<compile_context>
chip_gen: v7x
topology: tpu7x:2x2x1
jax: 0.10.0
libtpu: 0.0.40
codegen_flags: <defaults>
</compile_context>

<pallas_src>
import functools
import math

import jax
import jax.numpy as jnp
from jax.experimental import pallas as pl
from jax.experimental.pallas import tpu as pltpu


_LN_EPS = 1e-6  # timm ViT uses LayerNorm(eps=1e-6)


@functools.lru_cache(maxsize=1)
def _vmem_limit_bytes():
    """Generation-aware scoped-VMEM budget."""
    cap = 64 * 1024 * 1024
    try:
        info = pltpu.get_tpu_info()
        cap = int(getattr(info, "vmem_capacity_bytes", cap) or cap)
    except Exception:
        pass
    # ~48MB on v7x (64MiB physical / TC), up to 96MB on v5e/v6e (128MiB).
    return min((cap * 3) // 4, 96 * 1024 * 1024)


def _round_up(x, m):
    return ((x + m - 1) // m) * m


def _pick_tile(dim, pref, align):
    """Largest tile <= pref that divides dim and is a multiple of align."""
    if dim <= pref:
        return dim
    t = (pref // align) * align
    while t >= align:
        if dim % t == 0:
            return t
        t -= align
    return dim


# ---------------------------------------------------------------------------
# Fused (LayerNorm ->) matmul -> bias (-> GELU) (-> residual) kernel
# ---------------------------------------------------------------------------

def _make_fused_kernel(has_ln, has_res, activation, eps):
    def kernel(*refs):
        idx = 0
        x_ref = refs[idx]; idx += 1
        if has_ln:
            g_ref, bt_ref = refs[idx], refs[idx + 1]; idx += 2
        w_ref, b_ref = refs[idx], refs[idx + 1]; idx += 2
        if has_res:
            r_ref = refs[idx]; idx += 1
        o_ref = refs[idx]; idx += 1

        if has_ln:
            xn_ref = refs[idx]  # (tm, K) bf16 scratch: LN once per M tile

            @pl.when(pl.program_id(1) == 0)
            def _():
                x = x_ref[...].astype(jnp.float32)
                mean = jnp.mean(x, axis=-1, keepdims=True)
                var = jnp.mean(jnp.square(x - mean), axis=-1, keepdims=True)
                x = (x - mean) * jax.lax.rsqrt(var + eps)
                x = (x * g_ref[...].astype(jnp.float32)
                     + bt_ref[...].astype(jnp.float32))
                xn_ref[...] = x.astype(jnp.bfloat16)

            xb = xn_ref[...]
        else:
            xb = x_ref[...].astype(jnp.bfloat16)

        # bf16 MXU inputs, f32 accumulation.
        acc = jnp.dot(xb, w_ref[...], preferred_element_type=jnp.float32)
        acc = acc + b_ref[...].astype(jnp.float32)
        if activation == "gelu":
            # tanh-approx GELU -> EUP slot (erf polynomial would load the VALU).
            acc = jax.nn.gelu(acc, approximate=True)
        if has_res:
            acc = acc + r_ref[...].astype(jnp.float32)
        o_ref[...] = acc.astype(o_ref.dtype)

    return kernel


def fused_matmul(x, w, bias, *, gamma=None, beta=None, residual=None,
                 activation=None, out_dtype=jnp.float32, tm_pref=256):
    """out = act( LN(x) @ W + b ) + residual."""
    M, K = x.shape
    K2, N = w.shape
    assert K == K2
    has_ln = gamma is not None
    has_res = residual is not None

    vmem_budget = int(_vmem_limit_bytes() * 0.9)
    x_bytes = x.dtype.itemsize
    r_bytes = residual.dtype.itemsize if has_res else 0
    o_bytes = jnp.dtype(out_dtype).itemsize

    tm = tm_pref if M >= tm_pref else _round_up(M, 8)

    def vmem_need(tm_, tn_):
        need = 2 * tm_ * K * x_bytes            # x tile (double-buffered)
        need += 2 * K * tn_ * 2                 # bf16 weight tile
        need += 2 * tn_ * 4                     # bias
        need += 2 * tm_ * tn_ * o_bytes         # output tile
        if has_res:
            need += 2 * tm_ * tn_ * r_bytes
        if has_ln:
            need += tm_ * K * 2 + 4 * K * 4     # LN scratch + gamma/beta
        return need

    # Prefer a single full-N weight tile: X and W stream from HBM exactly once
    # and the fused LayerNorm runs once per M tile.
    if vmem_need(tm, N) <= vmem_budget:
        tn = N
    else:
        tn = _pick_tile(N, 512, 128)
        while vmem_need(tm, tn) > vmem_budget and tm > 8:
            tm = max(8, ((tm // 2) // 8) * 8)

    # Pad M to a multiple of tm (keeps tiles large/aligned for awkward M).
    Mp = _round_up(M, tm)
    if Mp != M:
        # TODO(synk): for very large activations pad once per layer, not per call.
        x = jnp.pad(x, ((0, Mp - M), (0, 0)))
        if has_res:
            residual = jnp.pad(residual, ((0, Mp - M), (0, 0)))

    grid = (Mp // tm, N // tn)

    in_specs = [pl.BlockSpec((tm, K), lambda i, j: (i, 0))]
    args = [x]
    if has_ln:
        in_specs += [pl.BlockSpec((1, K), lambda i, j: (0, 0)),
                     pl.BlockSpec((1, K), lambda i, j: (0, 0))]
        args += [gamma.reshape(1, K).astype(jnp.float32),
                 beta.reshape(1, K).astype(jnp.float32)]
    in_specs += [pl.BlockSpec((K, tn), lambda i, j: (0, j)),
                 pl.BlockSpec((1, tn), lambda i, j: (0, j))]
    args += [w.astype(jnp.bfloat16), bias.reshape(1, N).astype(jnp.float32)]
    if has_res:
        in_specs.append(pl.BlockSpec((tm, tn), lambda i, j: (i, j)))
        args.append(residual)

    scratch = [pltpu.VMEM((tm, K), jnp.bfloat16)] if has_ln else []

    out = pl.pallas_call(
        _make_fused_kernel(has_ln, has_res, activation, _LN_EPS),
        out_shape=jax.ShapeDtypeStruct((Mp, N), out_dtype),
        grid=grid,
        in_specs=in_specs,
        out_specs=pl.BlockSpec((tm, tn), lambda i, j: (i, j)),
        scratch_shapes=scratch,
        compiler_params=pltpu.CompilerParams(
            dimension_semantics=("parallel", "arbitrary"),
            vmem_limit_bytes=_vmem_limit_bytes()),
    )(*args)
    return out[:M] if Mp != M else out


# ---------------------------------------------------------------------------
# Multi-head attention: grid over (batch, head-group); all heads of one
# example are processed in a single grid step (amortizes per-step overhead).
# ---------------------------------------------------------------------------

def _attn_kernel(q_ref, k_ref, v_ref, o_ref, *, scale, heads, dh):
    q_all = q_ref[0]                       # (S, heads*dh)
    k_all = k_ref[0]
    v_all = v_ref[0]
    outs = []
    for h in range(heads):                 # static unroll over heads
        sl = slice(h * dh, (h + 1) * dh)
        # Fold the softmax scale into q in f32 before the bf16 MXU cast.
        q = (q_all[:, sl].astype(jnp.float32) * scale).astype(jnp.bfloat16)
        k = k_all[:, sl].astype(jnp.bfloat16)
        v = v_all[:, sl].astype(jnp.bfloat16)
        s = jax.lax.dot_general(q, k, (((1,), (1,)), ((), ())),
                                preferred_element_type=jnp.float32)   # (S, S)
        m = jnp.max(s, axis=-1, keepdims=True)
        p = jnp.exp(s - m)
        l = jnp.sum(p, axis=-1, keepdims=True)                        # (S, 1)
        o = jnp.dot(p.astype(jnp.bfloat16), v,
                    preferred_element_type=jnp.float32)               # (S, dh)
        # Normalize the (S,dh) output instead of the (S,S) probabilities.
        o = o * pl.reciprocal(l, approx=True)
        outs.append(o.astype(o_ref.dtype))
    o_ref[0] = jnp.concatenate(outs, axis=-1) if heads > 1 else outs[0]


def attention(qkv, num_heads, embed_dim):
    """qkv: (B, S, 3*D) row-major (Q | K | V, heads contiguous) -> (B, S, D) bf16."""
    B, S, _ = qkv.shape
    D = embed_dim
    H = num_heads
    dh = D // H
    assert D % 128 == 0, "embed dim must be lane-aligned (multiple of 128)"
    scale = dh ** -0.5

    # TODO(synk): switch to an online-softmax KV loop if S grows past ~1-2k.
    hb = H                                  # heads per grid step (all of them)
    ng = H // hb                            # head-groups (=1)
    blk = (1, S, hb * dh)

    return pl.pallas_call(
        functools.partial(_attn_kernel, scale=scale, heads=hb, dh=dh),
        out_shape=jax.ShapeDtypeStruct((B, S, D), jnp.bfloat16),
        grid=(B, ng),
        in_specs=[
            pl.BlockSpec(blk, lambda b, g: (b, 0, g)),             # Q slice
            pl.BlockSpec(blk, lambda b, g: (b, 0, ng + g)),        # K slice
            pl.BlockSpec(blk, lambda b, g: (b, 0, 2 * ng + g)),    # V slice
        ],
        out_specs=pl.BlockSpec(blk, lambda b, g: (b, 0, g)),
        compiler_params=pltpu.CompilerParams(
            dimension_semantics=("parallel", "parallel"),
            vmem_limit_bytes=_vmem_limit_bytes()),
    )(qkv, qkv, qkv)


# ---------------------------------------------------------------------------
# Model (glue in plain JAX, all dense/attention math in Pallas)
# ---------------------------------------------------------------------------

def init_params(key, *, img_size, patch_size, in_chans, embed_dim, depth,
                num_heads, mlp_ratio, latent_dim):
    n_patches = (img_size // patch_size) ** 2
    hidden = int(embed_dim * mlp_ratio)
    keys = iter(jax.random.split(key, 8 + 8 * depth))

    def w(shape, scale=0.02):
        return (scale * jax.random.normal(next(keys), shape, jnp.float32)
                ).astype(jnp.bfloat16)

    params = {
        "patch_w": w((in_chans * patch_size * patch_size, embed_dim)),
        "patch_b": jnp.zeros((embed_dim,), jnp.float32),
        "cls": 0.02 * jax.random.normal(next(keys), (1, 1, embed_dim), jnp.float32),
        "pos": 0.02 * jax.random.normal(next(keys), (1, n_patches + 1, embed_dim),
                                        jnp.float32),
        "norm_g": jnp.ones((embed_dim,), jnp.float32),
        "norm_b": jnp.zeros((embed_dim,), jnp.float32),
        "proj_w": w((embed_dim, latent_dim)),    # nn.Linear(num_features, latent_dim)
        "proj_b": jnp.zeros((latent_dim,), jnp.float32),
        "blocks": [],
    }
    for _ in range(depth):
        params["blocks"].append({
            "ln1_g": jnp.ones((embed_dim,), jnp.float32),
            "ln1_b": jnp.zeros((embed_dim,), jnp.float32),
            "qkv_w": w((embed_dim, 3 * embed_dim)),
            "qkv_b": jnp.zeros((3 * embed_dim,), jnp.float32),
            "attn_proj_w": w((embed_dim, embed_dim)),
            "attn_proj_b": jnp.zeros((embed_dim,), jnp.float32),
            "ln2_g": jnp.ones((embed_dim,), jnp.float32),
            "ln2_b": jnp.zeros((embed_dim,), jnp.float32),
            "fc1_w": w((embed_dim, hidden)),
            "fc1_b": jnp.zeros((hidden,), jnp.float32),
            "fc2_w": w((hidden, embed_dim)),
            "fc2_b": jnp.zeros((embed_dim,), jnp.float32),
        })
    return params


def transformer_block(p, x2d, B, S, D, num_heads):
    # --- attention: LN1 fused into QKV matmul, residual fused into attn-proj ---
    qkv = fused_matmul(x2d, p["qkv_w"], p["qkv_b"],
                       gamma=p["ln1_g"], beta=p["ln1_b"],
                       out_dtype=jnp.bfloat16)                      # (B*S, 3D) bf16
    attn = attention(qkv.reshape(B, S, 3 * D), num_heads, D)        # (B, S, D) bf16
    x2d = fused_matmul(attn.reshape(B * S, D),
                       p["attn_proj_w"], p["attn_proj_b"],
                       residual=x2d, out_dtype=jnp.float32)         # f32 residual stream

    # --- mlp: LN2+fc1+GELU fused, residual fused into fc2 ---
    h = fused_matmul(x2d, p["fc1_w"], p["fc1_b"],
                     gamma=p["ln2_g"], beta=p["ln2_b"],
                     activation="gelu", out_dtype=jnp.bfloat16)     # (B*S, 4D) bf16
    x2d = fused_matmul(h, p["fc2_w"], p["fc2_b"],
                       residual=x2d, out_dtype=jnp.float32)
    return x2d


def vit_to_deepcad_latent(params, x, *, patch_size, num_heads):
    """Forward: vit(x) -> dropout(identity @ eval) -> Linear projection."""
    B, C, H, W = x.shape
    P = patch_size
    nh, nw = H // P, W // P
    D = params["patch_w"].shape[1]

    # Patch embedding: conv(k=s=P) as a matmul over flattened (C,P,P) patches.
    # TODO(synk): at 224x224 fuse the patch extraction into the kernel (grid over
    # patches reading NCHW blocks) to avoid this host-side transpose round trip.
    patches = x.reshape(B, C, nh, P, nw, P).transpose(0, 2, 4, 1, 3, 5)
    patches = patches.reshape(B * nh * nw, C * P * P)
    tok = fused_matmul(patches, params["patch_w"], params["patch_b"])
    tok = tok.reshape(B, nh * nw, D)

    # cls token + positional embedding (tiny, kept in host JAX)
    cls = jnp.broadcast_to(params["cls"], (B, 1, D))
    x_seq = jnp.concatenate([cls, tok], axis=1) + params["pos"]     # (B, S, D) f32
    S = x_seq.shape[1]
    x2d = x_seq.reshape(B * S, D)

    for blk in params["blocks"]:
        x2d = transformer_block(blk, x2d, B, S, D, num_heads)

    # CLS pooling BEFORE the final LN (LN is per-row -> identical result),
    # final LN fused into the projection.  Dropout(p=0.15): identity at eval.
    features = x2d.reshape(B, S, D)[:, 0, :]                        # (B, D)
    latent = fused_matmul(features, params["proj_w"], params["proj_b"],
                          gamma=params["norm_g"], beta=params["norm_b"])
    return latent


# ---------------------------------------------------------------------------
# main
# ---------------------------------------------------------------------------

if __name__ == "__main__":
    # Small, lane-dense config consistent with the module structure.
    cfg = dict(img_size=32, patch_size=16, in_chans=3, embed_dim=256,
               depth=2, num_heads=2, mlp_ratio=4, latent_dim=256)

    key = jax.random.PRNGKey(0)
    pkey, xkey = jax.random.split(key)
    params = init_params(pkey, **cfg)

    x = jax.random.normal(xkey, (2, cfg["in_chans"], cfg["img_size"],
                                 cfg["img_size"]), jnp.float32)

    fwd = jax.jit(functools.partial(vit_to_deepcad_latent,
                                    patch_size=cfg["patch_size"],
                                    num_heads=cfg["num_heads"]))
    latent = jax.block_until_ready(fwd(params, x))

    assert latent.shape == (2, cfg["latent_dim"])
    assert bool(jnp.all(jnp.isfinite(latent)))
    print("KERNEL_OK")
</pallas_src>

<mosaic_0001>
module attributes {stable_mosaic.version = 11 : i64} {
  func.func @kernel(%arg0: i32, %arg1: i32, %arg2: memref<8x768xf32, #tpu.memory_space<vmem>>, %arg3: memref<768x256xbf16, #tpu.memory_space<vmem>>, %arg4: memref<1x256xf32, #tpu.memory_space<vmem>>, %arg5: memref<8x256xf32, #tpu.memory_space<vmem>>) attributes {dimension_semantics = [#tpu.dimension_semantics<parallel>, #tpu.dimension_semantics<arbitrary>], iteration_bounds = array<i64: 1, 1>, scalar_prefetch = 0 : i64, scratch_operands = 0 : i64, tpu.core_type = #tpu.core_type<tc>, window_params = [{transform_indices = @transform_0, window_bounds = array<i64: 8, 768>}, {transform_indices = @transform_1, window_bounds = array<i64: 768, 256>}, {transform_indices = @transform_2, window_bounds = array<i64: 1, 256>}, {transform_indices = @transform_3, window_bounds = array<i64: 8, 256>}]} {
    %c0 = arith.constant 0 : index
    %c0_0 = arith.constant 0 : index
    %0 = vector.load %arg2[%c0, %c0_0] : memref<8x768xf32, #tpu.memory_space<vmem>>, vector<8x768xf32>
    %1 = arith.truncf %0 : vector<8x768xf32> to vector<8x768xbf16>
    %c0_1 = arith.constant 0 : index
    %c0_2 = arith.constant 0 : index
    %2 = vector.load %arg3[%c0_1, %c0_2] : memref<768x256xbf16, #tpu.memory_space<vmem>>, vector<768x256xbf16>
    %cst = arith.constant dense<0.000000e+00> : vector<8x256xf32>
    %3 = tpu.matmul %1, %2, %cst {dimension_numbers = #tpu.dot_dimension_numbers<[1], [0], [0], [1], [0, 0, 1, 1], [], []>} : vector<8x768xbf16>, vector<768x256xbf16>, vector<8x256xf32> -> vector<8x256xf32>
    %c0_3 = arith.constant 0 : index
    %c0_4 = arith.constant 0 : index
    %4 = vector.load %arg4[%c0_3, %c0_4] : memref<1x256xf32, #tpu.memory_space<vmem>>, vector<1x256xf32>
    %5 = vector.broadcast %4 : vector<1x256xf32> to vector<8x256xf32>
    %6 = arith.addf %3, %5 : vector<8x256xf32>
    %c0_5 = arith.constant 0 : index
    %c0_6 = arith.constant 0 : index
    %7 = vector.load %arg5[%c0_5, %c0_6] : memref<8x256xf32, #tpu.memory_space<vmem>>, vector<8x256xf32>
    tpu.vector_store %arg5[%c0_5, %c0_6], %6 {strides = array<i32>} : memref<8x256xf32, #tpu.memory_space<vmem>>, vector<8x256xf32>,
    return
  }
  func.func @transform_0(%arg0: i32, %arg1: i32) -> (i32, i32) {
    %c0_i32 = arith.constant 0 : i32
    %c0_i32_0 = arith.constant 0 : i32
    return %arg0, %c0_i32 : i32, i32
  }
  func.func @transform_1(%arg0: i32, %arg1: i32) -> (i32, i32) {
    %c0_i32 = arith.constant 0 : i32
    %c0_i32_0 = arith.constant 0 : i32
    return %c0_i32, %arg1 : i32, i32
  }
  func.func @transform_2(%arg0: i32, %arg1: i32) -> (i32, i32) {
    %c0_i32 = arith.constant 0 : i32
    %c0_i32_0 = arith.constant 0 : i32
    return %c0_i32, %arg1 : i32, i32
  }
  func.func @transform_3(%arg0: i32, %arg1: i32) -> (i32, i32) {
    %c0_i32 = arith.constant 0 : i32
    return %arg0, %arg1 : i32, i32
  }
}

module attributes {stable_mosaic.version = 11 : i64} {
  func.func @kernel(%arg0: i32, %arg1: i32, %arg2: memref<16x256xf32, #tpu.memory_space<vmem>>, %arg3: memref<1x256xf32, #tpu.memory_space<vmem>>, %arg4: memref<1x256xf32, #tpu.memory_space<vmem>>, %arg5: memref<256x768xbf16, #tpu.memory_space<vmem>>, %arg6: memref<1x768xf32, #tpu.memory_space<vmem>>, %arg7: memref<16x768xbf16, #tpu.memory_space<vmem>>, %arg8: memref<16x256xbf16, #tpu.memory_space<vmem>>) attributes {dimension_semantics = [#tpu.dimension_semantics<parallel>, #tpu.dimension_semantics<arbitrary>], iteration_bounds = array<i64: 1, 1>, scalar_prefetch = 0 : i64, scratch_operands = 1 : i64, tpu.core_type = #tpu.core_type<tc>, window_params = [{transform_indices = @transform_0, window_bounds = array<i64: 16, 256>}, {pipeline_mode = #tpu.pipeline_mode<synchronous>, transform_indices = @transform_1, window_bounds = array<i64: 1, 256>}, {pipeline_mode = #tpu.pipeline_mode<synchronous>, transform_indices = @transform_2, window_bounds = array<i64: 1, 256>}, {transform_indices = @transform_3, window_bounds = array<i64: 256, 768>}, {transform_indices = @transform_4, window_bounds = array<i64: 1, 768>}, {transform_indices = @transform_5, window_bounds = array<i64: 16, 768>}]} {
    %c0_i32 = arith.constant 0 : i32
    %0 = arith.cmpi eq, %arg1, %c0_i32 : i32
    %1 = arith.extui %0 : i1 to i32
    %c0_i32_0 = arith.constant 0 : i32
    %2 = arith.cmpi ne, %1, %c0_i32_0 : i32
    scf.if %2 {
      %c0_8 = arith.constant 0 : index
      %c0_9 = arith.constant 0 : index
      %11 = vector.load %arg2[%c0_8, %c0_9] : memref<16x256xf32, #tpu.memory_space<vmem>>, vector<16x256xf32>
      %cst_10 = arith.constant dense<0.000000e+00> : vector<16xf32>
      %12 = vector.multi_reduction <add>, %11, %cst_10 [1] : vector<16x256xf32> to vector<16xf32>
      %13 = vector.shape_cast %12 : vector<16xf32> to vector<16x1xf32>
      %cst_11 = arith.constant 2.560000e+02 : f32
      %14 = vector.broadcast %cst_11 : f32 to vector<16x1xf32>
      %15 = arith.divf %13, %14 : vector<16x1xf32>
      %16 = vector.broadcast %15 : vector<16x1xf32> to vector<16x256xf32>
      %17 = arith.subf %11, %16 : vector<16x256xf32>
      %18 = arith.mulf %17, %17 : vector<16x256xf32>
      %cst_12 = arith.constant dense<0.000000e+00> : vector<16xf32>
      %19 = vector.multi_reduction <add>, %18, %cst_12 [1] : vector<16x256xf32> to vector<16xf32>
      %20 = vector.shape_cast %19 : vector<16xf32> to vector<16x1xf32>
      %cst_13 = arith.constant 2.560000e+02 : f32
      %21 = vector.broadcast %cst_13 : f32 to vector<16x1xf32>
      %22 = arith.divf %20, %21 : vector<16x1xf32>
      %23 = vector.broadcast %15 : vector<16x1xf32> to vector<16x256xf32>
      %24 = arith.subf %11, %23 : vector<16x256xf32>
      %cst_14 = arith.constant 9.99999997E-7 : f32
      %25 = vector.broadcast %cst_14 : f32 to vector<16x1xf32>
      %26 = arith.addf %22, %25 : vector<16x1xf32>
      %27 = math.rsqrt %26 : vector<16x1xf32>
      %28 = vector.broadcast %27 : vector<16x1xf32> to vector<16x256xf32>
      %29 = arith.mulf %24, %28 : vector<16x256xf32>
      %c0_15 = arith.constant 0 : index
      %c0_16 = arith.constant 0 : index
      %30 = vector.load %arg3[%c0_15, %c0_16] : memref<1x256xf32, #tpu.memory_space<vmem>>, vector<1x256xf32>
      %31 = vector.broadcast %30 : vector<1x256xf32> to vector<16x256xf32>
      %32 = arith.mulf %29, %31 : vector<16x256xf32>
      %c0_17 = arith.constant 0 : index
      %c0_18 = arith.constant 0 : index
      %33 = vector.load %arg4[%c0_17, %c0_18] : memref<1x256xf32, #tpu.memory_space<vmem>>, vector<1x256xf32>
      %34 = vector.broadcast %33 : vector<1x256xf32> to vector<16x256xf32>
      %35 = arith.addf %32, %34 : vector<16x256xf32>
      %36 = arith.truncf %35 : vector<16x256xf32> to vector<16x256xbf16>
      %c0_19 = arith.constant 0 : index
      %c0_20 = arith.constant 0 : index
      %37 = vector.load %arg8[%c0_19, %c0_20] : memref<16x256xbf16, #tpu.memory_space<vmem>>, vector<16x256xbf16>
      tpu.vector_store %arg8[%c0_19, %c0_20], %36 {strides = array<i32>} : memref<16x256xbf16, #tpu.memory_space<vmem>>, vector<16x256xbf16>,
    } else {
    }
    %c0 = arith.constant 0 : index
    %c0_1 = arith.constant 0 : index
    %3 = vector.load %arg8[%c0, %c0_1] : memref<16x256xbf16, #tpu.memory_space<vmem>>, vector<16x256xbf16>
    %c0_2 = arith.constant 0 : index
    %c0_3 = arith.constant 0 : index
    %4 = vector.load %arg5[%c0_2, %c0_3] : memref<256x768xbf16, #tpu.memory_space<vmem>>, vector<256x768xbf16>
    %cst = arith.constant dense<0.000000e+00> : vector<16x768xf32>
    %5 = tpu.matmul %3, %4, %cst {dimension_numbers = #tpu.dot_dimension_numbers<[1], [0], [0], [1], [0, 0, 1, 1], [], []>} : vector<16x256xbf16>, vector<256x768xbf16>, vector<16x768xf32> -> vector<16x768xf32>
    %c0_4 = arith.constant 0 : index
    %c0_5 = arith.constant 0 : index
    %6 = vector.load %arg6[%c0_4, %c0_5] : memref<1x768xf32, #tpu.memory_space<vmem>>, vector<1x768xf32>
    %7 = vector.broadcast %6 : vector<1x768xf32> to vector<16x768xf32>
    %8 = arith.addf %5, %7 : vector<16x768xf32>
    %9 = arith.truncf %8 : vector<16x768xf32> to vector<16x768xbf16>
    %c0_6 = arith.constant 0 : index
    %c0_7 = arith.constant 0 : index
    %10 = vector.load %arg7[%c0_6, %c0_7] : memref<16x768xbf16, #tpu.memory_space<vmem>>, vector<16x768xbf16>
    tpu.vector_store %arg7[%c0_6, %c0_7], %9 {strides = array<i32>} : memref<16x768xbf16, #tpu.memory_space<vmem>>, vector<16x768xbf16>,
    return
  }
  func.func @transform_0(%arg0: i32, %arg1: i32) -> (i32, i32) {
    %c0_i32 = arith.constant 0 : i32
    %c0_i32_0 = arith.constant 0 : i32
    return %arg0, %c0_i32 : i32, i32
  }
  func.func @transform_1(%arg0: i32, %arg1: i32) -> (i32, i32) {
    %c0_i32 = arith.constant 0 : i32
    %c0_i32_0 = arith.constant 0 : i32
    %c0_i32_1 = arith.constant 0 : i32
    return %c0_i32, %c0_i32_0 : i32, i32
  }
  func.func @transform_2(%arg0: i32, %arg1: i32) -> (i32, i32) {
    %c0_i32 = arith.constant 0 : i32
    %c0_i32_0 = arith.constant 0 : i32
    %c0_i32_1 = arith.constant 0 : i32
    return %c0_i32, %c0_i32_0 : i32, i32
  }
  func.func @transform_3(%arg0: i32, %arg1: i32) -> (i32, i32) {
    %c0_i32 = arith.constant 0 : i32
    %c0_i32_0 = arith.constant 0 : i32
    return %c0_i32, %arg1 : i32, i32
  }
  func.func @transform_4(%arg0: i32, %arg1: i32) -> (i32, i32) {
    %c0_i32 = arith.constant 0 : i32
    %c0_i32_0 = arith.constant 0 : i32
    return %c0_i32, %arg1 : i32, i32
  }
  func.func @transform_5(%arg0: i32, %arg1: i32) -> (i32, i32) {
    %c0_i32 = arith.constant 0 : i32
    return %arg0, %arg1 : i32, i32
  }
}

module attributes {stable_mosaic.version = 11 : i64} {
  func.func @_attn_kernel(%arg0: i32, %arg1: i32, %arg2: memref<1x5x256xbf16, #tpu.memory_space<vmem>>, %arg3: memref<1x5x256xbf16, #tpu.memory_space<vmem>>, %arg4: memref<1x5x256xbf16, #tpu.memory_space<vmem>>, %arg5: memref<1x5x256xbf16, #tpu.memory_space<vmem>>) attributes {dimension_semantics = [#tpu.dimension_semantics<parallel>, #tpu.dimension_semantics<parallel>], iteration_bounds = array<i64: 2, 1>, scalar_prefetch = 0 : i64, scratch_operands = 0 : i64, tpu.core_type = #tpu.core_type<tc>, window_params = [{transform_indices = @transform_0, window_bounds = array<i64: 1, 5, 256>}, {transform_indices = @transform_1, window_bounds = array<i64: 1, 5, 256>}, {transform_indices = @transform_2, window_bounds = array<i64: 1, 5, 256>}, {transform_indices = @transform_3, window_bounds = array<i64: 1, 5, 256>}]} {
    %c0 = arith.constant 0 : index
    %c0_0 = arith.constant 0 : index
    %c0_1 = arith.constant 0 : index
    %0 = vector.load %arg2[%c0, %c0_0, %c0_1] : memref<1x5x256xbf16, #tpu.memory_space<vmem>>, vector<1x5x256xbf16>
    %1 = vector.shape_cast %0 : vector<1x5x256xbf16> to vector<5x256xbf16>
    %c0_2 = arith.constant 0 : index
    %c0_3 = arith.constant 0 : index
    %c0_4 = arith.constant 0 : index
    %2 = vector.load %arg3[%c0_2, %c0_3, %c0_4] : memref<1x5x256xbf16, #tpu.memory_space<vmem>>, vector<1x5x256xbf16>
    %3 = vector.shape_cast %2 : vector<1x5x256xbf16> to vector<5x256xbf16>
    %c0_5 = arith.constant 0 : index
    %c0_6 = arith.constant 0 : index
    %c0_7 = arith.constant 0 : index
    %4 = vector.load %arg4[%c0_5, %c0_6, %c0_7] : memref<1x5x256xbf16, #tpu.memory_space<vmem>>, vector<1x5x256xbf16>
    %5 = vector.shape_cast %4 : vector<1x5x256xbf16> to vector<5x256xbf16>
    %6 = vector.extract_strided_slice %1 {offsets = [0, 0], sizes = [5, 128], strides = [1, 1]} : vector<5x256xbf16> to vector<5x128xbf16>
    %7 = arith.extf %6 : vector<5x128xbf16> to vector<5x128xf32>
    %cst = arith.constant 0.0883883461 : f32
    %8 = vector.broadcast %cst : f32 to vector<5x128xf32>
    %9 = arith.mulf %7, %8 : vector<5x128xf32>
    %10 = arith.truncf %9 : vector<5x128xf32> to vector<5x128xbf16>
    %11 = vector.extract_strided_slice %3 {offsets = [0, 0], sizes = [5, 128], strides = [1, 1]} : vector<5x256xbf16> to vector<5x128xbf16>
    %12 = vector.extract_strided_slice %5 {offsets = [0, 0], sizes = [5, 128], strides = [1, 1]} : vector<5x256xbf16> to vector<5x128xbf16>
    %cst_8 = arith.constant dense<0.000000e+00> : vector<5x5xf32>
    %13 = tpu.matmul %10, %11, %cst_8 {dimension_numbers = #tpu.dot_dimension_numbers<[1], [1], [0], [0], [0, 0, 1, 0], [], []>} : vector<5x128xbf16>, vector<5x128xbf16>, vector<5x5xf32> -> vector<5x5xf32>
    %cst_9 = arith.constant dense<0xFF800000> : vector<5xf32>
    %14 = vector.multi_reduction <maximumf>, %13, %cst_9 [1] : vector<5x5xf32> to vector<5xf32>
    %15 = vector.shape_cast %14 : vector<5xf32> to vector<5x1xf32>
    %16 = vector.broadcast %15 : vector<5x1xf32> to vector<5x5xf32>
    %17 = arith.subf %13, %16 : vector<5x5xf32>
    %18 = math.exp %17 : vector<5x5xf32>
    %cst_10 = arith.constant dense<0.000000e+00> : vector<5xf32>
    %19 = vector.multi_reduction <add>, %18, %cst_10 [1] : vector<5x5xf32> to vector<5xf32>
    %20 = vector.shape_cast %19 : vector<5xf32> to vector<5x1xf32>
    %21 = arith.truncf %18 : vector<5x5xf32> to vector<5x5xbf16>
    %cst_11 = arith.constant dense<0.000000e+00> : vector<5x128xf32>
    %22 = tpu.matmul %21, %12, %cst_11 {dimension_numbers = #tpu.dot_dimension_numbers<[1], [0], [0], [1], [0, 0, 1, 1], [], []>} : vector<5x5xbf16>, vector<5x128xbf16>, vector<5x128xf32> -> vector<5x128xf32>
    %23 = tpu.reciprocal %20 {approx = true} : vector<5x1xf32> -> vector<5x1xf32>
    %24 = vector.broadcast %23 : vector<5x1xf32> to vector<5x128xf32>
    %25 = arith.mulf %22, %24 : vector<5x128xf32>
    %26 = arith.truncf %25 : vector<5x128xf32> to vector<5x128xbf16>
    %27 = vector.extract_strided_slice %1 {offsets = [0, 128], sizes = [5, 128], strides = [1, 1]} : vector<5x256xbf16> to vector<5x128xbf16>
    %28 = arith.extf %27 : vector<5x128xbf16> to vector<5x128xf32>
    %cst_12 = arith.constant 0.0883883461 : f32
    %29 = vector.broadcast %cst_12 : f32 to vector<5x128xf32>
    %30 = arith.mulf %28, %29 : vector<5x128xf32>
    %31 = arith.truncf %30 : vector<5x128xf32> to vector<5x128xbf16>
    %32 = vector.extract_strided_slice %3 {offsets = [0, 128], sizes = [5, 128], strides = [1, 1]} : vector<5x256xbf16> to vector<5x128xbf16>
    %33 = vector.extract_strided_slice %5 {offsets = [0, 128], sizes = [5, 128], strides = [1, 1]} : vector<5x256xbf16> to vector<5x128xbf16>
    %cst_13 = arith.constant dense<0.000000e+00> : vector<5x5xf32>
    %34 = tpu.matmul %31, %32, %cst_13 {dimension_numbers = #tpu.dot_dimension_numbers<[1], [1], [0], [0], [0, 0, 1, 0], [], []>} : vector<5x128xbf16>, vector<5x128xbf16>, vector<5x5xf32> -> vector<5x5xf32>
    %cst_14 = arith.constant dense<0xFF800000> : vector<5xf32>
    %35 = vector.multi_reduction <maximumf>, %34, %cst_14 [1] : vector<5x5xf32> to vector<5xf32>
    %36 = vector.shape_cast %35 : vector<5xf32> to vector<5x1xf32>
    %37 = vector.broadcast %36 : vector<5x1xf32> to vector<5x5xf32>
    %38 = arith.subf %34, %37 : vector<5x5xf32>
    %39 = math.exp %38 : vector<5x5xf32>
    %cst_15 = arith.constant dense<0.000000e+00> : vector<5xf32>
    %40 = vector.multi_reduction <add>, %39, %cst_15 [1] : vector<5x5xf32> to vector<5xf32>
    %41 = vector.shape_cast %40 : vector<5xf32> to vector<5x1xf32>
    %42 = arith.truncf %39 : vector<5x5xf32> to vector<5x5xbf16>
    %cst_16 = arith.constant dense<0.000000e+00> : vector<5x128xf32>
    %43 = tpu.matmul %42, %33, %cst_16 {dimension_numbers = #tpu.dot_dimension_numbers<[1], [0], [0], [1], [0, 0, 1, 1], [], []>} : vector<5x5xbf16>, vector<5x128xbf16>, vector<5x128xf32> -> vector<5x128xf32>
    %44 = tpu.reciprocal %41 {approx = true} : vector<5x1xf32> -> vector<5x1xf32>
    %45 = vector.broadcast %44 : vector<5x1xf32> to vector<5x128xf32>
    %46 = arith.mulf %43, %45 : vector<5x128xf32>
    %47 = arith.truncf %46 : vector<5x128xf32> to vector<5x128xbf16>
    %48 = tpu.concatenate %26, %47 in 1 : vector<5x128xbf16>, vector<5x128xbf16> -> vector<5x256xbf16>
    %c0_17 = arith.constant 0 : index
    %c0_18 = arith.constant 0 : index
    %c0_19 = arith.constant 0 : index
    %49 = vector.load %arg5[%c0_17, %c0_18, %c0_19] : memref<1x5x256xbf16, #tpu.memory_space<vmem>>, vector<1x5x256xbf16>
    %50 = vector.shape_cast %49 : vector<1x5x256xbf16> to vector<5x256xbf16>
    %51 = vector.shape_cast %48 : vector<5x256xbf16> to vector<1x5x256xbf16>
    tpu.vector_store %arg5[%c0_17, %c0_18, %c0_19], %51 {strides = array<i32>} : memref<1x5x256xbf16, #tpu.memory_space<vmem>>, vector<1x5x256xbf16>,
    return
  }
  func.func @transform_0(%arg0: i32, %arg1: i32) -> (i32, i32, i32) {
    %c0_i32 = arith.constant 0 : i32
    %c0_i32_0 = arith.constant 0 : i32
    return %arg0, %c0_i32, %arg1 : i32, i32, i32
  }
  func.func @transform_1(%arg0: i32, %arg1: i32) -> (i32, i32, i32) {
    %c1_i32 = arith.constant 1 : i32
    %0 = arith.addi %c1_i32, %arg1 : i32
    %c0_i32 = arith.constant 0 : i32
    %c0_i32_0 = arith.constant 0 : i32
    return %arg0, %c0_i32, %0 : i32, i32, i32
  }
  func.func @transform_2(%arg0: i32, %arg1: i32) -> (i32, i32, i32) {
    %c2_i32 = arith.constant 2 : i32
    %0 = arith.addi %c2_i32, %arg1 : i32
    %c0_i32 = arith.constant 0 : i32
    %c0_i32_0 = arith.constant 0 : i32
    return %arg0, %c0_i32, %0 : i32, i32, i32
  }
  func.func @transform_3(%arg0: i32, %arg1: i32) -> (i32, i32, i32) {
    %c0_i32 = arith.constant 0 : i32
    %c0_i32_0 = arith.constant 0 : i32
    return %arg0, %c0_i32, %arg1 : i32, i32, i32
  }
}

module attributes {stable_mosaic.version = 11 : i64} {
  func.func @kernel(%arg0: i32, %arg1: i32, %arg2: memref<16x256xbf16, #tpu.memory_space<vmem>>, %arg3: memref<256x256xbf16, #tpu.memory_space<vmem>>, %arg4: memref<1x256xf32, #tpu.memory_space<vmem>>, %arg5: memref<16x256xf32, #tpu.memory_space<vmem>>, %arg6: memref<16x256xf32, #tpu.memory_space<vmem>>) attributes {dimension_semantics = [#tpu.dimension_semantics<parallel>, #tpu.dimension_semantics<arbitrary>], iteration_bounds = array<i64: 1, 1>, scalar_prefetch = 0 : i64, scratch_operands = 0 : i64, tpu.core_type = #tpu.core_type<tc>, window_params = [{transform_indices = @transform_0, window_bounds = array<i64: 16, 256>}, {transform_indices = @transform_1, window_bounds = array<i64: 256, 256>}, {transform_indices = @transform_2, window_bounds = array<i64: 1, 256>}, {transform_indices = @transform_3, window_bounds = array<i64: 16, 256>}, {transform_indices = @transform_4, window_bounds = array<i64: 16, 256>}]} {
    %c0 = arith.constant 0 : index
    %c0_0 = arith.constant 0 : index
    %0 = vector.load %arg2[%c0, %c0_0] : memref<16x256xbf16, #tpu.memory_space<vmem>>, vector<16x256xbf16>
    %c0_1 = arith.constant 0 : index
    %c0_2 = arith.constant 0 : index
    %1 = vector.load %arg3[%c0_1, %c0_2] : memref<256x256xbf16, #tpu.memory_space<vmem>>, vector<256x256xbf16>
    %cst = arith.constant dense<0.000000e+00> : vector<16x256xf32>
    %2 = tpu.matmul %0, %1, %cst {dimension_numbers = #tpu.dot_dimension_numbers<[1], [0], [0], [1], [0, 0, 1, 1], [], []>} : vector<16x256xbf16>, vector<256x256xbf16>, vector<16x256xf32> -> vector<16x256xf32>
    %c0_3 = arith.constant 0 : index
    %c0_4 = arith.constant 0 : index
    %3 = vector.load %arg4[%c0_3, %c0_4] : memref<1x256xf32, #tpu.memory_space<vmem>>, vector<1x256xf32>
    %4 = vector.broadcast %3 : vector<1x256xf32> to vector<16x256xf32>
    %5 = arith.addf %2, %4 : vector<16x256xf32>
    %c0_5 = arith.constant 0 : index
    %c0_6 = arith.constant 0 : index
    %6 = vector.load %arg5[%c0_5, %c0_6] : memref<16x256xf32, #tpu.memory_space<vmem>>, vector<16x256xf32>
    %7 = arith.addf %5, %6 : vector<16x256xf32>
    %c0_7 = arith.constant 0 : index
    %c0_8 = arith.constant 0 : index
    %8 = vector.load %arg6[%c0_7, %c0_8] : memref<16x256xf32, #tpu.memory_space<vmem>>, vector<16x256xf32>
    tpu.vector_store %arg6[%c0_7, %c0_8], %7 {strides = array<i32>} : memref<16x256xf32, #tpu.memory_space<vmem>>, vector<16x256xf32>,
    return
  }
  func.func @transform_0(%arg0: i32, %arg1: i32) -> (i32, i32) {
    %c0_i32 = arith.constant 0 : i32
    %c0_i32_0 = arith.constant 0 : i32
    return %arg0, %c0_i32 : i32, i32
  }
  func.func @transform_1(%arg0: i32, %arg1: i32) -> (i32, i32) {
    %c0_i32 = arith.constant 0 : i32
    %c0_i32_0 = arith.constant 0 : i32
    return %c0_i32, %arg1 : i32, i32
  }
  func.func @transform_2(%arg0: i32, %arg1: i32) -> (i32, i32) {
    %c0_i32 = arith.constant 0 : i32
    %c0_i32_0 = arith.constant 0 : i32
    return %c0_i32, %arg1 : i32, i32
  }
  func.func @transform_3(%arg0: i32, %arg1: i32) -> (i32, i32) {
    %c0_i32 = arith.constant 0 : i32
    return %arg0, %arg1 : i32, i32
  }
  func.func @transform_4(%arg0: i32, %arg1: i32) -> (i32, i32) {
    %c0_i32 = arith.constant 0 : i32
    return %arg0, %arg1 : i32, i32
  }
}

module attributes {stable_mosaic.version = 11 : i64} {
  func.func @kernel(%arg0: i32, %arg1: i32, %arg2: memref<16x256xf32, #tpu.memory_space<vmem>>, %arg3: memref<1x256xf32, #tpu.memory_space<vmem>>, %arg4: memref<1x256xf32, #tpu.memory_space<vmem>>, %arg5: memref<256x1024xbf16, #tpu.memory_space<vmem>>, %arg6: memref<1x1024xf32, #tpu.memory_space<vmem>>, %arg7: memref<16x1024xbf16, #tpu.memory_space<vmem>>, %arg8: memref<16x256xbf16, #tpu.memory_space<vmem>>) attributes {dimension_semantics = [#tpu.dimension_semantics<parallel>, #tpu.dimension_semantics<arbitrary>], iteration_bounds = array<i64: 1, 1>, scalar_prefetch = 0 : i64, scratch_operands = 1 : i64, tpu.core_type = #tpu.core_type<tc>, window_params = [{transform_indices = @transform_0, window_bounds = array<i64: 16, 256>}, {pipeline_mode = #tpu.pipeline_mode<synchronous>, transform_indices = @transform_1, window_bounds = array<i64: 1, 256>}, {pipeline_mode = #tpu.pipeline_mode<synchronous>, transform_indices = @transform_2, window_bounds = array<i64: 1, 256>}, {transform_indices = @transform_3, window_bounds = array<i64: 256, 1024>}, {transform_indices = @transform_4, window_bounds = array<i64: 1, 1024>}, {transform_indices = @transform_5, window_bounds = array<i64: 16, 1024>}]} {
    %c0_i32 = arith.constant 0 : i32
    %0 = arith.cmpi eq, %arg1, %c0_i32 : i32
    %1 = arith.extui %0 : i1 to i32
    %c0_i32_0 = arith.constant 0 : i32
    %2 = arith.cmpi ne, %1, %c0_i32_0 : i32
    scf.if %2 {
      %c0_12 = arith.constant 0 : index
      %c0_13 = arith.constant 0 : index
      %24 = vector.load %arg2[%c0_12, %c0_13] : memref<16x256xf32, #tpu.memory_space<vmem>>, vector<16x256xf32>
      %cst_14 = arith.constant dense<0.000000e+00> : vector<16xf32>
      %25 = vector.multi_reduction <add>, %24, %cst_14 [1] : vector<16x256xf32> to vector<16xf32>
      %26 = vector.shape_cast %25 : vector<16xf32> to vector<16x1xf32>
      %cst_15 = arith.constant 2.560000e+02 : f32
      %27 = vector.broadcast %cst_15 : f32 to vector<16x1xf32>
      %28 = arith.divf %26, %27 : vector<16x1xf32>
      %29 = vector.broadcast %28 : vector<16x1xf32> to vector<16x256xf32>
      %30 = arith.subf %24, %29 : vector<16x256xf32>
      %31 = arith.mulf %30, %30 : vector<16x256xf32>
      %cst_16 = arith.constant dense<0.000000e+00> : vector<16xf32>
      %32 = vector.multi_reduction <add>, %31, %cst_16 [1] : vector<16x256xf32> to vector<16xf32>
      %33 = vector.shape_cast %32 : vector<16xf32> to vector<16x1xf32>
      %cst_17 = arith.constant 2.560000e+02 : f32
      %34 = vector.broadcast %cst_17 : f32 to vector<16x1xf32>
      %35 = arith.divf %33, %34 : vector<16x1xf32>
      %36 = vector.broadcast %28 : vector<16x1xf32> to vector<16x256xf32>
      %37 = arith.subf %24, %36 : vector<16x256xf32>
      %cst_18 = arith.constant 9.99999997E-7 : f32
      %38 = vector.broadcast %cst_18 : f32 to vector<16x1xf32>
      %39 = arith.addf %35, %38 : vector<16x1xf32>
      %40 = math.rsqrt %39 : vector<16x1xf32>
      %41 = vector.broadcast %40 : vector<16x1xf32> to vector<16x256xf32>
      %42 = arith.mulf %37, %41 : vector<16x256xf32>
      %c0_19 = arith.constant 0 : index
      %c0_20 = arith.constant 0 : index
      %43 = vector.load %arg3[%c0_19, %c0_20] : memref<1x256xf32, #tpu.memory_space<vmem>>, vector<1x256xf32>
      %44 = vector.broadcast %43 : vector<1x256xf32> to vector<16x256xf32>
      %45 = arith.mulf %42, %44 : vector<16x256xf32>
      %c0_21 = arith.constant 0 : index
      %c0_22 = arith.constant 0 : index
      %46 = vector.load %arg4[%c0_21, %c0_22] : memref<1x256xf32, #tpu.memory_space<vmem>>, vector<1x256xf32>
      %47 = vector.broadcast %46 : vector<1x256xf32> to vector<16x256xf32>
      %48 = arith.addf %45, %47 : vector<16x256xf32>
      %49 = arith.truncf %48 : vector<16x256xf32> to vector<16x256xbf16>
      %c0_23 = arith.constant 0 : index
      %c0_24 = arith.constant 0 : index
      %50 = vector.load %arg8[%c0_23, %c0_24] : memref<16x256xbf16, #tpu.memory_space<vmem>>, vector<16x256xbf16>
      tpu.vector_store %arg8[%c0_23, %c0_24], %49 {strides = array<i32>} : memref<16x256xbf16, #tpu.memory_space<vmem>>, vector<16x256xbf16>,
    } else {
    }
    %c0 = arith.constant 0 : index
    %c0_1 = arith.constant 0 : index
    %3 = vector.load %arg8[%c0, %c0_1] : memref<16x256xbf16, #tpu.memory_space<vmem>>, vector<16x256xbf16>
    %c0_2 = arith.constant 0 : index
    %c0_3 = arith.constant 0 : index
    %4 = vector.load %arg5[%c0_2, %c0_3] : memref<256x1024xbf16, #tpu.memory_space<vmem>>, vector<256x1024xbf16>
    %cst = arith.constant dense<0.000000e+00> : vector<16x1024xf32>
    %5 = tpu.matmul %3, %4, %cst {dimension_numbers = #tpu.dot_dimension_numbers<[1], [0], [0], [1], [0, 0, 1, 1], [], []>} : vector<16x256xbf16>, vector<256x1024xbf16>, vector<16x1024xf32> -> vector<16x1024xf32>
    %c0_4 = arith.constant 0 : index
    %c0_5 = arith.constant 0 : index
    %6 = vector.load %arg6[%c0_4, %c0_5] : memref<1x1024xf32, #tpu.memory_space<vmem>>, vector<1x1024xf32>
    %7 = vector.broadcast %6 : vector<1x1024xf32> to vector<16x1024xf32>
    %8 = arith.addf %5, %7 : vector<16x1024xf32>
    %9 = arith.mulf %8, %8 : vector<16x1024xf32>
    %10 = arith.mulf %8, %9 : vector<16x1024xf32>
    %cst_6 = arith.constant 4.471500e-02 : f32
    %11 = vector.broadcast %cst_6 : f32 to vector<16x1024xf32>
    %12 = arith.mulf %11, %10 : vector<16x1024xf32>
    %13 = arith.addf %8, %12 : vector<16x1024xf32>
    %cst_7 = arith.constant 0.797884583 : f32
    %14 = vector.broadcast %cst_7 : f32 to vector<16x1024xf32>
    %15 = arith.mulf %14, %13 : vector<16x1024xf32>
    %16 = math.tanh %15 : vector<16x1024xf32>
    %cst_8 = arith.constant 1.000000e+00 : f32
    %17 = vector.broadcast %cst_8 : f32 to vector<16x1024xf32>
    %18 = arith.addf %17, %16 : vector<16x1024xf32>
    %cst_9 = arith.constant 5.000000e-01 : f32
    %19 = vector.broadcast %cst_9 : f32 to vector<16x1024xf32>
    %20 = arith.mulf %19, %18 : vector<16x1024xf32>
    %21 = arith.mulf %8, %20 : vector<16x1024xf32>
    %22 = arith.truncf %21 : vector<16x1024xf32> to vector<16x1024xbf16>
    %c0_10 = arith.constant 0 : index
    %c0_11 = arith.constant 0 : index
    %23 = vector.load %arg7[%c0_10, %c0_11] : memref<16x1024xbf16, #tpu.memory_space<vmem>>, vector<16x1024xbf16>
    tpu.vector_store %arg7[%c0_10, %c0_11], %22 {strides = array<i32>} : memref<16x1024xbf16, #tpu.memory_space<vmem>>, vector<16x1024xbf16>,
    return
  }
  func.func @transform_0(%arg0: i32, %arg1: i32) -> (i32, i32) {
    %c0_i32 = arith.constant 0 : i32
    %c0_i32_0 = arith.constant 0 : i32
    return %arg0, %c0_i32 : i32, i32
  }
  func.func @transform_1(%arg0: i32, %arg1: i32) -> (i32, i32) {
    %c0_i32 = arith.constant 0 : i32
    %c0_i32_0 = arith.constant 0 : i32
    %c0_i32_1 = arith.constant 0 : i32
    return %c0_i32, %c0_i32_0 : i32, i32
  }
  func.func @transform_2(%arg0: i32, %arg1: i32) -> (i32, i32) {
    %c0_i32 = arith.constant 0 : i32
    %c0_i32_0 = arith.constant 0 : i32
    %c0_i32_1 = arith.constant 0 : i32
    return %c0_i32, %c0_i32_0 : i32, i32
  }
  func.func @transform_3(%arg0: i32, %arg1: i32) -> (i32, i32) {
    %c0_i32 = arith.constant 0 : i32
    %c0_i32_0 = arith.constant 0 : i32
    return %c0_i32, %arg1 : i32, i32
  }
  func.func @transform_4(%arg0: i32, %arg1: i32) -> (i32, i32) {
    %c0_i32 = arith.constant 0 : i32
    %c0_i32_0 = arith.constant 0 : i32
    return %c0_i32, %arg1 : i32, i32
  }
  func.func @transform_5(%arg0: i32, %arg1: i32) -> (i32, i32) {
    %c0_i32 = arith.constant 0 : i32
    return %arg0, %arg1 : i32, i32
  }
}

module attributes {stable_mosaic.version = 11 : i64} {
  func.func @kernel(%arg0: i32, %arg1: i32, %arg2: memref<16x1024xbf16, #tpu.memory_space<vmem>>, %arg3: memref<1024x256xbf16, #tpu.memory_space<vmem>>, %arg4: memref<1x256xf32, #tpu.memory_space<vmem>>, %arg5: memref<16x256xf32, #tpu.memory_space<vmem>>, %arg6: memref<16x256xf32, #tpu.memory_space<vmem>>) attributes {dimension_semantics = [#tpu.dimension_semantics<parallel>, #tpu.dimension_semantics<arbitrary>], iteration_bounds = array<i64: 1, 1>, scalar_prefetch = 0 : i64, scratch_operands = 0 : i64, tpu.core_type = #tpu.core_type<tc>, window_params = [{transform_indices = @transform_0, window_bounds = array<i64: 16, 1024>}, {transform_indices = @transform_1, window_bounds = array<i64: 1024, 256>}, {transform_indices = @transform_2, window_bounds = array<i64: 1, 256>}, {transform_indices = @transform_3, window_bounds = array<i64: 16, 256>}, {transform_indices = @transform_4, window_bounds = array<i64: 16, 256>}]} {
    %c0 = arith.constant 0 : index
    %c0_0 = arith.constant 0 : index
    %0 = vector.load %arg2[%c0, %c0_0] : memref<16x1024xbf16, #tpu.memory_space<vmem>>, vector<16x1024xbf16>
    %c0_1 = arith.constant 0 : index
    %c0_2 = arith.constant 0 : index
    %1 = vector.load %arg3[%c0_1, %c0_2] : memref<1024x256xbf16, #tpu.memory_space<vmem>>, vector<1024x256xbf16>
    %cst = arith.constant dense<0.000000e+00> : vector<16x256xf32>
    %2 = tpu.matmul %0, %1, %cst {dimension_numbers = #tpu.dot_dimension_numbers<[1], [0], [0], [1], [0, 0, 1, 1], [], []>} : vector<16x1024xbf16>, vector<1024x256xbf16>, vector<16x256xf32> -> vector<16x256xf32>
    %c0_3 = arith.constant 0 : index
    %c0_4 = arith.constant 0 : index
    %3 = vector.load %arg4[%c0_3, %c0_4] : memref<1x256xf32, #tpu.memory_space<vmem>>, vector<1x256xf32>
    %4 = vector.broadcast %3 : vector<1x256xf32> to vector<16x256xf32>
    %5 = arith.addf %2, %4 : vector<16x256xf32>
    %c0_5 = arith.constant 0 : index
    %c0_6 = arith.constant 0 : index
    %6 = vector.load %arg5[%c0_5, %c0_6] : memref<16x256xf32, #tpu.memory_space<vmem>>, vector<16x256xf32>
    %7 = arith.addf %5, %6 : vector<16x256xf32>
    %c0_7 = arith.constant 0 : index
    %c0_8 = arith.constant 0 : index
    %8 = vector.load %arg6[%c0_7, %c0_8] : memref<16x256xf32, #tpu.memory_space<vmem>>, vector<16x256xf32>
    tpu.vector_store %arg6[%c0_7, %c0_8], %7 {strides = array<i32>} : memref<16x256xf32, #tpu.memory_space<vmem>>, vector<16x256xf32>,
    return
  }
  func.func @transform_0(%arg0: i32, %arg1: i32) -> (i32, i32) {
    %c0_i32 = arith.constant 0 : i32
    %c0_i32_0 = arith.constant 0 : i32
    return %arg0, %c0_i32 : i32, i32
  }
  func.func @transform_1(%arg0: i32, %arg1: i32) -> (i32, i32) {
    %c0_i32 = arith.constant 0 : i32
    %c0_i32_0 = arith.constant 0 : i32
    return %c0_i32, %arg1 : i32, i32
  }
  func.func @transform_2(%arg0: i32, %arg1: i32) -> (i32, i32) {
    %c0_i32 = arith.constant 0 : i32
    %c0_i32_0 = arith.constant 0 : i32
    return %c0_i32, %arg1 : i32, i32
  }
  func.func @transform_3(%arg0: i32, %arg1: i32) -> (i32, i32) {
    %c0_i32 = arith.constant 0 : i32
    return %arg0, %arg1 : i32, i32
  }
  func.func @transform_4(%arg0: i32, %arg1: i32) -> (i32, i32) {
    %c0_i32 = arith.constant 0 : i32
    return %arg0, %arg1 : i32, i32
  }
}

module attributes {stable_mosaic.version = 11 : i64} {
  func.func @kernel(%arg0: i32, %arg1: i32, %arg2: memref<8x256xf32, #tpu.memory_space<vmem>>, %arg3: memref<1x256xf32, #tpu.memory_space<vmem>>, %arg4: memref<1x256xf32, #tpu.memory_space<vmem>>, %arg5: memref<256x256xbf16, #tpu.memory_space<vmem>>, %arg6: memref<1x256xf32, #tpu.memory_space<vmem>>, %arg7: memref<8x256xf32, #tpu.memory_space<vmem>>, %arg8: memref<8x256xbf16, #tpu.memory_space<vmem>>) attributes {dimension_semantics = [#tpu.dimension_semantics<parallel>, #tpu.dimension_semantics<arbitrary>], iteration_bounds = array<i64: 1, 1>, scalar_prefetch = 0 : i64, scratch_operands = 1 : i64, tpu.core_type = #tpu.core_type<tc>, window_params = [{transform_indices = @transform_0, window_bounds = array<i64: 8, 256>}, {pipeline_mode = #tpu.pipeline_mode<synchronous>, transform_indices = @transform_1, window_bounds = array<i64: 1, 256>}, {pipeline_mode = #tpu.pipeline_mode<synchronous>, transform_indices = @transform_2, window_bounds = array<i64: 1, 256>}, {transform_indices = @transform_3, window_bounds = array<i64: 256, 256>}, {transform_indices = @transform_4, window_bounds = array<i64: 1, 256>}, {transform_indices = @transform_5, window_bounds = array<i64: 8, 256>}]} {
    %c0_i32 = arith.constant 0 : i32
    %0 = arith.cmpi eq, %arg1, %c0_i32 : i32
    %1 = arith.extui %0 : i1 to i32
    %c0_i32_0 = arith.constant 0 : i32
    %2 = arith.cmpi ne, %1, %c0_i32_0 : i32
    scf.if %2 {
      %c0_8 = arith.constant 0 : index
      %c0_9 = arith.constant 0 : index
      %10 = vector.load %arg2[%c0_8, %c0_9] : memref<8x256xf32, #tpu.memory_space<vmem>>, vector<8x256xf32>
      %cst_10 = arith.constant dense<0.000000e+00> : vector<8xf32>
      %11 = vector.multi_reduction <add>, %10, %cst_10 [1] : vector<8x256xf32> to vector<8xf32>
      %12 = vector.shape_cast %11 : vector<8xf32> to vector<8x1xf32>
      %cst_11 = arith.constant 2.560000e+02 : f32
      %13 = vector.broadcast %cst_11 : f32 to vector<8x1xf32>
      %14 = arith.divf %12, %13 : vector<8x1xf32>
      %15 = vector.broadcast %14 : vector<8x1xf32> to vector<8x256xf32>
      %16 = arith.subf %10, %15 : vector<8x256xf32>
      %17 = arith.mulf %16, %16 : vector<8x256xf32>
      %cst_12 = arith.constant dense<0.000000e+00> : vector<8xf32>
      %18 = vector.multi_reduction <add>, %17, %cst_12 [1] : vector<8x256xf32> to vector<8xf32>
      %19 = vector.shape_cast %18 : vector<8xf32> to vector<8x1xf32>
      %cst_13 = arith.constant 2.560000e+02 : f32
      %20 = vector.broadcast %cst_13 : f32 to vector<8x1xf32>
      %21 = arith.divf %19, %20 : vector<8x1xf32>
      %22 = vector.broadcast %14 : vector<8x1xf32> to vector<8x256xf32>
      %23 = arith.subf %10, %22 : vector<8x256xf32>
      %cst_14 = arith.constant 9.99999997E-7 : f32
      %24 = vector.broadcast %cst_14 : f32 to vector<8x1xf32>
      %25 = arith.addf %21, %24 : vector<8x1xf32>
      %26 = math.rsqrt %25 : vector<8x1xf32>
      %27 = vector.broadcast %26 : vector<8x1xf32> to vector<8x256xf32>
      %28 = arith.mulf %23, %27 : vector<8x256xf32>
      %c0_15 = arith.constant 0 : index
      %c0_16 = arith.constant 0 : index
      %29 = vector.load %arg3[%c0_15, %c0_16] : memref<1x256xf32, #tpu.memory_space<vmem>>, vector<1x256xf32>
      %30 = vector.broadcast %29 : vector<1x256xf32> to vector<8x256xf32>
      %31 = arith.mulf %28, %30 : vector<8x256xf32>
      %c0_17 = arith.constant 0 : index
      %c0_18 = arith.constant 0 : index
      %32 = vector.load %arg4[%c0_17, %c0_18] : memref<1x256xf32, #tpu.memory_space<vmem>>, vector<1x256xf32>
      %33 = vector.broadcast %32 : vector<1x256xf32> to vector<8x256xf32>
      %34 = arith.addf %31, %33 : vector<8x256xf32>
      %35 = arith.truncf %34 : vector<8x256xf32> to vector<8x256xbf16>
      %c0_19 = arith.constant 0 : index
      %c0_20 = arith.constant 0 : index
      %36 = vector.load %arg8[%c0_19, %c0_20] : memref<8x256xbf16, #tpu.memory_space<vmem>>, vector<8x256xbf16>
      tpu.vector_store %arg8[%c0_19, %c0_20], %35 {strides = array<i32>} : memref<8x256xbf16, #tpu.memory_space<vmem>>, vector<8x256xbf16>,
    } else {
    }
    %c0 = arith.constant 0 : index
    %c0_1 = arith.constant 0 : index
    %3 = vector.load %arg8[%c0, %c0_1] : memref<8x256xbf16, #tpu.memory_space<vmem>>, vector<8x256xbf16>
    %c0_2 = arith.constant 0 : index
    %c0_3 = arith.constant 0 : index
    %4 = vector.load %arg5[%c0_2, %c0_3] : memref<256x256xbf16, #tpu.memory_space<vmem>>, vector<256x256xbf16>
    %cst = arith.constant dense<0.000000e+00> : vector<8x256xf32>
    %5 = tpu.matmul %3, %4, %cst {dimension_numbers = #tpu.dot_dimension_numbers<[1], [0], [0], [1], [0, 0, 1, 1], [], []>} : vector<8x256xbf16>, vector<256x256xbf16>, vector<8x256xf32> -> vector<8x256xf32>
    %c0_4 = arith.constant 0 : index
    %c0_5 = arith.constant 0 : index
    %6 = vector.load %arg6[%c0_4, %c0_5] : memref<1x256xf32, #tpu.memory_space<vmem>>, vector<1x256xf32>
    %7 = vector.broadcast %6 : vector<1x256xf32> to vector<8x256xf32>
    %8 = arith.addf %5, %7 : vector<8x256xf32>
    %c0_6 = arith.constant 0 : index
    %c0_7 = arith.constant 0 : index
    %9 = vector.load %arg7[%c0_6, %c0_7] : memref<8x256xf32, #tpu.memory_space<vmem>>, vector<8x256xf32>
    tpu.vector_store %arg7[%c0_6, %c0_7], %8 {strides = array<i32>} : memref<8x256xf32, #tpu.memory_space<vmem>>, vector<8x256xf32>,
    return
  }
  func.func @transform_0(%arg0: i32, %arg1: i32) -> (i32, i32) {
    %c0_i32 = arith.constant 0 : i32
    %c0_i32_0 = arith.constant 0 : i32
    return %arg0, %c0_i32 : i32, i32
  }
  func.func @transform_1(%arg0: i32, %arg1: i32) -> (i32, i32) {
    %c0_i32 = arith.constant 0 : i32
    %c0_i32_0 = arith.constant 0 : i32
    %c0_i32_1 = arith.constant 0 : i32
    return %c0_i32, %c0_i32_0 : i32, i32
  }
  func.func @transform_2(%arg0: i32, %arg1: i32) -> (i32, i32) {
    %c0_i32 = arith.constant 0 : i32
    %c0_i32_0 = arith.constant 0 : i32
    %c0_i32_1 = arith.constant 0 : i32
    return %c0_i32, %c0_i32_0 : i32, i32
  }
  func.func @transform_3(%arg0: i32, %arg1: i32) -> (i32, i32) {
    %c0_i32 = arith.constant 0 : i32
    %c0_i32_0 = arith.constant 0 : i32
    return %c0_i32, %arg1 : i32, i32
  }
  func.func @transform_4(%arg0: i32, %arg1: i32) -> (i32, i32) {
    %c0_i32 = arith.constant 0 : i32
    %c0_i32_0 = arith.constant 0 : i32
    return %c0_i32, %arg1 : i32, i32
  }
  func.func @transform_5(%arg0: i32, %arg1: i32) -> (i32, i32) {
    %c0_i32 = arith.constant 0 : i32
    return %arg0, %arg1 : i32, i32
  }
}

</mosaic_0001>

<bundles_post_ra>
// kernel: vit_to_deepcad_latent.12
= control target key start
LH: loop header
LB: loop body
LE: loop exit
PB: predicated region body
PF: predicated region fallthrough
CT: control target
= control target key end

     0   :  { %s1326_s1 = inlined_call_operand.vmem [shape: bf16[768,256], index: 1, kind: input, shape index: {}]   ;;  %s1327_s0 = inlined_call_operand.vmem [shape: f32[8,768], index: 0, kind: input, shape index: {}]   ;;  %s1328_s2 = inlined_call_operand.vmem [shape: f32[1,256], index: 2, kind: input, shape index: {}]   ;;  %s1329_s3 = inlined_call_operand.vmem [shape: f32[8,256], index: 3, kind: output, shape index: {}]  }
   0x1   :  { %v847_v0 = vld [vmem:[%s1326_s1 + $0x104] ss:$8 sps:$4 sm:$0xff]   ;;  %v849_v1 = vld [vmem:[%s1326_s1 + $0x100] ss:$8 sps:$4 sm:$0xff]   ;;  %v850_v2 = vld [vmem:[%s1326_s1 + $0x114] ss:$8 sps:$4 sm:$0xff]  }
   0x2   :  { %655 = vmatprep.subr.bf16.mxu0 %v847_v0  ;;  %v852_v3 = vld [vmem:[%s1326_s1 + $0x110] ss:$8 sps:$4 sm:$0xff]   ;;  %v853_v4 = vld [vmem:[%s1326_s1 + $0x124] ss:$8 sps:$4 sm:$0xff]   ;;  %v855_v5 = vld [vmem:[%s1326_s1 + $0x120] ss:$8 sps:$4 sm:$0xff]  }
   0x3   :  { %656 = vmatpush1.bf16.msra.mxu0 %v849_v1  ;;  %v856_v6 = vld [vmem:[%s1326_s1 + $0x134] ss:$8 sps:$4 sm:$0xff]   ;;  %v858_v7 = vld [vmem:[%s1326_s1 + $0x130] ss:$8 sps:$4 sm:$0xff]   ;;  %v859_v8 = vld [vmem:[%s1326_s1 + $0x144] ss:$8 sps:$4 sm:$0xff]  }
   0x4   :  { %657 = vmatprep.subr.bf16.mxu0 %v850_v2  ;;  %v861_v9 = vld [vmem:[%s1326_s1 + $0x140] ss:$8 sps:$4 sm:$0xff]   ;;  %v862_v10 = vld [vmem:[%s1326_s1 + $0x154] ss:$8 sps:$4 sm:$0xff]   ;;  %v864_v11 = vld [vmem:[%s1326_s1 + $0x150] ss:$8 sps:$4 sm:$0xff]  }
   0x5   :  { %v865_v12 = vld [vmem:[%s1326_s1 + $0x164] ss:$8 sps:$4 sm:$0xff]   ;;  %v894_v14 = vld [vmem:[%s1326_s1] ss:$8 sps:$4 sm:$0xff]   ;;  %v868_v16 = vld [vmem:[%s1326_s1 + $0x174] ss:$8 sps:$4 sm:$0xff]  }
   0x6   :  { %v892_v13 = vld [vmem:[%s1326_s1 + $0x4] ss:$8 sps:$4 sm:$0xff]   ;;  %v867_v15 = vld [vmem:[%s1326_s1 + $0x160] ss:$8 sps:$4 sm:$0xff]   ;;  %v898_v17 = vld [vmem:[%s1326_s1 + $0x14] ss:$8 sps:$4 sm:$0xff]  }
   0x7   :  { %658 = vmatpush1.bf16.msra.mxu0 %v852_v3  ;;  %614 = vmatprep.subr.bf16.mxu1 %v892_v13  ;;  %v900_v18 = vld [vmem:[%s1326_s1 + $0x10] ss:$8 sps:$4 sm:$0xff]   ;;  %v904_v22 = vld [vmem:[%s1326_s1 + $0x24] ss:$8 sps:$4 sm:$0xff]   ;;  %v906_v23 = vld [vmem:[%s1326_s1 + $0x20] ss:$8 sps:$4 sm:$0xff]  }
   0x8   :  { %659 = vmatprep.subr.bf16.mxu0 %v853_v4  ;;  %615 = vmatpush1.bf16.msra.mxu1 %v894_v14  ;;  %v17_v19 = vld [vmem:[%s1327_s0 + $0x18] sm:$0xff]  ;;  %v871_v24 = vld [vmem:[%s1326_s1 + $0x184] ss:$8 sps:$4 sm:$0xff]   ;;  %v873_v26 = vld [vmem:[%s1326_s1 + $0x180] ss:$8 sps:$4 sm:$0xff]  }
   0x9   :  { %v870_v20 = vld [vmem:[%s1326_s1 + $0x170] ss:$8 sps:$4 sm:$0xff]   ;;  %616 = vmatprep.subr.bf16.mxu1 %v898_v17  ;;  %v23_v21 = vpack.c.bf16 %v17_v19, %v17_v19  ;;  %v910_v25 = vld [vmem:[%s1326_s1 + $0x34] ss:$8 sps:$4 sm:$0xff]   ;;  %v916_v29 = vld [vmem:[%s1326_s1 + $0x44] ss:$8 sps:$4 sm:$0xff]  }
   0xa   :  { %v912_v27 = vld [vmem:[%s1326_s1 + $0x30] ss:$8 sps:$4 sm:$0xff]   ;;  %v874_v28 = vld [vmem:[%s1326_s1 + $0x194] ss:$8 sps:$4 sm:$0xff]   ;;  %v918_v31 = vld [vmem:[%s1326_s1 + $0x40] ss:$8 sps:$4 sm:$0xff]  }
   0xb   :  { %660 = vmatpush1.bf16.msra.mxu0 %v855_v5  ;;  %687 = vmatprep.mubr.bf16.mxu0 %v23_v21  ;;  %v876_v30 = vld [vmem:[%s1326_s1 + $0x190] ss:$8 sps:$4 sm:$0xff]   ;;  %v877_v32 = vld [vmem:[%s1326_s1 + $0x1a4] ss:$8 sps:$4 sm:$0xff]   ;;  %v922_v33 = vld [vmem:[%s1326_s1 + $0x54] ss:$8 sps:$4 sm:$0xff]  }
   0xc   :  { %661 = vmatprep.subr.bf16.mxu0 %v856_v6  ;;  %617 = vmatpush1.bf16.msra.mxu1 %v900_v18  ;;  %v879_v34 = vld [vmem:[%s1326_s1 + $0x1a0] ss:$8 sps:$4 sm:$0xff]   ;;  %v924_v35 = vld [vmem:[%s1326_s1 + $0x50] ss:$8 sps:$4 sm:$0xff]   ;;  %v880_v36 = vld [vmem:[%s1326_s1 + $0x1b4] ss:$8 sps:$4 sm:$0xff]  }
   0xd   :  { %618 = vmatprep.subr.bf16.mxu1 %v904_v22  ;;  %v928_v37 = vld [vmem:[%s1326_s1 + $0x64] ss:$8 sps:$4 sm:$0xff]   ;;  %v882_v38 = vld [vmem:[%s1326_s1 + $0x1b0] ss:$8 sps:$4 sm:$0xff]   ;;  %v930_v39 = vld [vmem:[%s1326_s1 + $0x60] ss:$8 sps:$4 sm:$0xff]  }
   0xe   :  { %v883_v40 = vld [vmem:[%s1326_s1 + $0x1c4] ss:$8 sps:$4 sm:$0xff]   ;;  %v934_v41 = vld [vmem:[%s1326_s1 + $0x74] ss:$8 sps:$4 sm:$0xff]   ;;  %v885_v42 = vld [vmem:[%s1326_s1 + $0x1c0] ss:$8 sps:$4 sm:$0xff]  }
   0xf   :  { %662 = vmatpush1.bf16.msra.mxu0 %v858_v7  ;;  %v936_v43 = vld [vmem:[%s1326_s1 + $0x70] ss:$8 sps:$4 sm:$0xff]   ;;  %v886_v44 = vld [vmem:[%s1326_s1 + $0x1d4] ss:$8 sps:$4 sm:$0xff]   ;;  %v940_v45 = vld [vmem:[%s1326_s1 + $0x84] ss:$8 sps:$4 sm:$0xff]  }
  0x10   :  { %663 = vmatprep.subr.bf16.mxu0 %v859_v8  ;;  %619 = vmatpush1.bf16.msra.mxu1 %v906_v23  ;;  %v888_v46 = vld [vmem:[%s1326_s1 + $0x1d0] ss:$8 sps:$4 sm:$0xff]   ;;  %v942_v47 = vld [vmem:[%s1326_s1 + $0x80] ss:$8 sps:$4 sm:$0xff]   ;;  %v889_v48 = vld [vmem:[%s1326_s1 + $0x1e4] ss:$8 sps:$4 sm:$0xff]  }
  0x11   :  { %620 = vmatprep.subr.bf16.mxu1 %v910_v25  ;;  %v946_v49 = vld [vmem:[%s1326_s1 + $0x94] ss:$8 sps:$4 sm:$0xff]   ;;  %v891_v50 = vld [vmem:[%s1326_s1 + $0x1e0] ss:$8 sps:$4 sm:$0xff]   ;;  %v948_v51 = vld [vmem:[%s1326_s1 + $0x90] ss:$8 sps:$4 sm:$0xff]  }
  0x12   :  { %v895_v52 = vld [vmem:[%s1326_s1 + $0x1f4] ss:$8 sps:$4 sm:$0xff]   ;;  %v952_v53 = vld [vmem:[%s1326_s1 + $0xa4] ss:$8 sps:$4 sm:$0xff]   ;;  %v897_v54 = vld [vmem:[%s1326_s1 + $0x1f0] ss:$8 sps:$4 sm:$0xff]  }
  0x13   :  { %664 = vmatpush1.bf16.msra.mxu0 %v861_v9  ;;  %v16_v55 = vld [vmem:[%s1327_s0 + $0x10] sm:$0xff]  ;;  %v954_v56 = vld [vmem:[%s1326_s1 + $0xa0] ss:$8 sps:$4 sm:$0xff]   ;;  %v903_v57 = vld [vmem:[%s1326_s1 + $0x204] ss:$8 sps:$4 sm:$0xff]  }
  0x14   :  { %665 = vmatprep.subr.bf16.mxu0 %v862_v10  ;;  %621 = vmatpush1.bf16.msra.mxu1 %v912_v27  ;;  %v958_v58 = vld [vmem:[%s1326_s1 + $0xb4] ss:$8 sps:$4 sm:$0xff]   ;;  %v901_v59 = vld [vmem:[%s1326_s1 + $0x200] ss:$8 sps:$4 sm:$0xff]   ;;  %v22_v60 = vpack.c.bf16 %v16_v55, %v16_v55  ;;  %v960_v62 = vld [vmem:[%s1326_s1 + $0xb0] ss:$8 sps:$4 sm:$0xff]  }
  0x15   :  { %622 = vmatprep.subr.bf16.mxu1 %v916_v29  ;;  %v909_v61 = vld [vmem:[%s1326_s1 + $0x214] ss:$8 sps:$4 sm:$0xff]   ;;  %v15_v63 = vld [vmem:[%s1327_s0 + $0x8] sm:$0xff]  ;;  %v907_v4 = vld [vmem:[%s1326_s1 + $0x210] ss:$8 sps:$4 sm:$0xff]  }
  0x16   :  { %v964_v0 = vld [vmem:[%s1326_s1 + $0xc4] ss:$8 sps:$4 sm:$0xff]   ;;  %v21_v1 = vpack.c.bf16 %v15_v63, %v15_v63  ;;  %v966_v5 = vld [vmem:[%s1326_s1 + $0xc0] ss:$8 sps:$4 sm:$0xff]   ;;  %v970_v7 = vld [vmem:[%s1326_s1 + $0xd4] ss:$8 sps:$4 sm:$0xff]  }
  0x17   :  { %666 = vmatpush1.bf16.msra.mxu0 %v864_v11  ;;  %v19_v2 = vld [vmem:[%s1327_s0 + $0x28] sm:$0xff]  ;;  %v972_v9 = vld [vmem:[%s1326_s1 + $0xd0] ss:$8 sps:$4 sm:$0xff]   ;;  %v921_v10 = vld [vmem:[%s1326_s1 + $0x234] ss:$8 sps:$4 sm:$0xff]  }
  0x18   :  { %667 = vmatprep.subr.bf16.mxu0 %v865_v12  ;;  %623 = vmatpush1.bf16.msra.mxu1 %v918_v31  ;;  %v25_v3 = vpack.c.bf16 %v19_v2, %v19_v2  ;;  %v915_v6 = vld [vmem:[%s1326_s1 + $0x224] ss:$8 sps:$4 sm:$0xff]   ;;  %v913_v8 = vld [vmem:[%s1326_s1 + $0x220] ss:$8 sps:$4 sm:$0xff]   ;;  %v919_v12 = vld [vmem:[%s1326_s1 + $0x230] ss:$8 sps:$4 sm:$0xff]  }
  0x19   :  { %624 = vmatprep.subr.bf16.mxu1 %v922_v33  ;;  %646 = vmatprep.mubr.bf16.mxu1 %v21_v1  ;;  %v976_v11 = vld [vmem:[%s1326_s1 + $0xe4] ss:$8 sps:$4 sm:$0xff]   ;;  %v978_v13 = vld [vmem:[%s1326_s1 + $0xe0] ss:$8 sps:$4 sm:$0xff]   ;;  %v984_v17 = vld [vmem:[%s1326_s1 + $0xf0] ss:$8 sps:$4 sm:$0xff]  }
  0x1a   :  { %v927_v14 = vld [vmem:[%s1326_s1 + $0x244] ss:$8 sps:$4 sm:$0xff]   ;;  %v933_v19 = vld [vmem:[%s1326_s1 + $0x254] ss:$8 sps:$4 sm:$0xff]   ;;  %v931_v21 = vld [vmem:[%s1326_s1 + $0x250] ss:$8 sps:$4 sm:$0xff]  }
  0x1b   :  { %668 = vmatpush1.bf16.msra.mxu0 %v867_v15  ;;  %v982_v15 = vld [vmem:[%s1326_s1 + $0xf4] ss:$8 sps:$4 sm:$0xff]   ;;  %v14_v18 = vld [vmem:[%s1327_s0] sm:$0xff]  ;;  %v943_v25 = vld [vmem:[%s1326_s1 + $0x270] ss:$8 sps:$4 sm:$0xff]  }
  0x1c   :  { %669 = vmatprep.subr.bf16.mxu0 %v868_v16  ;;  %625 = vmatpush1.bf16.msra.mxu1 %v924_v35  ;;  %v925_v16 = vld [vmem:[%s1326_s1 + $0x240] ss:$8 sps:$4 sm:$0xff]   ;;  %v939_v22 = vld [vmem:[%s1326_s1 + $0x264] ss:$8 sps:$4 sm:$0xff]   ;;  %v955_v29 = vld [vmem:[%s1326_s1 + $0x290] ss:$8 sps:$4 sm:$0xff]  }
  0x1d   :  { %626 = vmatprep.subr.bf16.mxu1 %v928_v37  ;;  %v937_v23 = vld [vmem:[%s1326_s1 + $0x260] ss:$8 sps:$4 sm:$0xff]   ;;  %v967_v33 = vld [vmem:[%s1326_s1 + $0x2b0] ss:$8 sps:$4 sm:$0xff]  }
  0x1e   :  { %v949_v27 = vld [vmem:[%s1326_s1 + $0x280] ss:$8 sps:$4 sm:$0xff]   ;;  %v979_v37 = vld [vmem:[%s1326_s1 + $0x2d0] ss:$8 sps:$4 sm:$0xff]  }
  0x1f   :  { %670 = vmatpush1.bf16.msra.mxu0 %v870_v20  ;;  %v20_v20 = vpack.c.bf16 %v14_v18, %v14_v18  ;;  %v961_v31 = vld [vmem:[%s1326_s1 + $0x2a0] ss:$8 sps:$4 sm:$0xff]  }
  0x20   :  { %671 = vmatprep.subr.bf16.mxu0 %v871_v24  ;;  %627 = vmatpush1.bf16.msra.mxu1 %v930_v39  ;;  %v945_v24 = vld [vmem:[%s1326_s1 + $0x274] ss:$8 sps:$4 sm:$0xff]   ;;  %v973_v35 = vld [vmem:[%s1326_s1 + $0x2c0] ss:$8 sps:$4 sm:$0xff]  }
  0x21   :  { %628 = vmatprep.subr.bf16.mxu1 %v934_v41  ;;  %v985_v39 = vld [vmem:[%s1326_s1 + $0x2e0] ss:$8 sps:$4 sm:$0xff]   ;;  %v988_v41 = vld [vmem:[%s1326_s1 + $0x2f0] ss:$8 sps:$4 sm:$0xff]  }
  0x23   :  { %672 = vmatpush1.bf16.msra.mxu0 %v873_v26  ;;  %v951_v26 = vld [vmem:[%s1326_s1 + $0x284] ss:$8 sps:$4 sm:$0xff]  }
  0x24   :  { %673 = vmatprep.subr.bf16.mxu0 %v874_v28  ;;  %629 = vmatpush1.bf16.msra.mxu1 %v936_v43  ;;  %v957_v28 = vld [vmem:[%s1326_s1 + $0x294] ss:$8 sps:$4 sm:$0xff]  }
  0x25   :  { %630 = vmatprep.subr.bf16.mxu1 %v940_v45 }
  0x27   :  { %674 = vmatpush1.bf16.msra.mxu0 %v876_v30  ;;  %v963_v30 = vld [vmem:[%s1326_s1 + $0x2a4] ss:$8 sps:$4 sm:$0xff]  }
  0x28   :  { %675 = vmatprep.subr.bf16.mxu0 %v877_v32  ;;  %631 = vmatpush1.bf16.msra.mxu1 %v942_v47  ;;  %v969_v32 = vld [vmem:[%s1326_s1 + $0x2b4] ss:$8 sps:$4 sm:$0xff]  }
  0x29   :  { %632 = vmatprep.subr.bf16.mxu1 %v946_v49 }
  0x2b   :  { %676 = vmatpush1.bf16.msra.mxu0 %v879_v34  ;;  %v975_v34 = vld [vmem:[%s1326_s1 + $0x2c4] ss:$8 sps:$4 sm:$0xff]  }
  0x2c   :  { %677 = vmatprep.subr.bf16.mxu0 %v880_v36  ;;  %633 = vmatpush1.bf16.msra.mxu1 %v948_v51  ;;  %v981_v36 = vld [vmem:[%s1326_s1 + $0x2d4] ss:$8 sps:$4 sm:$0xff]   ;;  %v122_v51 = vld [vmem:[%s1328_s2] sm:$0x3] }
  0x2d   :  { %634 = vmatprep.subr.bf16.mxu1 %v952_v53 }
  0x2f   :  { %678 = vmatpush1.bf16.msra.mxu0 %v882_v38  ;;  %v987_v38 = vld [vmem:[%s1326_s1 + $0x2e4] ss:$8 sps:$4 sm:$0xff]  }
  0x30   :  { %679 = vmatprep.subr.bf16.mxu0 %v883_v40  ;;  %635 = vmatpush1.bf16.msra.mxu1 %v954_v56  ;;  %v990_v40 = vld [vmem:[%s1326_s1 + $0x2f4] ss:$8 sps:$4 sm:$0xff]  }
  0x31   :  { %636 = vmatprep.subr.bf16.mxu1 %v958_v58 }
  0x33   :  { %680 = vmatpush1.bf16.msra.mxu0 %v885_v42  ;;  %v18_v42 = vld [vmem:[%s1327_s0 + $0x20] sm:$0xff] }
  0x34   :  { %681 = vmatprep.subr.bf16.mxu0 %v886_v44  ;;  %637 = vmatpush1.bf16.msra.mxu1 %v960_v62  ;;  %v24_v43 = vpack.c.bf16 %v18_v42, %v18_v42 }
  0x35   :  { %638 = vmatprep.subr.bf16.mxu1 %v964_v0 }
  0x37   :  { %682 = vmatpush1.bf16.msra.mxu0 %v888_v46 }
  0x38   :  { %683 = vmatprep.subr.bf16.mxu0 %v889_v48  ;;  %639 = vmatpush1.bf16.msra.mxu1 %v966_v5  ;;  %v124_v48 = vlaneseq }
  0x39   :  { %640 = vmatprep.subr.bf16.mxu1 %v970_v7 }
  0x3a   :  { %v125_v49 = vshrl.u32 %v124_v48, 7 }
  0x3b   :  { %684 = vmatpush1.bf16.msra.mxu0 %v891_v50 }
  0x3c   :  { %685 = vmatprep.subr.bf16.mxu0 %v895_v52  ;;  %641 = vmatpush1.bf16.msra.mxu1 %v972_v9  ;;  %v126_v50 = vsub.s32 0, %v125_v49  ;;  %v130_v52 = vsub.s32 1, %v125_v49 }
  0x3d   :  { %642 = vmatprep.subr.bf16.mxu1 %v976_v11 }
  0x3e   :  { %v127_v53 = vrot.slane %v122_v51, %v126_v50 }
  0x3f   :  { %686 = vmatpush1.bf16.msra.mxu0 %v897_v54  ;;  %v131_v54 = vrot.slane %v122_v51, %v130_v52 }
  0x40   :  { %696 = vmatprep.subr.bf16.mxu0 %v903_v57  ;;  %643 = vmatpush1.bf16.msra.mxu1 %v978_v13 }
  0x41   :  { %644 = vmatprep.subr.bf16.mxu1 %v982_v15 }
  0x42   :  { %688 = vmatmul.mubr.bf16.vlgmr.msra.gmra.mrb[0].mxu0 %v22_v60 }
  0x43   :  { %697 = vmatpush1.bf16.msra.mxu0 %v901_v59  ;;  %728 = vmatprep.mubr.bf16.mxu0 %v25_v3 }
  0x44   :  { %698 = vmatprep.subr.bf16.mxu0 %v909_v61  ;;  %645 = vmatpush1.bf16.msra.mxu1 %v984_v17 }
  0x47   :  { %699 = vmatpush1.bf16.msra.mxu0 %v907_v4  ;;  %647 = vmatmul.mubr.bf16.vlgmr.msra.gmra.mrb[0].mxu1 %v20_v20 }
  0x48   :  { %700 = vmatprep.subr.bf16.mxu0 %v915_v6 }
  0x4b   :  { %701 = vmatpush1.bf16.msra.mxu0 %v913_v8 }
  0x4c   :  { %702 = vmatprep.subr.bf16.mxu0 %v921_v10 }
  0x4f   :  { %703 = vmatpush1.bf16.msra.mxu0 %v919_v12 }
  0x50   :  { %704 = vmatprep.subr.bf16.mxu0 %v927_v14 }
  0x53   :  { %705 = vmatpush1.bf16.msra.mxu0 %v925_v16 }
  0x54   :  { %706 = vmatprep.subr.bf16.mxu0 %v933_v19 }
  0x57   :  { %707 = vmatpush1.bf16.msra.mxu0 %v931_v21 }
  0x58   :  { %708 = vmatprep.subr.bf16.mxu0 %v939_v22 }
  0x5b   :  { %709 = vmatpush1.bf16.msra.mxu0 %v937_v23 }
  0x5c   :  { %710 = vmatprep.subr.bf16.mxu0 %v945_v24 }
  0x5f   :  { %711 = vmatpush1.bf16.msra.mxu0 %v943_v25 }
  0x60   :  { %712 = vmatprep.subr.bf16.mxu0 %v951_v26 }
  0x63   :  { %713 = vmatpush1.bf16.msra.mxu0 %v949_v27 }
  0x64   :  { %714 = vmatprep.subr.bf16.mxu0 %v957_v28 }
  0x67   :  { %715 = vmatpush1.bf16.msra.mxu0 %v955_v29 }
  0x68   :  { %716 = vmatprep.subr.bf16.mxu0 %v963_v30 }
  0x6b   :  { %717 = vmatpush1.bf16.msra.mxu0 %v961_v31 }
  0x6c   :  { %718 = vmatprep.subr.bf16.mxu0 %v969_v32 }
  0x6f   :  { %719 = vmatpush1.bf16.msra.mxu0 %v967_v33 }
  0x70   :  { %720 = vmatprep.subr.bf16.mxu0 %v975_v34 }
  0x73   :  { %721 = vmatpush1.bf16.msra.mxu0 %v973_v35 }
  0x74   :  { %722 = vmatprep.subr.bf16.mxu0 %v981_v36 }
  0x77   :  { %723 = vmatpush1.bf16.msra.mxu0 %v979_v37 }
  0x78   :  { %724 = vmatprep.subr.bf16.mxu0 %v987_v38 }
  0x7b   :  { %725 = vmatpush1.bf16.msra.mxu0 %v985_v39 }
  0x7c   :  { %726 = vmatprep.subr.bf16.mxu0 %v990_v40 }
  0x7f   :  { %727 = vmatpush1.bf16.msra.mxu0 %v988_v41 }
  0x82   :  { %729 = vmatmul.mubr.bf16.vlgmr.msra.gmra.mrb[0].mxu0 %v24_v43 }
 0x11a   :  { %v648_v44 = vpop.f32.mrb[0].mxu1 }
 0x11b   :  { %v650_v45 = vpop.f32.mrb[1].mxu1  ;;  %v649_v55 = vadd.f32 %v648_v44, %v127_v53 }
 0x11c   :  { %v652_v46 = vpop.f32.mrb[2].mxu1  ;;  %v651_v56 = vadd.f32 %v650_v45, %v131_v54 }
 0x11d   :  { %v653_v47 = vpop.f32.mrb[3].mxu1 }
 0x155   :  { %v730_v57 = vpop.f32.mrb[0].mxu0 }
 0x156   :  { %v840_v58 = vadd.f32 %v730_v57, %v649_v55  ;;  %v732_v59 = vpop.f32.mrb[1].mxu0 }
 0x157   :  { %v842_v60 = vadd.f32 %v732_v59, %v651_v56  ;;  %v734_v61 = vpop.f32.mrb[2].mxu0 }
 0x158   :  { %737 = vst [vmem:[%s1329_s3] sm:$0xff] %v840_v58  ;;  %v735_v62 = vpop.f32.mrb[3].mxu0 }
 0x159   :  { %738 = vst [vmem:[%s1329_s3 + $0x8] sm:$0xff] %v842_v60 }

// kernel: vit_to_deepcad_latent.14
= control target key start
LH: loop header
LB: loop body
LE: loop exit
PB: predicated region body
PF: predicated region fallthrough
CT: control target
= control target key end

     0   :  { %s801_s12 = smov 0   ;;  %s803_s13 = smov 0   ;;  %s856_s0 = inlined_call_operand.vmem [shape: bf16[2,5,768], index: 0, kind: input, shape index: {}, may-alias: {0,1,2}]   ;;  %s857_s1 = inlined_call_operand.vmem [shape: bf16[2,5,768], index: 1, kind: input, shape index: {}, may-alias: {0,1,2}]   ;;  %s858_s2 = inlined_call_operand.vmem [shape: bf16[2,5,768], index: 2, kind: input, shape index: {}, may-alias: {0,1,2}]   ;;  %s859_s3 = inlined_call_operand.vmem [shape: bf16[2,5,256], index: 3, kind: output, shape index: {}]  }
   0x1   :  { %s805_s14 = smov 0  }
   0x2 LB: > { %s25_s15 = sadd.s32 1, %s772_s13  ;;  %p663_p0 = scmp.ge.s32.totalorder %s776_s14, 1  ;;  %s776_s14 = sphi %s805_s14, %s13_s14   ;;  %s772_s13 = sphi %s803_s13, %s861_s13   ;;  %s768_s12 = sphi %s801_s12, %s860_s12  }
   0x3   : > { %p27_p1 = scmp.ge.s32.totalorder %s25_s15, 2  ;;  %p200_p2 = scmp.lt.s32.totalorder %s776_s14, 3 }
   0x5   : > { %s863_s15 = smov (%p27_p1, %s25_s15), 0  ;;  %p201_p3 = pnand %p663_p0, %p200_p2 }
   0x6   : > { %p253_p4 = scmp.lt.s32.totalorder (!%p201_p3), %s768_s12, 1  ;;  %v778_v0 = vmov (!%p201_p3), 0.0   ;;  %vm779_vm0 = vmmov (!%p201_p3), 0   ;;  %vm343_vm1 = vcmask (!%p201_p3), 36864   ;;  %vm358_vm2 = vcmask (!%p201_p3), 1041408  }
   0x7   : > { %204 = sbr.rel (%p201_p3) target bundleno = 997 (0x3e5), region = 32  ;;  %690 = vmatprep.subr.bf16.mxu0 (!%p201_p3), %v778_v0  ;;  %692 = vmatprep.mubr.msk.bf16.mxu0 (!%p201_p3), %vm779_vm0, %v778_v0  ;;  %vm359_vm3 = vcmask (!%p201_p3), 1042432   ;;  %v780_v11 = vmov (!%p201_p3), 65535   ;;  %vm354_vm4 = vcmask (!%p201_p3), 39936   ;;  %vm527_vm5 = vsmask.f32 (!%p201_p3), 2304 }
   0x8   : > { %696 = vmatprep.subr.bf16.mxu1 (!%p201_p3), %v778_v0  ;;  %698 = vmatprep.mubr.msk.bf16.mxu1 (!%p201_p3), %vm779_vm0, %v778_v0  ;;  %v360_v12 = vsel (!%p201_p3), %vm358_vm2, 4294967295, %v780_v11  ;;  %vm529_vm6 = vcmask (!%p201_p3), 1046532   ;;  %vm530_vm7 = vsmask.f32 (!%p201_p3), 6400  ;;  %vm528_vm8 = vmand (!%p201_p3), %vm359_vm3, %vm527_vm5 }
   0x9   : > { %v361_v14 = vsel (!%p201_p3), %vm359_vm3, %v360_v12, 0  ;;  %vm531_vm9 = vmand (!%p201_p3), %vm529_vm6, %vm530_vm7 }
   0xa   : > { %vm532_vm10 = vmor (!%p201_p3), %vm531_vm9, %vm528_vm8 }
   0xe   : > { %s865_s12 = smov (!%p253_p4, %s768_s12), 1 }
   0xf   : > { %s714_s16 = smul.u32 24, %s865_s12  ;;  %s680_s28 = sshll.u32 %s865_s12, 3 }
  0x10   : > { %s294_s4 = scalar_lea.vmem %s859_s3, %s680_s28 }
  0x11   : > { %s677_s17 = sadd.s32 8, %s714_s16  ;;  %s260_s20 = scalar_lea.vmem %s856_s0, %s714_s16  ;;  %v533_v52 = vld [vmem:[%s294_s4] sm:$0x77] }
  0x12   : > { %s271_s23 = scalar_lea.vmem %s857_s1, %s677_s17  ;;  %v297_v1 = vld [vmem:[%s260_s20] sm:$0x77]  ;;  %s679_s24 = sadd.s32 16, %s714_s16 }
  0x13   : > { %v298_v2 = vld [vmem:[%s271_s23] sm:$0x77]  ;;  %v300_v3 = vunpack.c.l.bf16 %v297_v1  ;;  %s283_s27 = scalar_lea.vmem %s858_s2, %s679_s24  ;;  %v409_v21 = vrot.slane %v297_v1, 4 }
  0x14   : > { %691 = vmatpush3.bf16.xpose.msra.mxu0 %v298_v2  ;;  %v299_v13 = vld [vmem:[%s283_s27] sm:$0x77]  ;;  %v670_v24 = vcombine.high %v298_v2, %v298_v2 }
  0x15   : > { %v301_v4 = vmul.f32 0.088388346, %v300_v3  ;;  %708 = vmatprep.subr.bf16.mxu0 %v778_v0  ;;  %v363_v15 = vand.u32 %v361_v14, %v299_v13  ;;  %v671_v16 = vcombine.high %v299_v13, %v299_v13  ;;  %v411_v22 = vunpack.c.l.bf16 %v409_v21 }
  0x17   : > { %v302_v5 = vpack.c.bf16 %v301_v4, %v301_v4  ;;  %697 = vmatpush3.bf16.msra.mxu1 %v363_v15  ;;  %v475_v17 = vand.u32 %v671_v16, %v361_v14  ;;  %v412_v27 = vmul.f32 0.088388346, %v411_v22 }
  0x18   : > { %702 = vmatprep.subr.bf16.mxu1 %v778_v0 }
  0x19   : > { %v413_v28 = vpack.c.bf16 %v412_v27, %v412_v27 }
  0x1b   : > { %693 = vmatmul.mubr.bf16.vlgmr.msra.gmra.mrb[0].mxu0 %v302_v5 }
  0x1c   : > { %710 = vmatprep.mubr.msk.bf16.mxu0 %vm779_vm0, %v778_v0  ;;  %709 = vmatpush3.bf16.msra.mxu0 %v475_v17 }
  0xee   : > { %v337_v6 = vpop.f32.mrb[0].mxu0 }
  0xef   : > { %v694_v7 = vpop.f32.mrb[1].mxu0  ;;  %v344_v8 = vsel %vm343_vm1, %v337_v6, -inf }
  0xf0   : > { %345 = vmax.xlane.f32.xlu0 %v344_v8  ;;  %v340_v9 = vpop.f32.mrb[2].mxu0 }
  0xf1   : > { %v695_v10 = vpop.f32.mrb[3].mxu0 }
 0x17d   : > { %v346_v18 = vpop.xlane.xlu0 %345 }
 0x17e   : > { %v347_v19 = vsub.f32 %v337_v6, %v346_v18 }
 0x180   : > { %v348_v20 = vmul.f32 1.442695, %v347_v19 }
 0x182   : > { %746 = vpow2.f32 %v348_v20 }
 0x18c   : > { %v747_v23 = vpop.eup %746 }
 0x18d   : > { %v350_v25 = vsel %vm343_vm1, %v747_v23, 0.0  ;;  %v353_v26 = vpack.c.bf16 %v747_v23, %v747_v23 }
 0x18e   : > { %351 = vadd.xlane.f32.xlu1 %v350_v25 }
 0x18f   : > { %699 = vmatmul.mubr.msk.bf16.vlgmr.msra.gmra.mrb[0].mxu1 %vm354_vm4, %v353_v26 }
 0x190   : > { %703 = vmatpush3.bf16.xpose.msra.mxu1 %v670_v24  ;;  %704 = vmatprep.mubr.msk.bf16.mxu1 %vm779_vm0, %v778_v0 }
 0x197   : > { %705 = vmatmul.mubr.bf16.vlgmr.msra.gmra.mrb[4].mxu1 %v413_v28 }
 0x21b   : > { %v352_v44 = vpop.xlane.xlu1 %351 }
 0x262   : > { %v399_v29 = vpop.f32.mrb[0].mxu1 }
 0x263   : > { %v700_v30 = vpop.f32.mrb[1].mxu1 }
 0x264   : > { %v402_v31 = vpop.f32.mrb[2].mxu1 }
 0x265   : > { %v701_v32 = vpop.f32.mrb[3].mxu1 }
 0x26a   : > { %v452_v33 = vpop.f32.mrb[4].mxu1 }
 0x26b   : > { %v706_v34 = vpop.f32.mrb[5].mxu1  ;;  %v458_v35 = vsel %vm343_vm1, %v452_v33, -inf }
 0x26c   : > { %459 = vmax.xlane.f32.xlu0 %v458_v35  ;;  %v455_v36 = vpop.f32.mrb[6].mxu1 }
 0x26d   : > { %v707_v37 = vpop.f32.mrb[7].mxu1 }
 0x2f9   : > { %v460_v38 = vpop.xlane.xlu0 %459 }
 0x2fa   : > { %v461_v39 = vsub.f32 %v452_v33, %v460_v38 }
 0x2fc   : > { %v462_v40 = vmul.f32 1.442695, %v461_v39 }
 0x2fe   : > { %748 = vpow2.f32 %v462_v40 }
 0x2ff   : > { %750 = vrcp.f32 %v352_v44 }
 0x308   : > { %v749_v41 = vpop.eup %748 }
 0x309   : > { %v464_v42 = vsel %vm343_vm1, %v749_v41, 0.0  ;;  %v467_v43 = vpack.c.bf16 %v749_v41, %v749_v41  ;;  %v751_v46 = vpop.eup %750 }
 0x30a   : > { %465 = vadd.xlane.f32.xlu1 %v464_v42  ;;  %v406_v49 = vmul.f32 %v751_v46, %v399_v29 }
 0x30b   : > { %711 = vmatmul.mubr.msk.bf16.vlgmr.msra.gmra.mrb[4].mxu0 %vm354_vm4, %v467_v43 }
 0x397   : > { %v466_v45 = vpop.xlane.xlu1 %465 }
 0x398   : > { %752 = vrcp.f32 %v466_v45 }
 0x3a2   : > { %v753_v47 = vpop.eup %752 }
 0x3de   : > { %v511_v48 = vpop.f32.mrb[4].mxu0 }
 0x3df   : > { %v518_v50 = vmul.f32 %v753_v47, %v511_v48  ;;  %v712_v51 = vpop.f32.mrb[5].mxu0 }
 0x3e0   : > { %v514_v53 = vpop.f32.mrb[6].mxu0 }
 0x3e1   : > { %v681_v54 = vpack.c.bf16 %v518_v50, %v406_v49  ;;  %v713_v55 = vpop.f32.mrb[7].mxu0 }
 0x3e3   : > { %v534_v56 = vsel %vm532_vm10, %v681_v54, %v533_v52 }
 0x3e4   : > { %535 = vst [vmem:[%s294_s4] sm:$0x77] %v534_v56 }
 0x3e5 PF: > { %s13_s14 = sadd.s32 1, %s776_s14   ;;  %s860_s12 = smov %s772_s13 }
 0x3e6   : > { %p10_p5 = scmp.ge.s32.totalorder %s13_s14, 4   ;;  %s861_s13 = smov %s863_s15 }
 0x3e8   :  { %12 = sbr.rel (!%p10_p5) target bundleno = 2 (0x2), region = 68 }

// kernel: vit_to_deepcad_latent.15
= control target key start
LH: loop header
LB: loop body
LE: loop exit
PB: predicated region body
PF: predicated region fallthrough
CT: control target
= control target key end

     0   :  { %v53_v34 = vlaneseq  ;;  %s531_s1 = inlined_call_operand.vmem [shape: bf16[256,256], index: 1, kind: input, shape index: {}]   ;;  %s532_s0 = inlined_call_operand.vmem [shape: bf16[16,256], index: 0, kind: input, shape index: {}]   ;;  %s533_s2 = inlined_call_operand.vmem [shape: f32[1,256], index: 2, kind: input, shape index: {}]   ;;  %s534_s3 = inlined_call_operand.vmem [shape: f32[16,256], index: 3, kind: input, shape index: {}]   ;;  %s535_s4 = inlined_call_operand.vmem [shape: f32[16,256], index: 4, kind: output, shape index: {}]  }
   0x1   :  { %v326_v0 = vld [vmem:[%s531_s1 + $0x4] ss:$8 sps:$4 sm:$0xff]   ;;  %v328_v1 = vld [vmem:[%s531_s1] ss:$8 sps:$4 sm:$0xff]   ;;  %v329_v2 = vld [vmem:[%s531_s1 + $0x14] ss:$8 sps:$4 sm:$0xff]  }
   0x2   :  { %233 = vmatprep.subr.bf16.mxu0 %v326_v0  ;;  %v331_v3 = vld [vmem:[%s531_s1 + $0x10] ss:$8 sps:$4 sm:$0xff]   ;;  %v332_v4 = vld [vmem:[%s531_s1 + $0x24] ss:$8 sps:$4 sm:$0xff]   ;;  %v334_v5 = vld [vmem:[%s531_s1 + $0x20] ss:$8 sps:$4 sm:$0xff]  }
   0x3   :  { %234 = vmatpush1.bf16.msra.mxu0 %v328_v1  ;;  %v335_v6 = vld [vmem:[%s531_s1 + $0x34] ss:$8 sps:$4 sm:$0xff]   ;;  %v337_v7 = vld [vmem:[%s531_s1 + $0x30] ss:$8 sps:$4 sm:$0xff]   ;;  %v338_v8 = vld [vmem:[%s531_s1 + $0x44] ss:$8 sps:$4 sm:$0xff]  }
   0x4   :  { %235 = vmatprep.subr.bf16.mxu0 %v329_v2  ;;  %v340_v9 = vld [vmem:[%s531_s1 + $0x40] ss:$8 sps:$4 sm:$0xff]   ;;  %v341_v10 = vld [vmem:[%s531_s1 + $0x54] ss:$8 sps:$4 sm:$0xff]   ;;  %v343_v11 = vld [vmem:[%s531_s1 + $0x50] ss:$8 sps:$4 sm:$0xff]  }
   0x5   :  { %v344_v12 = vld [vmem:[%s531_s1 + $0x64] ss:$8 sps:$4 sm:$0xff]   ;;  %v346_v14 = vld [vmem:[%s531_s1 + $0x60] ss:$8 sps:$4 sm:$0xff]   ;;  %v347_v15 = vld [vmem:[%s531_s1 + $0x74] ss:$8 sps:$4 sm:$0xff]  }
   0x6   :  { %v376_v13 = vld [vmem:[%s532_s0 + $0x4] ss:$8 sps:$4 sm:$0xff]   ;;  %v349_v16 = vld [vmem:[%s531_s1 + $0x70] ss:$8 sps:$4 sm:$0xff]   ;;  %v352_v18 = vld [vmem:[%s531_s1 + $0x80] ss:$8 sps:$4 sm:$0xff]  }
   0x7   :  { %236 = vmatpush1.bf16.msra.mxu0 %v331_v3  ;;  %265 = vmatprep.mubr.bf16.mxu0 %v376_v13  ;;  %v350_v17 = vld [vmem:[%s531_s1 + $0x84] ss:$8 sps:$4 sm:$0xff]   ;;  %v353_v19 = vld [vmem:[%s531_s1 + $0x94] ss:$8 sps:$4 sm:$0xff]   ;;  %v355_v20 = vld [vmem:[%s531_s1 + $0x90] ss:$8 sps:$4 sm:$0xff]  }
   0x8   :  { %237 = vmatprep.subr.bf16.mxu0 %v332_v4  ;;  %v356_v21 = vld [vmem:[%s531_s1 + $0xa4] ss:$8 sps:$4 sm:$0xff]   ;;  %v358_v22 = vld [vmem:[%s531_s1 + $0xa0] ss:$8 sps:$4 sm:$0xff]   ;;  %v359_v23 = vld [vmem:[%s531_s1 + $0xb4] ss:$8 sps:$4 sm:$0xff]  }
   0x9   :  { %v361_v24 = vld [vmem:[%s531_s1 + $0xb0] ss:$8 sps:$4 sm:$0xff]   ;;  %v362_v25 = vld [vmem:[%s531_s1 + $0xc4] ss:$8 sps:$4 sm:$0xff]   ;;  %v364_v26 = vld [vmem:[%s531_s1 + $0xc0] ss:$8 sps:$4 sm:$0xff]  }
   0xa   :  { %v365_v27 = vld [vmem:[%s531_s1 + $0xd4] ss:$8 sps:$4 sm:$0xff]   ;;  %v367_v28 = vld [vmem:[%s531_s1 + $0xd0] ss:$8 sps:$4 sm:$0xff]   ;;  %v368_v29 = vld [vmem:[%s531_s1 + $0xe4] ss:$8 sps:$4 sm:$0xff]  }
   0xb   :  { %238 = vmatpush1.bf16.msra.mxu0 %v334_v5  ;;  %v370_v30 = vld [vmem:[%s531_s1 + $0xe0] ss:$8 sps:$4 sm:$0xff]   ;;  %v371_v31 = vld [vmem:[%s531_s1 + $0xf4] ss:$8 sps:$4 sm:$0xff]   ;;  %v373_v32 = vld [vmem:[%s531_s1 + $0xf0] ss:$8 sps:$4 sm:$0xff]  }
   0xc   :  { %239 = vmatprep.subr.bf16.mxu0 %v335_v6  ;;  %v374_v33 = vld [vmem:[%s532_s0] ss:$8 sps:$4 sm:$0xff]   ;;  %v54_v35 = vshrl.u32 %v53_v34, 7  ;;  %v278_v48 = vld [vmem:[%s534_s3 + $0x10] sm:$0xff]  ;;  %v279_v52 = vld [vmem:[%s534_s3 + $0x18] sm:$0xff] }
   0xd   :  { %v51_v37 = vld [vmem:[%s533_s2] sm:$0x3]  ;;  %v277_v45 = vld [vmem:[%s534_s3 + $0x8] sm:$0xff] }
   0xe   :  { %v55_v36 = vsub.s32 0, %v54_v35  ;;  %v59_v38 = vsub.s32 1, %v54_v35  ;;  %v276_v42 = vld [vmem:[%s534_s3] sm:$0xff] }
   0xf   :  { %240 = vmatpush1.bf16.msra.mxu0 %v337_v7 }
  0x10   :  { %241 = vmatprep.subr.bf16.mxu0 %v338_v8  ;;  %v56_v39 = vrot.slane %v51_v37, %v55_v36  ;;  %v60_v40 = vrot.slane %v51_v37, %v59_v38 }
  0x13   :  { %242 = vmatpush1.bf16.msra.mxu0 %v340_v9 }
  0x14   :  { %243 = vmatprep.subr.bf16.mxu0 %v341_v10 }
  0x17   :  { %244 = vmatpush1.bf16.msra.mxu0 %v343_v11 }
  0x18   :  { %245 = vmatprep.subr.bf16.mxu0 %v344_v12 }
  0x1b   :  { %246 = vmatpush1.bf16.msra.mxu0 %v346_v14 }
  0x1c   :  { %247 = vmatprep.subr.bf16.mxu0 %v347_v15 }
  0x1f   :  { %248 = vmatpush1.bf16.msra.mxu0 %v349_v16 }
  0x20   :  { %249 = vmatprep.subr.bf16.mxu0 %v350_v17 }
  0x23   :  { %250 = vmatpush1.bf16.msra.mxu0 %v352_v18 }
  0x24   :  { %251 = vmatprep.subr.bf16.mxu0 %v353_v19 }
  0x27   :  { %252 = vmatpush1.bf16.msra.mxu0 %v355_v20 }
  0x28   :  { %253 = vmatprep.subr.bf16.mxu0 %v356_v21 }
  0x2b   :  { %254 = vmatpush1.bf16.msra.mxu0 %v358_v22 }
  0x2c   :  { %255 = vmatprep.subr.bf16.mxu0 %v359_v23 }
  0x2f   :  { %256 = vmatpush1.bf16.msra.mxu0 %v361_v24 }
  0x30   :  { %257 = vmatprep.subr.bf16.mxu0 %v362_v25 }
  0x33   :  { %258 = vmatpush1.bf16.msra.mxu0 %v364_v26 }
  0x34   :  { %259 = vmatprep.subr.bf16.mxu0 %v365_v27 }
  0x37   :  { %260 = vmatpush1.bf16.msra.mxu0 %v367_v28 }
  0x38   :  { %261 = vmatprep.subr.bf16.mxu0 %v368_v29 }
  0x3b   :  { %262 = vmatpush1.bf16.msra.mxu0 %v370_v30 }
  0x3c   :  { %263 = vmatprep.subr.bf16.mxu0 %v371_v31 }
  0x3f   :  { %264 = vmatpush1.bf16.msra.mxu0 %v373_v32 }
  0x42   :  { %266 = vmatmul.mubr.bf16.vlgmr.msra.gmra.mrb[0].mxu0 %v374_v33 }
 0x115   :  { %v267_v41 = vpop.f32.mrb[0].mxu0 }
 0x116   :  { %v268_v43 = vadd.f32 %v267_v41, %v56_v39  ;;  %v269_v44 = vpop.f32.mrb[1].mxu0 }
 0x117   :  { %v270_v46 = vadd.f32 %v269_v44, %v60_v40  ;;  %v271_v47 = vpop.f32.mrb[2].mxu0 }
 0x118   :  { %v280_v49 = vadd.f32 %v276_v42, %v268_v43  ;;  %v272_v50 = vadd.f32 %v271_v47, %v56_v39  ;;  %v273_v51 = vpop.f32.mrb[3].mxu0 }
 0x119   :  { %v281_v53 = vadd.f32 %v277_v45, %v270_v46  ;;  %v274_v54 = vadd.f32 %v273_v51, %v60_v40 }
 0x11a   :  { %284 = vst [vmem:[%s535_s4] sm:$0xff] %v280_v49  ;;  %v282_v55 = vadd.f32 %v278_v48, %v272_v50 }
 0x11b   :  { %285 = vst [vmem:[%s535_s4 + $0x8] sm:$0xff] %v281_v53  ;;  %v283_v56 = vadd.f32 %v279_v52, %v274_v54 }
 0x11c   :  { %286 = vst [vmem:[%s535_s4 + $0x10] sm:$0xff] %v282_v55 }
 0x11d   :  { %287 = vst [vmem:[%s535_s4 + $0x18] sm:$0xff] %v283_v56 }

// kernel: vit_to_deepcad_latent.13
= control target key start
LH: loop header
LB: loop body
LE: loop exit
PB: predicated region body
PF: predicated region fallthrough
CT: control target
= control target key end

     0   :  { %s1554_s0 = inlined_call_operand.vmem [shape: f32[16,256], index: 0, kind: input, shape index: {}]   ;;  %s1555_s3 = inlined_call_operand.vmem [shape: bf16[256,768], index: 3, kind: input, shape index: {}]   ;;  %s1556_s1 = inlined_call_operand.vmem [shape: f32[1,256], index: 1, kind: input, shape index: {}]   ;;  %s1557_s2 = inlined_call_operand.vmem [shape: f32[1,256], index: 2, kind: input, shape index: {}]   ;;  %s1558_s4 = inlined_call_operand.vmem [shape: f32[1,768], index: 4, kind: input, shape index: {}]   ;;  %s1559_s5 = inlined_call_operand.vmem [shape: bf16[16,768], index: 5, kind: output, shape index: {}]  }
   0x1   :  { %v1171_v0 = vld [vmem:[%s1554_s0] sm:$0xff]  ;;  %v1176_v1 = vld [vmem:[%s1554_s0 + $0x8] sm:$0xff]  ;;  %v1181_v2 = vld [vmem:[%s1554_s0 + $0x10] sm:$0xff] }
   0x2   :  { %v28_v3 = vadd.f32 %v1176_v1, %v1171_v0  ;;  %v1188_v4 = vld [vmem:[%s1554_s0 + $0x18] sm:$0xff]  ;;  %v993_v8 = vld [vmem:[%s1555_s3 + $0xc] ss:$24 sps:$4 sm:$0xff]   ;;  %v995_v9 = vld [vmem:[%s1555_s3 + $0x8] ss:$24 sps:$4 sm:$0xff]  }
   0x3   :  { %v31_v5 = vadd.f32 %v1188_v4, %v1181_v2  ;;  %v990_v6 = vld [vmem:[%s1555_s3 + $0x4] ss:$24 sps:$4 sm:$0xff]   ;;  %v992_v7 = vld [vmem:[%s1555_s3] ss:$24 sps:$4 sm:$0xff]   ;;  %v996_v10 = vld [vmem:[%s1555_s3 + $0x34] ss:$24 sps:$4 sm:$0xff]   ;;  %750 = vmatprep.subr.bf16.mxu1 %v993_v8 }
   0x4   :  { %29 = vadd.xlane.f32.xlu0 %v28_v3  ;;  %707 = vmatprep.subr.bf16.mxu0 %v990_v6  ;;  %v998_v11 = vld [vmem:[%s1555_s3 + $0x30] ss:$24 sps:$4 sm:$0xff]   ;;  %v999_v12 = vld [vmem:[%s1555_s3 + $0x3c] ss:$24 sps:$4 sm:$0xff]   ;;  %v1004_v15 = vld [vmem:[%s1555_s3 + $0x60] ss:$24 sps:$4 sm:$0xff]  }
   0x5   :  { %708 = vmatpush1.bf16.msra.mxu0 %v992_v7  ;;  %751 = vmatpush1.bf16.msra.mxu1 %v995_v9  ;;  %v1001_v13 = vld [vmem:[%s1555_s3 + $0x38] ss:$24 sps:$4 sm:$0xff]   ;;  %v1002_v14 = vld [vmem:[%s1555_s3 + $0x64] ss:$24 sps:$4 sm:$0xff]   ;;  %v1008_v17 = vld [vmem:[%s1555_s3 + $0x94] ss:$24 sps:$4 sm:$0xff]  }
   0x6   :  { %709 = vmatprep.subr.bf16.mxu0 %v996_v10  ;;  %752 = vmatprep.subr.bf16.mxu1 %v999_v12  ;;  %v1005_v16 = vld [vmem:[%s1555_s3 + $0x6c] ss:$24 sps:$4 sm:$0xff]   ;;  %v1007_v18 = vld [vmem:[%s1555_s3 + $0x68] ss:$24 sps:$4 sm:$0xff]   ;;  %v1011_v19 = vld [vmem:[%s1555_s3 + $0x9c] ss:$24 sps:$4 sm:$0xff]  }
   0x7   :  { %v1010_v20 = vld [vmem:[%s1555_s3 + $0x90] ss:$24 sps:$4 sm:$0xff]   ;;  %v1014_v21 = vld [vmem:[%s1555_s3 + $0xc4] ss:$24 sps:$4 sm:$0xff]   ;;  %v1016_v24 = vld [vmem:[%s1555_s3 + $0xc0] ss:$24 sps:$4 sm:$0xff]  }
   0x8   :  { %32 = vadd.xlane.f32.xlu0 %v31_v5  ;;  %v1013_v22 = vld [vmem:[%s1555_s3 + $0x98] ss:$24 sps:$4 sm:$0xff]   ;;  %v1017_v23 = vld [vmem:[%s1555_s3 + $0xcc] ss:$24 sps:$4 sm:$0xff]   ;;  %v1019_v26 = vld [vmem:[%s1555_s3 + $0xc8] ss:$24 sps:$4 sm:$0xff]  }
   0x9   :  { %710 = vmatpush1.bf16.msra.mxu0 %v998_v11  ;;  %753 = vmatpush1.bf16.msra.mxu1 %v1001_v13  ;;  %v1020_v25 = vld [vmem:[%s1555_s3 + $0xf4] ss:$24 sps:$4 sm:$0xff]   ;;  %v1022_v28 = vld [vmem:[%s1555_s3 + $0xf0] ss:$24 sps:$4 sm:$0xff]   ;;  %v1026_v29 = vld [vmem:[%s1555_s3 + $0x124] ss:$24 sps:$4 sm:$0xff]  }
   0xa   :  { %711 = vmatprep.subr.bf16.mxu0 %v1002_v14  ;;  %754 = vmatprep.subr.bf16.mxu1 %v1005_v16  ;;  %v1023_v27 = vld [vmem:[%s1555_s3 + $0xfc] ss:$24 sps:$4 sm:$0xff]   ;;  %v1025_v30 = vld [vmem:[%s1555_s3 + $0xf8] ss:$24 sps:$4 sm:$0xff]   ;;  %v1029_v32 = vld [vmem:[%s1555_s3 + $0x12c] ss:$24 sps:$4 sm:$0xff]  }
   0xb   :  { %v1028_v31 = vld [vmem:[%s1555_s3 + $0x120] ss:$24 sps:$4 sm:$0xff]   ;;  %v1032_v34 = vld [vmem:[%s1555_s3 + $0x154] ss:$24 sps:$4 sm:$0xff]   ;;  %v1034_v36 = vld [vmem:[%s1555_s3 + $0x150] ss:$24 sps:$4 sm:$0xff]  }
   0xc   :  { %v1031_v33 = vld [vmem:[%s1555_s3 + $0x128] ss:$24 sps:$4 sm:$0xff]   ;;  %v1035_v35 = vld [vmem:[%s1555_s3 + $0x15c] ss:$24 sps:$4 sm:$0xff]   ;;  %v1037_v38 = vld [vmem:[%s1555_s3 + $0x158] ss:$24 sps:$4 sm:$0xff]  }
   0xd   :  { %712 = vmatpush1.bf16.msra.mxu0 %v1004_v15  ;;  %755 = vmatpush1.bf16.msra.mxu1 %v1007_v18  ;;  %v1038_v37 = vld [vmem:[%s1555_s3 + $0x184] ss:$24 sps:$4 sm:$0xff]   ;;  %v1040_v40 = vld [vmem:[%s1555_s3 + $0x180] ss:$24 sps:$4 sm:$0xff]   ;;  %v1044_v41 = vld [vmem:[%s1555_s3 + $0x1b4] ss:$24 sps:$4 sm:$0xff]  }
   0xe   :  { %713 = vmatprep.subr.bf16.mxu0 %v1008_v17  ;;  %756 = vmatprep.subr.bf16.mxu1 %v1011_v19  ;;  %v1041_v39 = vld [vmem:[%s1555_s3 + $0x18c] ss:$24 sps:$4 sm:$0xff]   ;;  %v1043_v42 = vld [vmem:[%s1555_s3 + $0x188] ss:$24 sps:$4 sm:$0xff]   ;;  %v1047_v58 = vld [vmem:[%s1555_s3 + $0x1bc] ss:$24 sps:$4 sm:$0xff]  }
   0xf   :  { %v1046_v57 = vld [vmem:[%s1555_s3 + $0x1b0] ss:$24 sps:$4 sm:$0xff]   ;;  %v1050_v60 = vld [vmem:[%s1555_s3 + $0x1e4] ss:$24 sps:$4 sm:$0xff]   ;;  %v1052_v61 = vld [vmem:[%s1555_s3 + $0x1e0] ss:$24 sps:$4 sm:$0xff]  }
  0x10   :  { %v1049_v59 = vld [vmem:[%s1555_s3 + $0x1b8] ss:$24 sps:$4 sm:$0xff]   ;;  %v1053_v62 = vld [vmem:[%s1555_s3 + $0x1ec] ss:$24 sps:$4 sm:$0xff]   ;;  %v1055_v63 = vld [vmem:[%s1555_s3 + $0x1e8] ss:$24 sps:$4 sm:$0xff]  }
  0x11   :  { %714 = vmatpush1.bf16.msra.mxu0 %v1010_v20  ;;  %757 = vmatpush1.bf16.msra.mxu1 %v1013_v22  ;;  %v1061_v3 = vld [vmem:[%s1555_s3 + $0x218] ss:$24 sps:$4 sm:$0xff]   ;;  %v1065_v6 = vld [vmem:[%s1555_s3 + $0x24c] ss:$24 sps:$4 sm:$0xff]   ;;  %v1067_v7 = vld [vmem:[%s1555_s3 + $0x248] ss:$24 sps:$4 sm:$0xff]  }
  0x12   :  { %715 = vmatprep.subr.bf16.mxu0 %v1014_v21  ;;  %758 = vmatprep.subr.bf16.mxu1 %v1017_v23  ;;  %v1064_v5 = vld [vmem:[%s1555_s3 + $0x240] ss:$24 sps:$4 sm:$0xff]   ;;  %v1068_v8 = vld [vmem:[%s1555_s3 + $0x274] ss:$24 sps:$4 sm:$0xff]   ;;  %v1070_v10 = vld [vmem:[%s1555_s3 + $0x270] ss:$24 sps:$4 sm:$0xff]  }
  0x13   :  { %v1071_v9 = vld [vmem:[%s1555_s3 + $0x27c] ss:$24 sps:$4 sm:$0xff]   ;;  %v1073_v11 = vld [vmem:[%s1555_s3 + $0x278] ss:$24 sps:$4 sm:$0xff]   ;;  %v1077_v13 = vld [vmem:[%s1555_s3 + $0x2ac] ss:$24 sps:$4 sm:$0xff]  }
  0x14   :  { %v1074_v12 = vld [vmem:[%s1555_s3 + $0x2a4] ss:$24 sps:$4 sm:$0xff]   ;;  %v1076_v14 = vld [vmem:[%s1555_s3 + $0x2a0] ss:$24 sps:$4 sm:$0xff]   ;;  %v1080_v16 = vld [vmem:[%s1555_s3 + $0x2d4] ss:$24 sps:$4 sm:$0xff]  }
  0x15   :  { %716 = vmatpush1.bf16.msra.mxu0 %v1016_v24  ;;  %759 = vmatpush1.bf16.msra.mxu1 %v1019_v26  ;;  %v1079_v15 = vld [vmem:[%s1555_s3 + $0x2a8] ss:$24 sps:$4 sm:$0xff]   ;;  %v1083_v17 = vld [vmem:[%s1555_s3 + $0x2dc] ss:$24 sps:$4 sm:$0xff]   ;;  %v1085_v19 = vld [vmem:[%s1555_s3 + $0x2d8] ss:$24 sps:$4 sm:$0xff]  }
  0x16   :  { %717 = vmatprep.subr.bf16.mxu0 %v1020_v25  ;;  %760 = vmatprep.subr.bf16.mxu1 %v1023_v27  ;;  %v1082_v18 = vld [vmem:[%s1555_s3 + $0x2d0] ss:$24 sps:$4 sm:$0xff]   ;;  %v1088_v20 = vld [vmem:[%s1555_s3 + $0x14] ss:$24 sps:$4 sm:$0xff]   ;;  %v63_v25 = vlaneseq }
  0x19   :  { %718 = vmatpush1.bf16.msra.mxu0 %v1022_v28  ;;  %761 = vmatpush1.bf16.msra.mxu1 %v1025_v30  ;;  %v1407_v28 = vshrl.u32 %v63_v25, 7 }
  0x1a   :  { %719 = vmatprep.subr.bf16.mxu0 %v1026_v29  ;;  %762 = vmatprep.subr.bf16.mxu1 %v1029_v32 }
  0x1b   :  { %v1410_v29 = vsub.s32 1, %v1407_v28  ;;  %v1413_v30 = vsub.s32 0, %v1407_v28 }
  0x1d   :  { %720 = vmatpush1.bf16.msra.mxu0 %v1028_v31  ;;  %763 = vmatpush1.bf16.msra.mxu1 %v1031_v33  ;;  %v61_v31 = vld [vmem:[%s1556_s1] sm:$0x3] }
  0x1e   :  { %721 = vmatprep.subr.bf16.mxu0 %v1032_v34  ;;  %764 = vmatprep.subr.bf16.mxu1 %v1035_v35  ;;  %v70_v34 = vrot.slane %v61_v31, %v1410_v29  ;;  %v77_v35 = vld [vmem:[%s1557_s2] sm:$0x3] }
  0x21   :  { %722 = vmatpush1.bf16.msra.mxu0 %v1034_v36  ;;  %765 = vmatpush1.bf16.msra.mxu1 %v1037_v38 }
  0x22   :  { %723 = vmatprep.subr.bf16.mxu0 %v1038_v37  ;;  %766 = vmatprep.subr.bf16.mxu1 %v1041_v39  ;;  %v66_v37 = vrot.slane %v61_v31, %v1413_v30  ;;  %v86_v39 = vrot.slane %v77_v35, %v1410_v29 }
  0x25   :  { %724 = vmatpush1.bf16.msra.mxu0 %v1040_v40  ;;  %767 = vmatpush1.bf16.msra.mxu1 %v1043_v42  ;;  %v82_v40 = vrot.slane %v77_v35, %v1413_v30 }
  0x26   :  { %725 = vmatprep.subr.bf16.mxu0 %v1044_v41  ;;  %768 = vmatprep.subr.bf16.mxu1 %v1047_v58  ;;  %v1097_v58 = vld [vmem:[%s1555_s3 + $0xa4] ss:$24 sps:$4 sm:$0xff]  }
  0x29   :  { %726 = vmatpush1.bf16.msra.mxu0 %v1046_v57  ;;  %769 = vmatpush1.bf16.msra.mxu1 %v1049_v59  ;;  %v1092_v57 = vld [vmem:[%s1555_s3 + $0x70] ss:$24 sps:$4 sm:$0xff]   ;;  %v1095_v59 = vld [vmem:[%s1555_s3 + $0xa0] ss:$24 sps:$4 sm:$0xff]  }
  0x2a   :  { %727 = vmatprep.subr.bf16.mxu0 %v1050_v60  ;;  %770 = vmatprep.subr.bf16.mxu1 %v1053_v62  ;;  %v1100_v60 = vld [vmem:[%s1555_s3 + $0xd4] ss:$24 sps:$4 sm:$0xff]   ;;  %v1103_v62 = vld [vmem:[%s1555_s3 + $0x104] ss:$24 sps:$4 sm:$0xff]  }
  0x2d   :  { %728 = vmatpush1.bf16.msra.mxu0 %v1052_v61  ;;  %771 = vmatpush1.bf16.msra.mxu1 %v1055_v63  ;;  %v1098_v61 = vld [vmem:[%s1555_s3 + $0xd0] ss:$24 sps:$4 sm:$0xff]   ;;  %v1101_v63 = vld [vmem:[%s1555_s3 + $0x100] ss:$24 sps:$4 sm:$0xff]  }
  0x91   :  { %v30_v43 = vpop.xlane.xlu0 %29 }
  0x92   :  { %v35_v44 = vmul.f32 0.00390625, %v30_v43 }
  0x94   :  { %v1304_v45 = vsub.f32 %v1171_v0, %v35_v44  ;;  %v1307_v46 = vsub.f32 %v1176_v1, %v35_v44  ;;  %v1056_v0 = vld [vmem:[%s1555_s3 + $0x214] ss:$24 sps:$4 sm:$0xff]   ;;  %v1058_v1 = vld [vmem:[%s1555_s3 + $0x210] ss:$24 sps:$4 sm:$0xff]  }
  0x95   :  { %v33_v47 = vpop.xlane.xlu0 %32  ;;  %729 = vmatprep.subr.bf16.mxu0 %v1056_v0  ;;  %v1106_v0 = vld [vmem:[%s1555_s3 + $0x134] ss:$24 sps:$4 sm:$0xff]  }
  0x96   :  { %v36_v48 = vmul.f32 0.00390625, %v33_v47  ;;  %v41_v49 = vmul.f32 %v1304_v45, %v1304_v45  ;;  %v42_v50 = vmul.f32 %v1307_v46, %v1307_v46  ;;  %730 = vmatpush1.bf16.msra.mxu0 %v1058_v1  ;;  %v1104_v1 = vld [vmem:[%s1555_s3 + $0x130] ss:$24 sps:$4 sm:$0xff]  }
  0x98   :  { %v1314_v51 = vsub.f32 %v1181_v2, %v36_v48  ;;  %v1317_v52 = vsub.f32 %v1188_v4, %v36_v48  ;;  %v45_v53 = vadd.f32 %v42_v50, %v41_v49  ;;  %v1059_v2 = vld [vmem:[%s1555_s3 + $0x21c] ss:$24 sps:$4 sm:$0xff]  }
  0x99   :  { %772 = vmatprep.subr.bf16.mxu1 %v1059_v2  ;;  %v1062_v4 = vld [vmem:[%s1555_s3 + $0x244] ss:$24 sps:$4 sm:$0xff]  }
  0x9a   :  { %46 = vadd.xlane.f32.xlu1 %v45_v53  ;;  %v43_v54 = vmul.f32 %v1314_v51, %v1314_v51  ;;  %v44_v55 = vmul.f32 %v1317_v52, %v1317_v52  ;;  %773 = vmatpush1.bf16.msra.mxu1 %v1061_v3  ;;  %v1109_v2 = vld [vmem:[%s1555_s3 + $0x164] ss:$24 sps:$4 sm:$0xff]   ;;  %v1107_v3 = vld [vmem:[%s1555_s3 + $0x160] ss:$24 sps:$4 sm:$0xff]  }
  0x9b   :  { %731 = vmatprep.subr.bf16.mxu0 %v1062_v4  ;;  %774 = vmatprep.subr.bf16.mxu1 %v1065_v6  ;;  %v1112_v4 = vld [vmem:[%s1555_s3 + $0x194] ss:$24 sps:$4 sm:$0xff]   ;;  %v1115_v6 = vld [vmem:[%s1555_s3 + $0x1c4] ss:$24 sps:$4 sm:$0xff]  }
  0x9c   :  { %v48_v56 = vadd.f32 %v44_v55, %v43_v54  ;;  %732 = vmatpush1.bf16.msra.mxu0 %v1064_v5  ;;  %v1086_v54 = vld [vmem:[%s1555_s3 + $0x10] ss:$24 sps:$4 sm:$0xff]  }
  0x9d   :  { %733 = vmatprep.subr.bf16.mxu0 %v1068_v8  ;;  %v1110_v5 = vld [vmem:[%s1555_s3 + $0x190] ss:$24 sps:$4 sm:$0xff]   ;;  %v1118_v8 = vld [vmem:[%s1555_s3 + $0x1f4] ss:$24 sps:$4 sm:$0xff]  }
  0x9e   :  { %49 = vadd.xlane.f32.xlu1 %v48_v56  ;;  %775 = vmatpush1.bf16.msra.mxu1 %v1067_v7  ;;  %v1094_v56 = vld [vmem:[%s1555_s3 + $0x74] ss:$24 sps:$4 sm:$0xff]   ;;  %v1113_v7 = vld [vmem:[%s1555_s3 + $0x1c0] ss:$24 sps:$4 sm:$0xff]  }
  0x9f   :  { %776 = vmatprep.subr.bf16.mxu1 %v1071_v9  ;;  %v1116_v9 = vld [vmem:[%s1555_s3 + $0x1f0] ss:$24 sps:$4 sm:$0xff]  }
  0xa0   :  { %734 = vmatpush1.bf16.msra.mxu0 %v1070_v10  ;;  %v1121_v10 = vld [vmem:[%s1555_s3 + $0x224] ss:$24 sps:$4 sm:$0xff]  }
  0xa1   :  { %735 = vmatprep.subr.bf16.mxu0 %v1074_v12  ;;  %v1124_v12 = vld [vmem:[%s1555_s3 + $0x254] ss:$24 sps:$4 sm:$0xff]  }
  0xa2   :  { %777 = vmatpush1.bf16.msra.mxu1 %v1073_v11  ;;  %v1119_v11 = vld [vmem:[%s1555_s3 + $0x220] ss:$24 sps:$4 sm:$0xff]  }
  0xa3   :  { %778 = vmatprep.subr.bf16.mxu1 %v1077_v13  ;;  %v1122_v13 = vld [vmem:[%s1555_s3 + $0x250] ss:$24 sps:$4 sm:$0xff]  }
  0xa4   :  { %736 = vmatpush1.bf16.msra.mxu0 %v1076_v14  ;;  %v1127_v14 = vld [vmem:[%s1555_s3 + $0x284] ss:$24 sps:$4 sm:$0xff]  }
  0xa5   :  { %737 = vmatprep.subr.bf16.mxu0 %v1080_v16  ;;  %v1130_v16 = vld [vmem:[%s1555_s3 + $0x2b4] ss:$24 sps:$4 sm:$0xff]  }
  0xa6   :  { %779 = vmatpush1.bf16.msra.mxu1 %v1079_v15  ;;  %v1125_v15 = vld [vmem:[%s1555_s3 + $0x280] ss:$24 sps:$4 sm:$0xff]  }
  0xa7   :  { %780 = vmatprep.subr.bf16.mxu1 %v1083_v17  ;;  %v1128_v17 = vld [vmem:[%s1555_s3 + $0x2b0] ss:$24 sps:$4 sm:$0xff]  }
  0xa8   :  { %738 = vmatpush1.bf16.msra.mxu0 %v1082_v18  ;;  %v1133_v18 = vld [vmem:[%s1555_s3 + $0x2e4] ss:$24 sps:$4 sm:$0xff]  }
  0xa9   :  { %793 = vmatprep.subr.bf16.mxu0 %v1088_v20  ;;  %v207_v20 = vsub.s32 2, %v1407_v28 }
  0xaa   :  { %781 = vmatpush1.bf16.msra.mxu1 %v1085_v19  ;;  %v1131_v19 = vld [vmem:[%s1555_s3 + $0x2e0] ss:$24 sps:$4 sm:$0xff]  }
 0x127   :  { %v47_v21 = vpop.xlane.xlu1 %46 }
 0x128   :  { %v51_v22 = vmul.f32 0.00390625, %v47_v21  ;;  %v195_v21 = vld [vmem:[%s1558_s4] sm:$0x3f] }
 0x129   :  { %v204_v25 = vrot.slane %v195_v21, %v1410_v29 }
 0x12a   :  { %v53_v23 = vadd.f32 1e-06, %v51_v22  ;;  %v211_v22 = vsub.s32 3, %v1407_v28 }
 0x12b   :  { %v50_v24 = vpop.xlane.xlu1 %49 }
 0x12c   :  { %1134 = vrsqrt.f32 %v53_v23  ;;  %v52_v26 = vmul.f32 0.00390625, %v50_v24  ;;  %v200_v23 = vrot.slane %v195_v21, %v1413_v30  ;;  %v208_v24 = vrot.slane %v195_v21, %v207_v20 }
 0x12e   :  { %v54_v27 = vadd.f32 1e-06, %v52_v26  ;;  %v212_v26 = vrot.slane %v195_v21, %v211_v22 }
 0x130   :  { %1136 = vrsqrt.f32 %v54_v27 }
 0x136   :  { %v1135_v32 = vpop.eup %1134 }
 0x137   :  { %v58_v33 = vmul.f32 %v1135_v32, %v1307_v46  ;;  %v57_v36 = vmul.f32 %v1135_v32, %v1304_v45 }
 0x139   :  { %v74_v42 = vmul.f32 %v70_v34, %v58_v33  ;;  %v73_v44 = vmul.f32 %v66_v37, %v57_v36 }
 0x13a   :  { %v1137_v38 = vpop.eup %1136 }
 0x13b   :  { %v60_v41 = vmul.f32 %v1137_v38, %v1317_v52  ;;  %v59_v43 = vmul.f32 %v1137_v38, %v1314_v51  ;;  %v90_v48 = vadd.f32 %v86_v39, %v74_v42  ;;  %v89_v50 = vadd.f32 %v82_v40, %v73_v44  ;;  %v1091_v52 = vld [vmem:[%s1555_s3 + $0x44] ss:$24 sps:$4 sm:$0xff]   ;;  %v1089_v51 = vld [vmem:[%s1555_s3 + $0x40] ss:$24 sps:$4 sm:$0xff]  }
 0x13d   :  { %v76_v46 = vmul.f32 %v70_v34, %v60_v41  ;;  %v75_v47 = vmul.f32 %v66_v37, %v59_v43 }
 0x13f   :  { %v92_v49 = vadd.f32 %v86_v39, %v76_v46  ;;  %v91_v53 = vadd.f32 %v82_v40, %v75_v47 }
 0x141   :  { %v94_v45 = vpack.c.bf16 %v92_v49, %v90_v48  ;;  %v1432_v55 = vpack.c.bf16 %v91_v53, %v89_v50  ;;  %v215_v49 = vsub.s32 4, %v1407_v28  ;;  %v219_v50 = vsub.s32 5, %v1407_v28 }
 0x143   :  { %739 = vmatprep.mubr.bf16.mxu0 %v94_v45  ;;  %782 = vmatprep.mubr.bf16.mxu1 %v94_v45  ;;  %v216_v53 = vrot.slane %v195_v21, %v215_v49 }
 0x144   :  { %740 = vmatmul.mubr.bf16.vlgmr.msra.gmra.mrb[0].mxu0 %v1432_v55  ;;  %783 = vmatmul.mubr.bf16.vlgmr.msra.gmra.mrb[0].mxu1 %v1432_v55 }
 0x145   :  { %794 = vmatpush1.bf16.msra.mxu0 %v1086_v54  ;;  %825 = vmatprep.mubr.bf16.mxu0 %v94_v45  ;;  %v220_v45 = vrot.slane %v195_v21, %v219_v50 }
 0x146   :  { %795 = vmatprep.subr.bf16.mxu0 %v1091_v52 }
 0x149   :  { %796 = vmatpush1.bf16.msra.mxu0 %v1089_v51 }
 0x14a   :  { %797 = vmatprep.subr.bf16.mxu0 %v1094_v56 }
 0x14d   :  { %798 = vmatpush1.bf16.msra.mxu0 %v1092_v57 }
 0x14e   :  { %799 = vmatprep.subr.bf16.mxu0 %v1097_v58 }
 0x151   :  { %800 = vmatpush1.bf16.msra.mxu0 %v1095_v59 }
 0x152   :  { %801 = vmatprep.subr.bf16.mxu0 %v1100_v60 }
 0x155   :  { %802 = vmatpush1.bf16.msra.mxu0 %v1098_v61 }
 0x156   :  { %803 = vmatprep.subr.bf16.mxu0 %v1103_v62 }
 0x159   :  { %804 = vmatpush1.bf16.msra.mxu0 %v1101_v63 }
 0x15a   :  { %805 = vmatprep.subr.bf16.mxu0 %v1106_v0 }
 0x15d   :  { %806 = vmatpush1.bf16.msra.mxu0 %v1104_v1 }
 0x15e   :  { %807 = vmatprep.subr.bf16.mxu0 %v1109_v2 }
 0x161   :  { %808 = vmatpush1.bf16.msra.mxu0 %v1107_v3 }
 0x162   :  { %809 = vmatprep.subr.bf16.mxu0 %v1112_v4 }
 0x165   :  { %810 = vmatpush1.bf16.msra.mxu0 %v1110_v5 }
 0x166   :  { %811 = vmatprep.subr.bf16.mxu0 %v1115_v6 }
 0x169   :  { %812 = vmatpush1.bf16.msra.mxu0 %v1113_v7 }
 0x16a   :  { %813 = vmatprep.subr.bf16.mxu0 %v1118_v8 }
 0x16d   :  { %814 = vmatpush1.bf16.msra.mxu0 %v1116_v9 }
 0x16e   :  { %815 = vmatprep.subr.bf16.mxu0 %v1121_v10 }
 0x171   :  { %816 = vmatpush1.bf16.msra.mxu0 %v1119_v11 }
 0x172   :  { %817 = vmatprep.subr.bf16.mxu0 %v1124_v12 }
 0x175   :  { %818 = vmatpush1.bf16.msra.mxu0 %v1122_v13 }
 0x176   :  { %819 = vmatprep.subr.bf16.mxu0 %v1127_v14 }
 0x179   :  { %820 = vmatpush1.bf16.msra.mxu0 %v1125_v15 }
 0x17a   :  { %821 = vmatprep.subr.bf16.mxu0 %v1130_v16 }
 0x17d   :  { %822 = vmatpush1.bf16.msra.mxu0 %v1128_v17 }
 0x17e   :  { %823 = vmatprep.subr.bf16.mxu0 %v1133_v18 }
 0x181   :  { %824 = vmatpush1.bf16.msra.mxu0 %v1131_v19 }
 0x184   :  { %826 = vmatmul.mubr.bf16.vlgmr.msra.gmra.mrb[4].mxu0 %v1432_v55 }
 0x217   :  { %v741_v27 = vpop.f32.mrb[0].mxu0  ;;  %v784_v31 = vpop.f32.mrb[0].mxu1 }
 0x218   :  { %v742_v32 = vadd.f32 %v741_v27, %v200_v23  ;;  %v785_v33 = vadd.f32 %v784_v31, %v208_v24  ;;  %v743_v34 = vpop.f32.mrb[1].mxu0  ;;  %v786_v35 = vpop.f32.mrb[1].mxu1 }
 0x219   :  { %v744_v36 = vadd.f32 %v743_v34, %v204_v25  ;;  %v787_v37 = vadd.f32 %v786_v35, %v212_v26  ;;  %v745_v38 = vpop.f32.mrb[2].mxu0  ;;  %v788_v39 = vpop.f32.mrb[2].mxu1 }
 0x21a   :  { %v746_v40 = vadd.f32 %v745_v38, %v200_v23  ;;  %v789_v41 = vadd.f32 %v788_v39, %v208_v24  ;;  %v747_v42 = vpop.f32.mrb[3].mxu0  ;;  %v790_v43 = vpop.f32.mrb[3].mxu1 }
 0x21b   :  { %v984_v44 = vpack.c.bf16 %v744_v36, %v742_v32  ;;  %v985_v30 = vpack.c.bf16 %v787_v37, %v785_v33  ;;  %v748_v46 = vadd.f32 %v747_v42, %v204_v25  ;;  %v791_v47 = vadd.f32 %v790_v43, %v212_v26 }
 0x21d   :  { %872 = vst [vmem:[%s1559_s5] sm:$0xff] %v984_v44  ;;  %873 = vst [vmem:[%s1559_s5 + $0x8] sm:$0xff] %v985_v30  ;;  %v987_v29 = vpack.c.bf16 %v748_v46, %v746_v40  ;;  %v988_v48 = vpack.c.bf16 %v791_v47, %v789_v41 }
 0x21f   :  { %875 = vst [vmem:[%s1559_s5 + $0x18] sm:$0xff] %v987_v29  ;;  %876 = vst [vmem:[%s1559_s5 + $0x20] sm:$0xff] %v988_v48 }
 0x257   :  { %v827_v54 = vpop.f32.mrb[4].mxu0 }
 0x258   :  { %v828_v55 = vadd.f32 %v827_v54, %v216_v53  ;;  %v829_v52 = vpop.f32.mrb[5].mxu0 }
 0x259   :  { %v830_v51 = vadd.f32 %v829_v52, %v220_v45  ;;  %v831_v56 = vpop.f32.mrb[6].mxu0 }
 0x25a   :  { %v832_v57 = vadd.f32 %v831_v56, %v216_v53  ;;  %v833_v58 = vpop.f32.mrb[7].mxu0 }
 0x25b   :  { %v986_v59 = vpack.c.bf16 %v830_v51, %v828_v55  ;;  %v834_v60 = vadd.f32 %v833_v58, %v220_v45 }
 0x25d   :  { %874 = vst [vmem:[%s1559_s5 + $0x10] sm:$0xff] %v986_v59  ;;  %v989_v61 = vpack.c.bf16 %v834_v60, %v832_v57 }
 0x25f   :  { %877 = vst [vmem:[%s1559_s5 + $0x28] sm:$0xff] %v989_v61 }

// kernel: vit_to_deepcad_latent.16
= control target key start
LH: loop header
LB: loop body
LE: loop exit
PB: predicated region body
PF: predicated region fallthrough
CT: control target
= control target key end

     0   :  { %s2108_s0 = inlined_call_operand.vmem [shape: f32[16,256], index: 0, kind: input, shape index: {}]   ;;  %s2109_s3 = inlined_call_operand.vmem [shape: bf16[256,1024], index: 3, kind: input, shape index: {}]   ;;  %s2110_s1 = inlined_call_operand.vmem [shape: f32[1,256], index: 1, kind: input, shape index: {}]   ;;  %s2111_s2 = inlined_call_operand.vmem [shape: f32[1,256], index: 2, kind: input, shape index: {}]   ;;  %s2112_s4 = inlined_call_operand.vmem [shape: f32[1,1024], index: 4, kind: input, shape index: {}]   ;;  %s2113_s5 = inlined_call_operand.vmem [shape: bf16[16,1024], index: 5, kind: output, shape index: {}]  }
   0x1   :  { %v1498_v0 = vld [vmem:[%s2108_s0] sm:$0xff]  ;;  %v1503_v1 = vld [vmem:[%s2108_s0 + $0x8] sm:$0xff]  ;;  %v1508_v2 = vld [vmem:[%s2108_s0 + $0x10] sm:$0xff] }
   0x2   :  { %v28_v3 = vadd.f32 %v1503_v1, %v1498_v0  ;;  %v1515_v4 = vld [vmem:[%s2108_s0 + $0x18] sm:$0xff]  ;;  %v99_v6 = vld [vmem:[%s2109_s3] sm:$0xff]  ;;  %v100_v8 = vld [vmem:[%s2109_s3 + $0x8] sm:$0xff] }
   0x3   :  { %v31_v5 = vadd.f32 %v1515_v4, %v1508_v2  ;;  %v103_v7 = vld [vmem:[%s2109_s3 + $0x20] sm:$0xff]  ;;  %v104_v10 = vld [vmem:[%s2109_s3 + $0x28] sm:$0xff] }
   0x4   :  { %29 = vadd.xlane.f32.xlu0 %v28_v3  ;;  %v1286_v9 = vcombine.high %v99_v6, %v103_v7  ;;  %v1285_v11 = vcombine.low %v99_v6, %v103_v7  ;;  %v107_v12 = vld [vmem:[%s2109_s3 + $0x40] sm:$0xff]  ;;  %v1288_v14 = vcombine.high %v100_v8, %v104_v10  ;;  %v1287_v15 = vcombine.low %v100_v8, %v104_v10  ;;  %v108_v17 = vld [vmem:[%s2109_s3 + $0x48] sm:$0xff] }
   0x5   :  { %v111_v13 = vld [vmem:[%s2109_s3 + $0x60] sm:$0xff]  ;;  %v112_v18 = vld [vmem:[%s2109_s3 + $0x68] sm:$0xff] }
   0x6   :  { %v1294_v16 = vcombine.high %v107_v12, %v111_v13  ;;  %v115_v19 = vld [vmem:[%s2109_s3 + $0x80] sm:$0xff]  ;;  %909 = vmatprep.subr.bf16.mxu0 %v1286_v9  ;;  %v1296_v20 = vcombine.high %v108_v17, %v112_v18  ;;  %v116_v22 = vld [vmem:[%s2109_s3 + $0x88] sm:$0xff]  ;;  %952 = vmatprep.subr.bf16.mxu1 %v1288_v14  ;;  %v1293_v24 = vcombine.low %v107_v12, %v111_v13 }
   0x7   :  { %v119_v21 = vld [vmem:[%s2109_s3 + $0xa0] sm:$0xff]  ;;  %v120_v23 = vld [vmem:[%s2109_s3 + $0xa8] sm:$0xff]  ;;  %910 = vmatpush1.bf16.msra.mxu0 %v1285_v11  ;;  %953 = vmatpush1.bf16.msra.mxu1 %v1287_v15  ;;  %v1295_v25 = vcombine.low %v108_v17, %v112_v18 }
   0x8   :  { %32 = vadd.xlane.f32.xlu0 %v31_v5  ;;  %911 = vmatprep.subr.bf16.mxu0 %v1294_v16  ;;  %v1302_v26 = vcombine.high %v115_v19, %v119_v21  ;;  %v1304_v27 = vcombine.high %v116_v22, %v120_v23  ;;  %v123_v28 = vld [vmem:[%s2109_s3 + $0xc0] sm:$0xff]  ;;  %v124_v30 = vld [vmem:[%s2109_s3 + $0xc8] sm:$0xff]  ;;  %v1301_v32 = vcombine.low %v115_v19, %v119_v21 }
   0x9   :  { %954 = vmatprep.subr.bf16.mxu1 %v1296_v20  ;;  %v127_v29 = vld [vmem:[%s2109_s3 + $0xe0] sm:$0xff]  ;;  %v128_v31 = vld [vmem:[%s2109_s3 + $0xe8] sm:$0xff]  ;;  %v1303_v33 = vcombine.low %v116_v22, %v120_v23 }
   0xa   :  { %v1310_v34 = vcombine.high %v123_v28, %v127_v29  ;;  %v1312_v35 = vcombine.high %v124_v30, %v128_v31  ;;  %v131_v36 = vld [vmem:[%s2109_s3 + $0x100] sm:$0xff]  ;;  %v132_v38 = vld [vmem:[%s2109_s3 + $0x108] sm:$0xff]  ;;  %v1309_v40 = vcombine.low %v123_v28, %v127_v29  ;;  %v1311_v41 = vcombine.low %v124_v30, %v128_v31 }
   0xb   :  { %912 = vmatpush1.bf16.msra.mxu0 %v1293_v24  ;;  %955 = vmatpush1.bf16.msra.mxu1 %v1295_v25  ;;  %v135_v37 = vld [vmem:[%s2109_s3 + $0x120] sm:$0xff]  ;;  %v136_v39 = vld [vmem:[%s2109_s3 + $0x128] sm:$0xff] }
   0xc   :  { %913 = vmatprep.subr.bf16.mxu0 %v1302_v26  ;;  %956 = vmatprep.subr.bf16.mxu1 %v1304_v27  ;;  %v1318_v42 = vcombine.high %v131_v36, %v135_v37  ;;  %v1320_v43 = vcombine.high %v132_v38, %v136_v39  ;;  %v139_v44 = vld [vmem:[%s2109_s3 + $0x140] sm:$0xff]  ;;  %v140_v46 = vld [vmem:[%s2109_s3 + $0x148] sm:$0xff]  ;;  %v1317_v48 = vcombine.low %v131_v36, %v135_v37 }
   0xd   :  { %v143_v45 = vld [vmem:[%s2109_s3 + $0x160] sm:$0xff]  ;;  %v144_v47 = vld [vmem:[%s2109_s3 + $0x168] sm:$0xff]  ;;  %v1319_v49 = vcombine.low %v132_v38, %v136_v39 }
   0xe   :  { %v1326_v50 = vcombine.high %v139_v44, %v143_v45  ;;  %v1328_v51 = vcombine.high %v140_v46, %v144_v47  ;;  %v147_v52 = vld [vmem:[%s2109_s3 + $0x180] sm:$0xff]  ;;  %v148_v54 = vld [vmem:[%s2109_s3 + $0x188] sm:$0xff]  ;;  %v1325_v56 = vcombine.low %v139_v44, %v143_v45  ;;  %v1327_v57 = vcombine.low %v140_v46, %v144_v47 }
   0xf   :  { %914 = vmatpush1.bf16.msra.mxu0 %v1301_v32  ;;  %957 = vmatpush1.bf16.msra.mxu1 %v1303_v33  ;;  %v151_v53 = vld [vmem:[%s2109_s3 + $0x1a0] sm:$0xff]  ;;  %v152_v55 = vld [vmem:[%s2109_s3 + $0x1a8] sm:$0xff] }
  0x10   :  { %915 = vmatprep.subr.bf16.mxu0 %v1310_v34  ;;  %958 = vmatprep.subr.bf16.mxu1 %v1312_v35  ;;  %v1334_v58 = vcombine.high %v147_v52, %v151_v53  ;;  %v1336_v59 = vcombine.high %v148_v54, %v152_v55  ;;  %v155_v60 = vld [vmem:[%s2109_s3 + $0x1c0] sm:$0xff]  ;;  %v156_v62 = vld [vmem:[%s2109_s3 + $0x1c8] sm:$0xff]  ;;  %v1333_v3 = vcombine.low %v147_v52, %v151_v53 }
  0x11   :  { %v159_v61 = vld [vmem:[%s2109_s3 + $0x1e0] sm:$0xff]  ;;  %v160_v63 = vld [vmem:[%s2109_s3 + $0x1e8] sm:$0xff]  ;;  %v1335_v5 = vcombine.low %v148_v54, %v152_v55 }
  0x12   :  { %v1342_v6 = vcombine.high %v155_v60, %v159_v61  ;;  %v1344_v7 = vcombine.high %v156_v62, %v160_v63  ;;  %v163_v8 = vld [vmem:[%s2109_s3 + $0x200] sm:$0xff]  ;;  %v164_v10 = vld [vmem:[%s2109_s3 + $0x208] sm:$0xff]  ;;  %v1341_v12 = vcombine.low %v155_v60, %v159_v61  ;;  %v1343_v13 = vcombine.low %v156_v62, %v160_v63 }
  0x13   :  { %916 = vmatpush1.bf16.msra.mxu0 %v1309_v40  ;;  %959 = vmatpush1.bf16.msra.mxu1 %v1311_v41  ;;  %v167_v9 = vld [vmem:[%s2109_s3 + $0x220] sm:$0xff]  ;;  %v168_v11 = vld [vmem:[%s2109_s3 + $0x228] sm:$0xff] }
  0x14   :  { %917 = vmatprep.subr.bf16.mxu0 %v1318_v42  ;;  %960 = vmatprep.subr.bf16.mxu1 %v1320_v43  ;;  %v1350_v14 = vcombine.high %v163_v8, %v167_v9  ;;  %v1352_v15 = vcombine.high %v164_v10, %v168_v11  ;;  %v171_v16 = vld [vmem:[%s2109_s3 + $0x240] sm:$0xff]  ;;  %v172_v18 = vld [vmem:[%s2109_s3 + $0x248] sm:$0xff]  ;;  %v1349_v20 = vcombine.low %v163_v8, %v167_v9 }
  0x15   :  { %v175_v17 = vld [vmem:[%s2109_s3 + $0x260] sm:$0xff]  ;;  %v176_v19 = vld [vmem:[%s2109_s3 + $0x268] sm:$0xff]  ;;  %v1351_v21 = vcombine.low %v164_v10, %v168_v11 }
  0x16   :  { %v1358_v22 = vcombine.high %v171_v16, %v175_v17  ;;  %v1360_v23 = vcombine.high %v172_v18, %v176_v19  ;;  %v1357_v36 = vcombine.low %v171_v16, %v175_v17  ;;  %v1359_v37 = vcombine.low %v172_v18, %v176_v19  ;;  %v180_v38 = vld [vmem:[%s2109_s3 + $0x288] sm:$0xff]  ;;  %v187_v44 = vld [vmem:[%s2109_s3 + $0x2c0] sm:$0xff] }
  0x17   :  { %918 = vmatpush1.bf16.msra.mxu0 %v1317_v48  ;;  %961 = vmatpush1.bf16.msra.mxu1 %v1319_v49  ;;  %v184_v40 = vld [vmem:[%s2109_s3 + $0x2a8] sm:$0xff]  ;;  %v191_v45 = vld [vmem:[%s2109_s3 + $0x2e0] sm:$0xff] }
  0x18   :  { %919 = vmatprep.subr.bf16.mxu0 %v1326_v50  ;;  %962 = vmatprep.subr.bf16.mxu1 %v1328_v51  ;;  %v1368_v41 = vcombine.high %v180_v38, %v184_v40  ;;  %v1367_v43 = vcombine.low %v180_v38, %v184_v40  ;;  %v188_v46 = vld [vmem:[%s2109_s3 + $0x2c8] sm:$0xff]  ;;  %v1374_v47 = vcombine.high %v187_v44, %v191_v45  ;;  %v195_v52 = vld [vmem:[%s2109_s3 + $0x300] sm:$0xff] }
  0x19   :  { %v192_v48 = vld [vmem:[%s2109_s3 + $0x2e8] sm:$0xff]  ;;  %v1373_v50 = vcombine.low %v187_v44, %v191_v45  ;;  %v199_v53 = vld [vmem:[%s2109_s3 + $0x320] sm:$0xff] }
  0x1a   :  { %v1376_v49 = vcombine.high %v188_v46, %v192_v48  ;;  %v1375_v51 = vcombine.low %v188_v46, %v192_v48  ;;  %v196_v54 = vld [vmem:[%s2109_s3 + $0x308] sm:$0xff]  ;;  %v1382_v55 = vcombine.high %v195_v52, %v199_v53  ;;  %v203_v60 = vld [vmem:[%s2109_s3 + $0x340] sm:$0xff] }
  0x1b   :  { %920 = vmatpush1.bf16.msra.mxu0 %v1325_v56  ;;  %963 = vmatpush1.bf16.msra.mxu1 %v1327_v57  ;;  %v200_v56 = vld [vmem:[%s2109_s3 + $0x328] sm:$0xff]  ;;  %v207_v61 = vld [vmem:[%s2109_s3 + $0x360] sm:$0xff] }
  0x1c   :  { %921 = vmatprep.subr.bf16.mxu0 %v1334_v58  ;;  %964 = vmatprep.subr.bf16.mxu1 %v1336_v59  ;;  %v1384_v57 = vcombine.high %v196_v54, %v200_v56  ;;  %v1381_v58 = vcombine.low %v195_v52, %v199_v53  ;;  %v1383_v59 = vcombine.low %v196_v54, %v200_v56  ;;  %v204_v62 = vld [vmem:[%s2109_s3 + $0x348] sm:$0xff]  ;;  %v211_v8 = vld [vmem:[%s2109_s3 + $0x380] sm:$0xff] }
  0x1d   :  { %v1390_v63 = vcombine.high %v203_v60, %v207_v61  ;;  %v215_v9 = vld [vmem:[%s2109_s3 + $0x3a0] sm:$0xff]  ;;  %v212_v10 = vld [vmem:[%s2109_s3 + $0x388] sm:$0xff] }
  0x1e   :  { %v1398_v11 = vcombine.high %v211_v8, %v215_v9  ;;  %v219_v16 = vld [vmem:[%s2109_s3 + $0x3c0] sm:$0xff]  ;;  %v220_v18 = vld [vmem:[%s2109_s3 + $0x3c8] sm:$0xff] }
  0x1f   :  { %922 = vmatpush1.bf16.msra.mxu0 %v1333_v3  ;;  %965 = vmatpush1.bf16.msra.mxu1 %v1335_v5  ;;  %v208_v3 = vld [vmem:[%s2109_s3 + $0x368] sm:$0xff]  ;;  %v223_v17 = vld [vmem:[%s2109_s3 + $0x3e0] sm:$0xff] }
  0x20   :  { %923 = vmatprep.subr.bf16.mxu0 %v1342_v6  ;;  %966 = vmatprep.subr.bf16.mxu1 %v1344_v7  ;;  %v1392_v5 = vcombine.high %v204_v62, %v208_v3  ;;  %v1389_v6 = vcombine.low %v203_v60, %v207_v61  ;;  %v1391_v7 = vcombine.low %v204_v62, %v208_v3  ;;  %v109_v60 = vld [vmem:[%s2109_s3 + $0x50] sm:$0xff] }
  0x21   :  { %v1406_v19 = vcombine.high %v219_v16, %v223_v17  ;;  %v113_v61 = vld [vmem:[%s2109_s3 + $0x70] sm:$0xff] }
  0x22   :  { %v117_v3 = vld [vmem:[%s2109_s3 + $0x90] sm:$0xff] }
  0x23   :  { %924 = vmatpush1.bf16.msra.mxu0 %v1341_v12  ;;  %967 = vmatpush1.bf16.msra.mxu1 %v1343_v13  ;;  %v216_v12 = vld [vmem:[%s2109_s3 + $0x3a8] sm:$0xff] }
  0x24   :  { %925 = vmatprep.subr.bf16.mxu0 %v1350_v14  ;;  %968 = vmatprep.subr.bf16.mxu1 %v1352_v15  ;;  %v1400_v13 = vcombine.high %v212_v10, %v216_v12  ;;  %v1397_v14 = vcombine.low %v211_v8, %v215_v9  ;;  %v1399_v15 = vcombine.low %v212_v10, %v216_v12  ;;  %v118_v8 = vld [vmem:[%s2109_s3 + $0x98] sm:$0xff] }
  0x25   :  { %v122_v9 = vld [vmem:[%s2109_s3 + $0xb8] sm:$0xff]  ;;  %v1297_v10 = vcombine.low %v109_v60, %v113_v61 }
  0x27   :  { %926 = vmatpush1.bf16.msra.mxu0 %v1349_v20  ;;  %969 = vmatpush1.bf16.msra.mxu1 %v1351_v21  ;;  %v224_v20 = vld [vmem:[%s2109_s3 + $0x3e8] sm:$0xff]  ;;  %v1405_v21 = vcombine.low %v219_v16, %v223_v17  ;;  %v126_v16 = vld [vmem:[%s2109_s3 + $0xd8] sm:$0xff] }
  0x28   :  { %927 = vmatprep.subr.bf16.mxu0 %v1358_v22  ;;  %970 = vmatprep.subr.bf16.mxu1 %v1360_v23  ;;  %v1408_v22 = vcombine.high %v220_v18, %v224_v20  ;;  %v1407_v23 = vcombine.low %v220_v18, %v224_v20  ;;  %v130_v17 = vld [vmem:[%s2109_s3 + $0xf8] sm:$0xff] }
  0x2b   :  { %928 = vmatpush1.bf16.msra.mxu0 %v1357_v36  ;;  %971 = vmatpush1.bf16.msra.mxu1 %v1359_v37 }
  0x2c   :  { %972 = vmatprep.subr.bf16.mxu1 %v1368_v41 }
  0x2f   :  { %973 = vmatpush1.bf16.msra.mxu1 %v1367_v43 }
  0x30   :  { %974 = vmatprep.subr.bf16.mxu1 %v1376_v49 }
  0x33   :  { %975 = vmatpush1.bf16.msra.mxu1 %v1375_v51 }
  0x34   :  { %976 = vmatprep.subr.bf16.mxu1 %v1384_v57 }
  0x37   :  { %977 = vmatpush1.bf16.msra.mxu1 %v1383_v59 }
  0x38   :  { %978 = vmatprep.subr.bf16.mxu1 %v1392_v5  ;;  %v1298_v5 = vcombine.high %v109_v60, %v113_v61 }
  0x3b   :  { %979 = vmatpush1.bf16.msra.mxu1 %v1391_v7  ;;  %v121_v7 = vld [vmem:[%s2109_s3 + $0xb0] sm:$0xff] }
  0x3c   :  { %980 = vmatprep.subr.bf16.mxu1 %v1400_v13  ;;  %v1306_v12 = vcombine.high %v117_v3, %v121_v7  ;;  %v1308_v13 = vcombine.high %v118_v8, %v122_v9  ;;  %v1305_v18 = vcombine.low %v117_v3, %v121_v7  ;;  %v174_v3 = vld [vmem:[%s2109_s3 + $0x258] sm:$0xff] }
  0x3f   :  { %981 = vmatpush1.bf16.msra.mxu1 %v1399_v15  ;;  %v129_v15 = vld [vmem:[%s2109_s3 + $0xf0] sm:$0xff] }
  0x40   :  { %982 = vmatprep.subr.bf16.mxu1 %v1408_v22  ;;  %v133_v22 = vld [vmem:[%s2109_s3 + $0x110] sm:$0xff] }
  0x43   :  { %983 = vmatpush1.bf16.msra.mxu1 %v1407_v23  ;;  %v137_v23 = vld [vmem:[%s2109_s3 + $0x130] sm:$0xff] }
  0x91   :  { %v30_v24 = vpop.xlane.xlu0 %29 }
  0x92   :  { %v35_v25 = vmul.f32 0.00390625, %v30_v24  ;;  %v101_v24 = vld [vmem:[%s2109_s3 + $0x10] sm:$0xff] }
  0x94   :  { %v1640_v26 = vsub.f32 %v1498_v0, %v35_v25  ;;  %v1643_v27 = vsub.f32 %v1503_v1, %v35_v25  ;;  %v105_v25 = vld [vmem:[%s2109_s3 + $0x30] sm:$0xff] }
  0x95   :  { %v33_v28 = vpop.xlane.xlu0 %32 }
  0x96   :  { %v36_v29 = vmul.f32 0.00390625, %v33_v28  ;;  %v41_v30 = vmul.f32 %v1640_v26, %v1640_v26  ;;  %v42_v31 = vmul.f32 %v1643_v27, %v1643_v27  ;;  %v102_v28 = vld [vmem:[%s2109_s3 + $0x18] sm:$0xff] }
  0x98   :  { %v1650_v32 = vsub.f32 %v1508_v2, %v36_v29  ;;  %v1653_v33 = vsub.f32 %v1515_v4, %v36_v29  ;;  %v45_v34 = vadd.f32 %v42_v31, %v41_v30  ;;  %v179_v2 = vld [vmem:[%s2109_s3 + $0x280] sm:$0xff]  ;;  %v1290_v29 = vcombine.high %v101_v24, %v105_v25  ;;  %v106_v30 = vld [vmem:[%s2109_s3 + $0x38] sm:$0xff] }
  0x99   :  { %v183_v4 = vld [vmem:[%s2109_s3 + $0x2a0] sm:$0xff]  ;;  %v1289_v31 = vcombine.low %v101_v24, %v105_v25  ;;  %v134_v24 = vld [vmem:[%s2109_s3 + $0x118] sm:$0xff] }
  0x9a   :  { %46 = vadd.xlane.f32.xlu1 %v45_v34  ;;  %v43_v0 = vmul.f32 %v1650_v32, %v1650_v32  ;;  %v44_v1 = vmul.f32 %v1653_v33, %v1653_v33  ;;  %v1366_v39 = vcombine.high %v179_v2, %v183_v4  ;;  %v1365_v42 = vcombine.low %v179_v2, %v183_v4  ;;  %v138_v25 = vld [vmem:[%s2109_s3 + $0x138] sm:$0xff] }
  0x9b   :  { %v1291_v34 = vcombine.low %v102_v28, %v106_v30  ;;  %v63_v2 = vlaneseq }
  0x9c   :  { %v48_v35 = vadd.f32 %v44_v1, %v43_v0  ;;  %929 = vmatprep.subr.bf16.mxu0 %v1366_v39  ;;  %v1292_v0 = vcombine.high %v102_v28, %v106_v30  ;;  %v1322_v30 = vcombine.high %v133_v22, %v137_v23 }
  0x9d   :  { %930 = vmatpush1.bf16.msra.mxu0 %v1365_v42  ;;  %v1743_v39 = vshrl.u32 %v63_v2, 7  ;;  %v61_v42 = vld [vmem:[%s2110_s1] sm:$0x3] }
  0x9e   :  { %49 = vadd.xlane.f32.xlu1 %v48_v35  ;;  %931 = vmatprep.subr.bf16.mxu0 %v1374_v47  ;;  %v77_v47 = vld [vmem:[%s2111_s2] sm:$0x3] }
  0x9f   :  { %1038 = vmatprep.subr.bf16.mxu1 %v1292_v0  ;;  %v1746_v40 = vsub.s32 1, %v1743_v39  ;;  %v1749_v41 = vsub.s32 0, %v1743_v39  ;;  %v145_v0 = vld [vmem:[%s2109_s3 + $0x170] sm:$0xff] }
  0xa1   :  { %932 = vmatpush1.bf16.msra.mxu0 %v1373_v50  ;;  %v70_v46 = vrot.slane %v61_v42, %v1746_v40  ;;  %v66_v48 = vrot.slane %v61_v42, %v1749_v41  ;;  %v86_v50 = vrot.slane %v77_v47, %v1746_v40  ;;  %v82_v51 = vrot.slane %v77_v47, %v1749_v41  ;;  %v153_v42 = vld [vmem:[%s2109_s3 + $0x1b0] sm:$0xff] }
  0xa2   :  { %933 = vmatprep.subr.bf16.mxu0 %v1382_v55 }
  0xa5   :  { %934 = vmatpush1.bf16.msra.mxu0 %v1381_v58 }
  0xa6   :  { %935 = vmatprep.subr.bf16.mxu0 %v1390_v63 }
  0xa9   :  { %936 = vmatpush1.bf16.msra.mxu0 %v1389_v6 }
  0xaa   :  { %937 = vmatprep.subr.bf16.mxu0 %v1398_v11 }
  0xad   :  { %938 = vmatpush1.bf16.msra.mxu0 %v1397_v14  ;;  %v125_v14 = vld [vmem:[%s2109_s3 + $0xd0] sm:$0xff] }
  0xae   :  { %939 = vmatprep.subr.bf16.mxu0 %v1406_v19  ;;  %v1307_v19 = vcombine.low %v118_v8, %v122_v9  ;;  %v1314_v20 = vcombine.high %v125_v14, %v129_v15  ;;  %v1313_v28 = vcombine.low %v125_v14, %v129_v15 }
  0xb1   :  { %940 = vmatpush1.bf16.msra.mxu0 %v1405_v21  ;;  %v1316_v21 = vcombine.high %v126_v16, %v130_v17 }
  0xb2   :  { %995 = vmatprep.subr.bf16.mxu0 %v1290_v29  ;;  %v1315_v29 = vcombine.low %v126_v16, %v130_v17 }
 0x127   :  { %v47_v1 = vpop.xlane.xlu1 %46 }
 0x128   :  { %v51_v35 = vmul.f32 0.00390625, %v47_v1  ;;  %v142_v1 = vld [vmem:[%s2109_s3 + $0x158] sm:$0xff] }
 0x12a   :  { %v53_v36 = vadd.f32 1e-06, %v51_v35  ;;  %v146_v35 = vld [vmem:[%s2109_s3 + $0x178] sm:$0xff] }
 0x12b   :  { %v50_v37 = vpop.xlane.xlu1 %49 }
 0x12c   :  { %1429 = vrsqrt.f32 %v53_v36  ;;  %v52_v4 = vmul.f32 0.00390625, %v50_v37  ;;  %v1321_v36 = vcombine.low %v133_v22, %v137_v23  ;;  %v1323_v37 = vcombine.low %v134_v24, %v138_v25 }
 0x12e   :  { %v54_v38 = vadd.f32 1e-06, %v52_v4  ;;  %v1332_v4 = vcombine.high %v142_v1, %v146_v35 }
 0x130   :  { %1431 = vrsqrt.f32 %v54_v38  ;;  %v149_v38 = vld [vmem:[%s2109_s3 + $0x190] sm:$0xff] }
 0x131   :  { %v1338_v47 = vcombine.high %v149_v38, %v153_v42 }
 0x136   :  { %v1430_v43 = vpop.eup %1429 }
 0x137   :  { %v57_v44 = vmul.f32 %v1430_v43, %v1640_v26  ;;  %v58_v45 = vmul.f32 %v1430_v43, %v1643_v27  ;;  %v150_v43 = vld [vmem:[%s2109_s3 + $0x198] sm:$0xff] }
 0x139   :  { %v74_v26 = vmul.f32 %v70_v46, %v58_v45  ;;  %v73_v54 = vmul.f32 %v66_v48, %v57_v44  ;;  %v154_v44 = vld [vmem:[%s2109_s3 + $0x1b8] sm:$0xff] }
 0x13a   :  { %v1432_v49 = vpop.eup %1431 }
 0x13b   :  { %v59_v52 = vmul.f32 %v1432_v49, %v1650_v32  ;;  %v60_v53 = vmul.f32 %v1432_v49, %v1653_v33  ;;  %v90_v56 = vadd.f32 %v86_v50, %v74_v26  ;;  %v89_v58 = vadd.f32 %v82_v51, %v73_v54  ;;  %v110_v32 = vld [vmem:[%s2109_s3 + $0x58] sm:$0xff]  ;;  %v157_v49 = vld [vmem:[%s2109_s3 + $0x1d0] sm:$0xff] }
 0x13c   :  { %v114_v33 = vld [vmem:[%s2109_s3 + $0x78] sm:$0xff]  ;;  %v1339_v26 = vcombine.low %v150_v43, %v154_v44 }
 0x13d   :  { %v76_v27 = vmul.f32 %v70_v46, %v60_v53  ;;  %v75_v55 = vmul.f32 %v66_v48, %v59_v52  ;;  %v1300_v6 = vcombine.high %v110_v32, %v114_v33  ;;  %v1299_v11 = vcombine.low %v110_v32, %v114_v33  ;;  %v162_v52 = vld [vmem:[%s2109_s3 + $0x1f8] sm:$0xff]  ;;  %v173_v33 = vld [vmem:[%s2109_s3 + $0x250] sm:$0xff] }
 0x13e   :  { %v1331_v46 = vcombine.low %v142_v1, %v146_v35  ;;  %v1340_v48 = vcombine.high %v150_v43, %v154_v44  ;;  %v1337_v53 = vcombine.low %v149_v38, %v153_v42 }
 0x13f   :  { %v92_v57 = vadd.f32 %v86_v50, %v76_v27  ;;  %v91_v59 = vadd.f32 %v82_v51, %v75_v55  ;;  %v161_v50 = vld [vmem:[%s2109_s3 + $0x1f0] sm:$0xff]  ;;  %v158_v51 = vld [vmem:[%s2109_s3 + $0x1d8] sm:$0xff] }
 0x140   :  { %v1346_v54 = vcombine.high %v157_v49, %v161_v50  ;;  %v1348_v27 = vcombine.high %v158_v51, %v162_v52  ;;  %v165_v55 = vld [vmem:[%s2109_s3 + $0x210] sm:$0xff]  ;;  %v1347_v60 = vcombine.low %v158_v51, %v162_v52 }
 0x141   :  { %v94_v62 = vpack.c.bf16 %v92_v57, %v90_v56  ;;  %v1777_v63 = vpack.c.bf16 %v91_v59, %v89_v58  ;;  %v169_v56 = vld [vmem:[%s2109_s3 + $0x230] sm:$0xff]  ;;  %v166_v57 = vld [vmem:[%s2109_s3 + $0x218] sm:$0xff]  ;;  %v1345_v59 = vcombine.low %v157_v49, %v161_v50 }
 0x142   :  { %v170_v58 = vld [vmem:[%s2109_s3 + $0x238] sm:$0xff]  ;;  %v1354_v61 = vcombine.high %v165_v55, %v169_v56 }
 0x143   :  { %941 = vmatprep.mubr.bf16.mxu0 %v94_v62  ;;  %984 = vmatprep.mubr.bf16.mxu1 %v94_v62  ;;  %v1356_v32 = vcombine.high %v166_v57, %v170_v58  ;;  %v1355_v7 = vcombine.low %v166_v57, %v170_v58 }
 0x144   :  { %942 = vmatmul.mubr.bf16.vlgmr.msra.gmra.mrb[0].mxu0 %v1777_v63  ;;  %985 = vmatmul.mubr.bf16.vlgmr.msra.gmra.mrb[0].mxu1 %v1777_v63 }
 0x145   :  { %996 = vmatpush1.bf16.msra.mxu0 %v1289_v31  ;;  %1039 = vmatpush1.bf16.msra.mxu1 %v1291_v34  ;;  %v1324_v31 = vcombine.high %v134_v24, %v138_v25  ;;  %v141_v34 = vld [vmem:[%s2109_s3 + $0x150] sm:$0xff] }
 0x146   :  { %1027 = vmatprep.mubr.bf16.mxu0 %v94_v62  ;;  %1070 = vmatprep.mubr.bf16.mxu1 %v94_v62  ;;  %v1330_v2 = vcombine.high %v141_v34, %v145_v0  ;;  %v1329_v45 = vcombine.low %v141_v34, %v145_v0  ;;  %v177_v62 = vld [vmem:[%s2109_s3 + $0x270] sm:$0xff] }
 0x147   :  { %997 = vmatprep.subr.bf16.mxu0 %v1298_v5  ;;  %1040 = vmatprep.subr.bf16.mxu1 %v1300_v6  ;;  %v178_v5 = vld [vmem:[%s2109_s3 + $0x278] sm:$0xff]  ;;  %v1353_v6 = vcombine.low %v165_v55, %v169_v56  ;;  %v1362_v8 = vcombine.high %v173_v33, %v177_v62  ;;  %v1361_v14 = vcombine.low %v173_v33, %v177_v62  ;;  %v243_v33 = vsub.s32 3, %v1743_v39 }
 0x148   :  { %v1364_v9 = vcombine.high %v174_v3, %v178_v5  ;;  %v1363_v15 = vcombine.low %v174_v3, %v178_v5 }
 0x149   :  { %998 = vmatpush1.bf16.msra.mxu0 %v1297_v10  ;;  %1041 = vmatpush1.bf16.msra.mxu1 %v1299_v11  ;;  %v181_v10 = vld [vmem:[%s2109_s3 + $0x290] sm:$0xff] }
 0x14a   :  { %999 = vmatprep.subr.bf16.mxu0 %v1306_v12  ;;  %1042 = vmatprep.subr.bf16.mxu1 %v1308_v13  ;;  %v185_v11 = vld [vmem:[%s2109_s3 + $0x2b0] sm:$0xff]  ;;  %v182_v12 = vld [vmem:[%s2109_s3 + $0x298] sm:$0xff] }
 0x14b   :  { %v186_v13 = vld [vmem:[%s2109_s3 + $0x2b8] sm:$0xff]  ;;  %v1370_v16 = vcombine.high %v181_v10, %v185_v11  ;;  %v1369_v22 = vcombine.low %v181_v10, %v185_v11 }
 0x14c   :  { %v1372_v17 = vcombine.high %v182_v12, %v186_v13  ;;  %v1371_v23 = vcombine.low %v182_v12, %v186_v13 }
 0x14d   :  { %1000 = vmatpush1.bf16.msra.mxu0 %v1305_v18  ;;  %1043 = vmatpush1.bf16.msra.mxu1 %v1307_v19  ;;  %v189_v18 = vld [vmem:[%s2109_s3 + $0x2d0] sm:$0xff] }
 0x14e   :  { %1001 = vmatprep.subr.bf16.mxu0 %v1314_v20  ;;  %1044 = vmatprep.subr.bf16.mxu1 %v1316_v21  ;;  %v193_v19 = vld [vmem:[%s2109_s3 + $0x2f0] sm:$0xff]  ;;  %v190_v20 = vld [vmem:[%s2109_s3 + $0x2d8] sm:$0xff] }
 0x14f   :  { %v194_v21 = vld [vmem:[%s2109_s3 + $0x2f8] sm:$0xff]  ;;  %v1378_v24 = vcombine.high %v189_v18, %v193_v19  ;;  %v1377_v34 = vcombine.low %v189_v18, %v193_v19 }
 0x150   :  { %v1380_v25 = vcombine.high %v190_v20, %v194_v21  ;;  %v1379_v0 = vcombine.low %v190_v20, %v194_v21 }
 0x151   :  { %1002 = vmatpush1.bf16.msra.mxu0 %v1313_v28  ;;  %1045 = vmatpush1.bf16.msra.mxu1 %v1315_v29  ;;  %v197_v28 = vld [vmem:[%s2109_s3 + $0x310] sm:$0xff] }
 0x152   :  { %1003 = vmatprep.subr.bf16.mxu0 %v1322_v30  ;;  %1046 = vmatprep.subr.bf16.mxu1 %v1324_v31  ;;  %v201_v29 = vld [vmem:[%s2109_s3 + $0x330] sm:$0xff]  ;;  %v198_v30 = vld [vmem:[%s2109_s3 + $0x318] sm:$0xff] }
 0x153   :  { %v202_v31 = vld [vmem:[%s2109_s3 + $0x338] sm:$0xff]  ;;  %v1386_v1 = vcombine.high %v197_v28, %v201_v29  ;;  %v1385_v38 = vcombine.low %v197_v28, %v201_v29 }
 0x154   :  { %v1388_v35 = vcombine.high %v198_v30, %v202_v31  ;;  %v1387_v42 = vcombine.low %v198_v30, %v202_v31 }
 0x155   :  { %1004 = vmatpush1.bf16.msra.mxu0 %v1321_v36  ;;  %1047 = vmatpush1.bf16.msra.mxu1 %v1323_v37  ;;  %v205_v36 = vld [vmem:[%s2109_s3 + $0x350] sm:$0xff] }
 0x156   :  { %1005 = vmatprep.subr.bf16.mxu0 %v1330_v2  ;;  %1048 = vmatprep.subr.bf16.mxu1 %v1332_v4  ;;  %v209_v37 = vld [vmem:[%s2109_s3 + $0x370] sm:$0xff]  ;;  %v206_v2 = vld [vmem:[%s2109_s3 + $0x358] sm:$0xff] }
 0x157   :  { %v210_v4 = vld [vmem:[%s2109_s3 + $0x378] sm:$0xff]  ;;  %v1394_v43 = vcombine.high %v205_v36, %v209_v37  ;;  %v1393_v49 = vcombine.low %v205_v36, %v209_v37 }
 0x158   :  { %v1396_v44 = vcombine.high %v206_v2, %v210_v4  ;;  %v1395_v50 = vcombine.low %v206_v2, %v210_v4 }
 0x159   :  { %1006 = vmatpush1.bf16.msra.mxu0 %v1329_v45  ;;  %1049 = vmatpush1.bf16.msra.mxu1 %v1331_v46  ;;  %v213_v45 = vld [vmem:[%s2109_s3 + $0x390] sm:$0xff] }
 0x15a   :  { %1007 = vmatprep.subr.bf16.mxu0 %v1338_v47  ;;  %1050 = vmatprep.subr.bf16.mxu1 %v1340_v48  ;;  %v217_v46 = vld [vmem:[%s2109_s3 + $0x3b0] sm:$0xff]  ;;  %v214_v47 = vld [vmem:[%s2109_s3 + $0x398] sm:$0xff] }
 0x15b   :  { %v218_v48 = vld [vmem:[%s2109_s3 + $0x3b8] sm:$0xff]  ;;  %v1402_v51 = vcombine.high %v213_v45, %v217_v46  ;;  %v1401_v55 = vcombine.low %v213_v45, %v217_v46 }
 0x15c   :  { %v1404_v52 = vcombine.high %v214_v47, %v218_v48  ;;  %v1403_v56 = vcombine.low %v214_v47, %v218_v48 }
 0x15d   :  { %1008 = vmatpush1.bf16.msra.mxu0 %v1337_v53  ;;  %1051 = vmatpush1.bf16.msra.mxu1 %v1339_v26  ;;  %v221_v53 = vld [vmem:[%s2109_s3 + $0x3d0] sm:$0xff] }
 0x15e   :  { %1009 = vmatprep.subr.bf16.mxu0 %v1346_v54  ;;  %1052 = vmatprep.subr.bf16.mxu1 %v1348_v27  ;;  %v225_v26 = vld [vmem:[%s2109_s3 + $0x3f0] sm:$0xff]  ;;  %v222_v54 = vld [vmem:[%s2109_s3 + $0x3d8] sm:$0xff] }
 0x15f   :  { %v226_v27 = vld [vmem:[%s2109_s3 + $0x3f8] sm:$0xff]  ;;  %v1410_v57 = vcombine.high %v221_v53, %v225_v26 }
 0x160   :  { %v1412_v58 = vcombine.high %v222_v54, %v226_v27 }
 0x161   :  { %1010 = vmatpush1.bf16.msra.mxu0 %v1345_v59  ;;  %1053 = vmatpush1.bf16.msra.mxu1 %v1347_v60  ;;  %v1409_v59 = vcombine.low %v221_v53, %v225_v26  ;;  %v1411_v60 = vcombine.low %v222_v54, %v226_v27 }
 0x162   :  { %1011 = vmatprep.subr.bf16.mxu0 %v1354_v61  ;;  %1054 = vmatprep.subr.bf16.mxu1 %v1356_v32  ;;  %v239_v61 = vsub.s32 2, %v1743_v39  ;;  %v1955_v32 = vld [vmem:[%s2112_s4] sm:$0xff] }
 0x163   :  { %v232_v62 = vrot.slane %v1955_v32, %v1749_v41  ;;  %v236_v5 = vrot.slane %v1955_v32, %v1746_v40 }
 0x164   :  { %v240_v3 = vrot.slane %v1955_v32, %v239_v61 }
 0x165   :  { %1012 = vmatpush1.bf16.msra.mxu0 %v1353_v6  ;;  %1055 = vmatpush1.bf16.msra.mxu1 %v1355_v7  ;;  %v244_v6 = vrot.slane %v1955_v32, %v243_v33 }
 0x166   :  { %1013 = vmatprep.subr.bf16.mxu0 %v1362_v8  ;;  %1056 = vmatprep.subr.bf16.mxu1 %v1364_v9 }
 0x169   :  { %1014 = vmatpush1.bf16.msra.mxu0 %v1361_v14  ;;  %1057 = vmatpush1.bf16.msra.mxu1 %v1363_v15 }
 0x16a   :  { %1015 = vmatprep.subr.bf16.mxu0 %v1370_v16  ;;  %1058 = vmatprep.subr.bf16.mxu1 %v1372_v17 }
 0x16d   :  { %1016 = vmatpush1.bf16.msra.mxu0 %v1369_v22  ;;  %1059 = vmatpush1.bf16.msra.mxu1 %v1371_v23 }
 0x16e   :  { %1017 = vmatprep.subr.bf16.mxu0 %v1378_v24  ;;  %1060 = vmatprep.subr.bf16.mxu1 %v1380_v25 }
 0x171   :  { %1018 = vmatpush1.bf16.msra.mxu0 %v1377_v34  ;;  %1061 = vmatpush1.bf16.msra.mxu1 %v1379_v0 }
 0x172   :  { %1019 = vmatprep.subr.bf16.mxu0 %v1386_v1  ;;  %1062 = vmatprep.subr.bf16.mxu1 %v1388_v35 }
 0x175   :  { %1020 = vmatpush1.bf16.msra.mxu0 %v1385_v38  ;;  %1063 = vmatpush1.bf16.msra.mxu1 %v1387_v42 }
 0x176   :  { %1021 = vmatprep.subr.bf16.mxu0 %v1394_v43  ;;  %1064 = vmatprep.subr.bf16.mxu1 %v1396_v44 }
 0x179   :  { %1022 = vmatpush1.bf16.msra.mxu0 %v1393_v49  ;;  %1065 = vmatpush1.bf16.msra.mxu1 %v1395_v50 }
 0x17a   :  { %1023 = vmatprep.subr.bf16.mxu0 %v1402_v51  ;;  %1066 = vmatprep.subr.bf16.mxu1 %v1404_v52 }
 0x17d   :  { %1024 = vmatpush1.bf16.msra.mxu0 %v1401_v55  ;;  %1067 = vmatpush1.bf16.msra.mxu1 %v1403_v56 }
 0x17e   :  { %1025 = vmatprep.subr.bf16.mxu0 %v1410_v57  ;;  %1068 = vmatprep.subr.bf16.mxu1 %v1412_v58 }
 0x181   :  { %1026 = vmatpush1.bf16.msra.mxu0 %v1409_v59  ;;  %1069 = vmatpush1.bf16.msra.mxu1 %v1411_v60 }
 0x184   :  { %1028 = vmatmul.mubr.bf16.vlgmr.msra.gmra.mrb[4].mxu0 %v1777_v63  ;;  %1071 = vmatmul.mubr.bf16.vlgmr.msra.gmra.mrb[4].mxu1 %v1777_v63 }
 0x217   :  { %v943_v63 = vpop.f32.mrb[0].mxu0  ;;  %v986_v7 = vpop.f32.mrb[0].mxu1 }
 0x218   :  { %v1964_v8 = vadd.f32 %v943_v63, %v232_v62  ;;  %v1966_v9 = vadd.f32 %v986_v7, %v240_v3  ;;  %v945_v10 = vpop.f32.mrb[1].mxu0  ;;  %v988_v11 = vpop.f32.mrb[1].mxu1 }
 0x219   :  { %v1968_v12 = vadd.f32 %v945_v10, %v236_v5  ;;  %v1970_v13 = vadd.f32 %v988_v11, %v244_v6  ;;  %v947_v41 = vpop.f32.mrb[2].mxu0  ;;  %v990_v14 = vpop.f32.mrb[2].mxu1 }
 0x21a   :  { %v1081_v15 = vmul.f32 %v1964_v8, %v1964_v8  ;;  %v1083_v40 = vmul.f32 %v1966_v9, %v1966_v9  ;;  %v1976_v16 = vadd.f32 %v947_v41, %v232_v62  ;;  %v1978_v17 = vadd.f32 %v990_v14, %v240_v3  ;;  %v949_v18 = vpop.f32.mrb[3].mxu0  ;;  %v992_v19 = vpop.f32.mrb[3].mxu1 }
 0x21b   :  { %v1082_v20 = vmul.f32 %v1968_v12, %v1968_v12  ;;  %v1084_v21 = vmul.f32 %v1970_v13, %v1970_v13  ;;  %v1984_v22 = vadd.f32 %v949_v18, %v236_v5  ;;  %v1986_v23 = vadd.f32 %v992_v19, %v244_v6 }
 0x21c   :  { %v1097_v24 = vmul.f32 %v1081_v15, %v1964_v8  ;;  %v1099_v25 = vmul.f32 %v1083_v40, %v1966_v9  ;;  %v1089_v28 = vmul.f32 %v1976_v16, %v1976_v16  ;;  %v1091_v29 = vmul.f32 %v1978_v17, %v1978_v17 }
 0x21d   :  { %v1098_v30 = vmul.f32 %v1082_v20, %v1968_v12  ;;  %v1100_v31 = vmul.f32 %v1084_v21, %v1970_v13  ;;  %v1090_v34 = vmul.f32 %v1984_v22, %v1984_v22  ;;  %v1092_v0 = vmul.f32 %v1986_v23, %v1986_v23 }
 0x21e   :  { %v1113_v1 = vmul.f32 0.044715, %v1097_v24  ;;  %v1115_v35 = vmul.f32 0.044715, %v1099_v25  ;;  %v1105_v36 = vmul.f32 %v1089_v28, %v1976_v16  ;;  %v1107_v37 = vmul.f32 %v1091_v29, %v1978_v17 }
 0x21f   :  { %v1114_v2 = vmul.f32 0.044715, %v1098_v30  ;;  %v1116_v4 = vmul.f32 0.044715, %v1100_v31  ;;  %v1106_v38 = vmul.f32 %v1090_v34, %v1984_v22  ;;  %v1108_v42 = vmul.f32 %v1092_v0, %v1986_v23 }
 0x220   :  { %v1129_v43 = vadd.f32 %v1113_v1, %v1964_v8  ;;  %v1131_v44 = vadd.f32 %v1115_v35, %v1966_v9  ;;  %v1121_v45 = vmul.f32 0.044715, %v1105_v36  ;;  %v1123_v46 = vmul.f32 0.044715, %v1107_v37 }
 0x221   :  { %v1130_v47 = vadd.f32 %v1114_v2, %v1968_v12  ;;  %v1132_v48 = vadd.f32 %v1116_v4, %v1970_v13  ;;  %v1122_v49 = vmul.f32 0.044715, %v1106_v38  ;;  %v1124_v50 = vmul.f32 0.044715, %v1108_v42 }
 0x222   :  { %v1145_v51 = vmul.f32 0.7978846, %v1129_v43  ;;  %v1147_v52 = vmul.f32 0.7978846, %v1131_v44  ;;  %v1137_v53 = vadd.f32 %v1121_v45, %v1976_v16  ;;  %v1139_v26 = vadd.f32 %v1123_v46, %v1978_v17 }
 0x223   :  { %v1146_v54 = vmul.f32 0.7978846, %v1130_v47  ;;  %v1148_v27 = vmul.f32 0.7978846, %v1132_v48  ;;  %v1138_v55 = vadd.f32 %v1122_v49, %v1984_v22  ;;  %v1140_v56 = vadd.f32 %v1124_v50, %v1986_v23 }
 0x224   :  { %1433 = vtanh.f32 %v1145_v51  ;;  %v1153_v57 = vmul.f32 0.7978846, %v1137_v53  ;;  %v1155_v58 = vmul.f32 0.7978846, %v1139_v26  ;;  %v259_v38 = vsub.s32 7, %v1743_v39 }
 0x225   :  { %1435 = vtanh.f32 %v1147_v52  ;;  %v1154_v59 = vmul.f32 0.7978846, %v1138_v55  ;;  %v1156_v60 = vmul.f32 0.7978846, %v1140_v56 }
 0x226   :  { %1437 = vtanh.f32 %v1146_v54  ;;  %v260_v44 = vrot.slane %v1955_v32, %v259_v38 }
 0x227   :  { %1439 = vtanh.f32 %v1148_v27 }
 0x228   :  { %1441 = vtanh.f32 %v1153_v57 }
 0x229   :  { %1443 = vtanh.f32 %v1155_v58 }
 0x22a   :  { %1445 = vtanh.f32 %v1154_v59 }
 0x22b   :  { %1447 = vtanh.f32 %v1156_v60 }
 0x22e   :  { %v1434_v61 = vpop.eup %1433 }
 0x22f   :  { %v1436_v33 = vpop.eup %1435  ;;  %v1177_v62 = vadd.f32 1.0, %v1434_v61 }
 0x230   :  { %v1438_v3 = vpop.eup %1437  ;;  %v1179_v5 = vadd.f32 1.0, %v1436_v33 }
 0x231   :  { %v1440_v6 = vpop.eup %1439  ;;  %v1193_v63 = vmul.f32 0.5, %v1177_v62  ;;  %v1178_v7 = vadd.f32 1.0, %v1438_v3 }
 0x232   :  { %v1442_v10 = vpop.eup %1441  ;;  %v1195_v11 = vmul.f32 0.5, %v1179_v5  ;;  %v1180_v41 = vadd.f32 1.0, %v1440_v6 }
 0x233   :  { %v1444_v14 = vpop.eup %1443  ;;  %v1209_v15 = vmul.f32 %v1193_v63, %v1964_v8  ;;  %v1194_v40 = vmul.f32 0.5, %v1178_v7  ;;  %v1185_v18 = vadd.f32 1.0, %v1442_v10 }
 0x234   :  { %v1446_v19 = vpop.eup %1445  ;;  %v1211_v20 = vmul.f32 %v1195_v11, %v1966_v9  ;;  %v1196_v21 = vmul.f32 0.5, %v1180_v41  ;;  %v1187_v24 = vadd.f32 1.0, %v1444_v14 }
 0x235   :  { %v1448_v25 = vpop.eup %1447  ;;  %v1210_v28 = vmul.f32 %v1194_v40, %v1968_v12  ;;  %v1201_v29 = vmul.f32 0.5, %v1185_v18  ;;  %v1186_v30 = vadd.f32 1.0, %v1446_v19 }
 0x236   :  { %v1212_v31 = vmul.f32 %v1196_v21, %v1970_v13  ;;  %v1203_v34 = vmul.f32 0.5, %v1187_v24  ;;  %v1188_v0 = vadd.f32 1.0, %v1448_v25 }
 0x237   :  { %v1421_v1 = vpack.c.bf16 %v1210_v28, %v1209_v15  ;;  %v1217_v35 = vmul.f32 %v1201_v29, %v1976_v16  ;;  %v1202_v8 = vmul.f32 0.5, %v1186_v30  ;;  %v247_v16 = vsub.s32 4, %v1743_v39 }
 0x238   :  { %v1422_v36 = vpack.c.bf16 %v1212_v31, %v1211_v20  ;;  %v1219_v37 = vmul.f32 %v1203_v34, %v1978_v17  ;;  %v1204_v2 = vmul.f32 0.5, %v1188_v0  ;;  %v255_v17 = vsub.s32 6, %v1743_v39 }
 0x239   :  { %1273 = vst [vmem:[%s2113_s5] sm:$0xff] %v1421_v1  ;;  %v1218_v9 = vmul.f32 %v1202_v8, %v1984_v22  ;;  %v251_v22 = vsub.s32 5, %v1743_v39 }
 0x23a   :  { %1274 = vst [vmem:[%s2113_s5 + $0x8] sm:$0xff] %v1422_v36  ;;  %v1220_v12 = vmul.f32 %v1204_v2, %v1986_v23  ;;  %v248_v23 = vrot.slane %v1955_v32, %v247_v16  ;;  %v256_v42 = vrot.slane %v1955_v32, %v255_v17 }
 0x23b   :  { %v1425_v13 = vpack.c.bf16 %v1218_v9, %v1217_v35  ;;  %v252_v43 = vrot.slane %v1955_v32, %v251_v22 }
 0x23c   :  { %v1426_v4 = vpack.c.bf16 %v1220_v12, %v1219_v37 }
 0x23d   :  { %1277 = vst [vmem:[%s2113_s5 + $0x20] sm:$0xff] %v1425_v13 }
 0x23e   :  { %1278 = vst [vmem:[%s2113_s5 + $0x28] sm:$0xff] %v1426_v4 }
 0x257   :  { %v1029_v45 = vpop.f32.mrb[4].mxu0  ;;  %v1072_v46 = vpop.f32.mrb[4].mxu1 }
 0x258   :  { %v2040_v47 = vadd.f32 %v1029_v45, %v248_v23  ;;  %v2042_v48 = vadd.f32 %v1072_v46, %v256_v42  ;;  %v1031_v49 = vpop.f32.mrb[5].mxu0  ;;  %v1074_v50 = vpop.f32.mrb[5].mxu1 }
 0x259   :  { %v2044_v51 = vadd.f32 %v1031_v49, %v252_v43  ;;  %v2046_v52 = vadd.f32 %v1074_v50, %v260_v44  ;;  %v1033_v39 = vpop.f32.mrb[6].mxu0  ;;  %v1076_v53 = vpop.f32.mrb[6].mxu1 }
 0x25a   :  { %v1085_v26 = vmul.f32 %v2040_v47, %v2040_v47  ;;  %v1087_v32 = vmul.f32 %v2042_v48, %v2042_v48  ;;  %v2052_v54 = vadd.f32 %v1033_v39, %v248_v23  ;;  %v2054_v27 = vadd.f32 %v1076_v53, %v256_v42  ;;  %v1035_v55 = vpop.f32.mrb[7].mxu0  ;;  %v1078_v56 = vpop.f32.mrb[7].mxu1 }
 0x25b   :  { %v1086_v57 = vmul.f32 %v2044_v51, %v2044_v51  ;;  %v1088_v58 = vmul.f32 %v2046_v52, %v2046_v52  ;;  %v2060_v59 = vadd.f32 %v1035_v55, %v252_v43  ;;  %v2062_v60 = vadd.f32 %v1078_v56, %v260_v44 }
 0x25c   :  { %v1101_v61 = vmul.f32 %v1085_v26, %v2040_v47  ;;  %v1103_v33 = vmul.f32 %v1087_v32, %v2042_v48  ;;  %v1093_v62 = vmul.f32 %v2052_v54, %v2052_v54  ;;  %v1095_v3 = vmul.f32 %v2054_v27, %v2054_v27 }
 0x25d   :  { %v1102_v5 = vmul.f32 %v1086_v57, %v2044_v51  ;;  %v1104_v6 = vmul.f32 %v1088_v58, %v2046_v52  ;;  %v1094_v63 = vmul.f32 %v2060_v59, %v2060_v59  ;;  %v1096_v7 = vmul.f32 %v2062_v60, %v2062_v60 }
 0x25e   :  { %v1117_v10 = vmul.f32 0.044715, %v1101_v61  ;;  %v1119_v11 = vmul.f32 0.044715, %v1103_v33  ;;  %v1109_v41 = vmul.f32 %v1093_v62, %v2052_v54  ;;  %v1111_v14 = vmul.f32 %v1095_v3, %v2054_v27 }
 0x25f   :  { %v1118_v15 = vmul.f32 0.044715, %v1102_v5  ;;  %v1120_v40 = vmul.f32 0.044715, %v1104_v6  ;;  %v1110_v18 = vmul.f32 %v1094_v63, %v2060_v59  ;;  %v1112_v19 = vmul.f32 %v1096_v7, %v2062_v60 }
 0x260   :  { %v1133_v20 = vadd.f32 %v1117_v10, %v2040_v47  ;;  %v1135_v21 = vadd.f32 %v1119_v11, %v2042_v48  ;;  %v1125_v24 = vmul.f32 0.044715, %v1109_v41  ;;  %v1127_v25 = vmul.f32 0.044715, %v1111_v14 }
 0x261   :  { %v1134_v28 = vadd.f32 %v1118_v15, %v2044_v51  ;;  %v1136_v29 = vadd.f32 %v1120_v40, %v2046_v52  ;;  %v1126_v30 = vmul.f32 0.044715, %v1110_v18  ;;  %v1128_v31 = vmul.f32 0.044715, %v1112_v19 }
 0x262   :  { %v1149_v34 = vmul.f32 0.7978846, %v1133_v20  ;;  %v1151_v0 = vmul.f32 0.7978846, %v1135_v21  ;;  %v1141_v1 = vadd.f32 %v1125_v24, %v2052_v54  ;;  %v1143_v35 = vadd.f32 %v1127_v25, %v2054_v27 }
 0x263   :  { %v1150_v8 = vmul.f32 0.7978846, %v1134_v28  ;;  %v1152_v36 = vmul.f32 0.7978846, %v1136_v29  ;;  %v1142_v37 = vadd.f32 %v1126_v30, %v2060_v59  ;;  %v1144_v2 = vadd.f32 %v1128_v31, %v2062_v60 }
 0x264   :  { %1449 = vtanh.f32 %v1149_v34  ;;  %v1157_v9 = vmul.f32 0.7978846, %v1141_v1  ;;  %v1159_v12 = vmul.f32 0.7978846, %v1143_v35 }
 0x265   :  { %1451 = vtanh.f32 %v1151_v0  ;;  %v1158_v13 = vmul.f32 0.7978846, %v1142_v37  ;;  %v1160_v4 = vmul.f32 0.7978846, %v1144_v2 }
 0x266   :  { %1453 = vtanh.f32 %v1150_v8 }
 0x267   :  { %1455 = vtanh.f32 %v1152_v36 }
 0x268   :  { %1457 = vtanh.f32 %v1157_v9 }
 0x269   :  { %1459 = vtanh.f32 %v1159_v12 }
 0x26a   :  { %1461 = vtanh.f32 %v1158_v13 }
 0x26b   :  { %1463 = vtanh.f32 %v1160_v4 }
 0x26e   :  { %v1450_v16 = vpop.eup %1449 }
 0x26f   :  { %v1452_v17 = vpop.eup %1451  ;;  %v1181_v22 = vadd.f32 1.0, %v1450_v16 }
 0x270   :  { %v1454_v38 = vpop.eup %1453  ;;  %v1183_v23 = vadd.f32 1.0, %v1452_v17 }
 0x271   :  { %v1456_v42 = vpop.eup %1455  ;;  %v1197_v43 = vmul.f32 0.5, %v1181_v22  ;;  %v1182_v44 = vadd.f32 1.0, %v1454_v38 }
 0x272   :  { %v1458_v45 = vpop.eup %1457  ;;  %v1199_v46 = vmul.f32 0.5, %v1183_v23  ;;  %v1184_v49 = vadd.f32 1.0, %v1456_v42 }
 0x273   :  { %v1460_v50 = vpop.eup %1459  ;;  %v1213_v39 = vmul.f32 %v1197_v43, %v2040_v47  ;;  %v1198_v53 = vmul.f32 0.5, %v1182_v44  ;;  %v1189_v26 = vadd.f32 1.0, %v1458_v45 }
 0x274   :  { %v1462_v32 = vpop.eup %1461  ;;  %v1215_v55 = vmul.f32 %v1199_v46, %v2042_v48  ;;  %v1200_v56 = vmul.f32 0.5, %v1184_v49  ;;  %v1191_v57 = vadd.f32 1.0, %v1460_v50 }
 0x275   :  { %v1464_v58 = vpop.eup %1463  ;;  %v1214_v61 = vmul.f32 %v1198_v53, %v2044_v51  ;;  %v1205_v33 = vmul.f32 0.5, %v1189_v26  ;;  %v1190_v62 = vadd.f32 1.0, %v1462_v32 }
 0x276   :  { %v1216_v3 = vmul.f32 %v1200_v56, %v2046_v52  ;;  %v1207_v5 = vmul.f32 0.5, %v1191_v57  ;;  %v1192_v6 = vadd.f32 1.0, %v1464_v58 }
 0x277   :  { %v1423_v63 = vpack.c.bf16 %v1214_v61, %v1213_v39  ;;  %v1221_v7 = vmul.f32 %v1205_v33, %v2052_v54  ;;  %v1206_v47 = vmul.f32 0.5, %v1190_v62 }
 0x278   :  { %v1424_v10 = vpack.c.bf16 %v1216_v3, %v1215_v55  ;;  %v1223_v11 = vmul.f32 %v1207_v5, %v2054_v27  ;;  %v1208_v41 = vmul.f32 0.5, %v1192_v6 }
 0x279   :  { %1275 = vst [vmem:[%s2113_s5 + $0x10] sm:$0xff] %v1423_v63  ;;  %v1222_v48 = vmul.f32 %v1206_v47, %v2060_v59 }
 0x27a   :  { %1276 = vst [vmem:[%s2113_s5 + $0x18] sm:$0xff] %v1424_v10  ;;  %v1224_v51 = vmul.f32 %v1208_v41, %v2062_v60 }
 0x27b   :  { %v1427_v52 = vpack.c.bf16 %v1222_v48, %v1221_v7 }
 0x27c   :  { %v1428_v14 = vpack.c.bf16 %v1224_v51, %v1223_v11 }
 0x27d   :  { %1279 = vst [vmem:[%s2113_s5 + $0x30] sm:$0xff] %v1427_v52 }
 0x27e   :  { %1280 = vst [vmem:[%s2113_s5 + $0x38] sm:$0xff] %v1428_v14 }

// kernel: vit_to_deepcad_latent.23
= control target key start
LH: loop header
LB: loop body
LE: loop exit
PB: predicated region body
PF: predicated region fallthrough
CT: control target
= control target key end

     0   :  { %v45_v44 = vlaneseq  ;;  %s574_s0 = inlined_call_operand.vmem [shape: f32[8,256], index: 0, kind: input, shape index: {}]   ;;  %s575_s3 = inlined_call_operand.vmem [shape: bf16[256,256], index: 3, kind: input, shape index: {}]   ;;  %s576_s1 = inlined_call_operand.vmem [shape: f32[1,256], index: 1, kind: input, shape index: {}]   ;;  %s577_s2 = inlined_call_operand.vmem [shape: f32[1,256], index: 2, kind: input, shape index: {}]   ;;  %s578_s4 = inlined_call_operand.vmem [shape: f32[1,256], index: 4, kind: input, shape index: {}]   ;;  %s579_s5 = inlined_call_operand.vmem [shape: f32[8,256], index: 5, kind: output, shape index: {}]  }
   0x1   :  { %v24_v0 = vld [vmem:[%s574_s0] sm:$0xff]  ;;  %v25_v1 = vld [vmem:[%s574_s0 + $0x8] sm:$0xff]  ;;  %v380_v5 = vld [vmem:[%s575_s3 + $0x14] ss:$8 sps:$4 sm:$0xff]  }
   0x2   :  { %v26_v2 = vadd.f32 %v25_v1, %v24_v0  ;;  %v377_v3 = vld [vmem:[%s575_s3 + $0x4] ss:$8 sps:$4 sm:$0xff]   ;;  %v379_v4 = vld [vmem:[%s575_s3] ss:$8 sps:$4 sm:$0xff]   ;;  %v382_v6 = vld [vmem:[%s575_s3 + $0x10] ss:$8 sps:$4 sm:$0xff]  }
   0x3   :  { %292 = vmatprep.subr.bf16.mxu0 %v377_v3  ;;  %v383_v7 = vld [vmem:[%s575_s3 + $0x24] ss:$8 sps:$4 sm:$0xff]   ;;  %v385_v8 = vld [vmem:[%s575_s3 + $0x20] ss:$8 sps:$4 sm:$0xff]   ;;  %v386_v9 = vld [vmem:[%s575_s3 + $0x34] ss:$8 sps:$4 sm:$0xff]  }
   0x4   :  { %27 = vadd.xlane.f32.xlu0 %v26_v2  ;;  %293 = vmatpush1.bf16.msra.mxu0 %v379_v4  ;;  %v388_v10 = vld [vmem:[%s575_s3 + $0x30] ss:$8 sps:$4 sm:$0xff]   ;;  %v389_v11 = vld [vmem:[%s575_s3 + $0x44] ss:$8 sps:$4 sm:$0xff]   ;;  %v391_v12 = vld [vmem:[%s575_s3 + $0x40] ss:$8 sps:$4 sm:$0xff]  }
   0x5   :  { %294 = vmatprep.subr.bf16.mxu0 %v380_v5  ;;  %v392_v13 = vld [vmem:[%s575_s3 + $0x54] ss:$8 sps:$4 sm:$0xff]   ;;  %v394_v14 = vld [vmem:[%s575_s3 + $0x50] ss:$8 sps:$4 sm:$0xff]   ;;  %v395_v15 = vld [vmem:[%s575_s3 + $0x64] ss:$8 sps:$4 sm:$0xff]  }
   0x6   :  { %v397_v16 = vld [vmem:[%s575_s3 + $0x60] ss:$8 sps:$4 sm:$0xff]   ;;  %v398_v17 = vld [vmem:[%s575_s3 + $0x74] ss:$8 sps:$4 sm:$0xff]   ;;  %v400_v18 = vld [vmem:[%s575_s3 + $0x70] ss:$8 sps:$4 sm:$0xff]  }
   0x7   :  { %v401_v19 = vld [vmem:[%s575_s3 + $0x84] ss:$8 sps:$4 sm:$0xff]   ;;  %v403_v20 = vld [vmem:[%s575_s3 + $0x80] ss:$8 sps:$4 sm:$0xff]   ;;  %v404_v21 = vld [vmem:[%s575_s3 + $0x94] ss:$8 sps:$4 sm:$0xff]  }
   0x8   :  { %295 = vmatpush1.bf16.msra.mxu0 %v382_v6  ;;  %v406_v22 = vld [vmem:[%s575_s3 + $0x90] ss:$8 sps:$4 sm:$0xff]   ;;  %v407_v30 = vld [vmem:[%s575_s3 + $0xa4] ss:$8 sps:$4 sm:$0xff]   ;;  %v409_v31 = vld [vmem:[%s575_s3 + $0xa0] ss:$8 sps:$4 sm:$0xff]  }
   0x9   :  { %296 = vmatprep.subr.bf16.mxu0 %v383_v7  ;;  %v410_v32 = vld [vmem:[%s575_s3 + $0xb4] ss:$8 sps:$4 sm:$0xff]   ;;  %v412_v33 = vld [vmem:[%s575_s3 + $0xb0] ss:$8 sps:$4 sm:$0xff]   ;;  %v413_v34 = vld [vmem:[%s575_s3 + $0xc4] ss:$8 sps:$4 sm:$0xff]  }
   0xa   :  { %v415_v35 = vld [vmem:[%s575_s3 + $0xc0] ss:$8 sps:$4 sm:$0xff]   ;;  %v416_v36 = vld [vmem:[%s575_s3 + $0xd4] ss:$8 sps:$4 sm:$0xff]   ;;  %v418_v37 = vld [vmem:[%s575_s3 + $0xd0] ss:$8 sps:$4 sm:$0xff]  }
   0xb   :  { %v419_v38 = vld [vmem:[%s575_s3 + $0xe4] ss:$8 sps:$4 sm:$0xff]   ;;  %v421_v39 = vld [vmem:[%s575_s3 + $0xe0] ss:$8 sps:$4 sm:$0xff]   ;;  %v422_v40 = vld [vmem:[%s575_s3 + $0xf4] ss:$8 sps:$4 sm:$0xff]  }
   0xc   :  { %297 = vmatpush1.bf16.msra.mxu0 %v385_v8  ;;  %v424_v41 = vld [vmem:[%s575_s3 + $0xf0] ss:$8 sps:$4 sm:$0xff]   ;;  %v46_v46 = vshrl.u32 %v45_v44, 7  ;;  %v43_v49 = vld [vmem:[%s576_s1] sm:$0x3] }
   0xd   :  { %298 = vmatprep.subr.bf16.mxu0 %v386_v9  ;;  %v57_v50 = vld [vmem:[%s577_s2] sm:$0x3] }
   0xe   :  { %v47_v47 = vsub.s32 0, %v46_v46  ;;  %v51_v48 = vsub.s32 1, %v46_v46 }
  0x10   :  { %299 = vmatpush1.bf16.msra.mxu0 %v388_v10  ;;  %v48_v51 = vrot.slane %v43_v49, %v47_v47  ;;  %v52_v52 = vrot.slane %v43_v49, %v51_v48  ;;  %v62_v55 = vrot.slane %v57_v50, %v47_v47  ;;  %v66_v56 = vrot.slane %v57_v50, %v51_v48 }
  0x11   :  { %300 = vmatprep.subr.bf16.mxu0 %v389_v11 }
  0x14   :  { %301 = vmatpush1.bf16.msra.mxu0 %v391_v12 }
  0x15   :  { %302 = vmatprep.subr.bf16.mxu0 %v392_v13 }
  0x18   :  { %303 = vmatpush1.bf16.msra.mxu0 %v394_v14 }
  0x19   :  { %304 = vmatprep.subr.bf16.mxu0 %v395_v15 }
  0x1c   :  { %305 = vmatpush1.bf16.msra.mxu0 %v397_v16 }
  0x1d   :  { %306 = vmatprep.subr.bf16.mxu0 %v398_v17 }
  0x20   :  { %307 = vmatpush1.bf16.msra.mxu0 %v400_v18 }
  0x21   :  { %308 = vmatprep.subr.bf16.mxu0 %v401_v19 }
  0x24   :  { %309 = vmatpush1.bf16.msra.mxu0 %v403_v20 }
  0x25   :  { %310 = vmatprep.subr.bf16.mxu0 %v404_v21 }
  0x28   :  { %311 = vmatpush1.bf16.msra.mxu0 %v406_v22 }
  0x29   :  { %312 = vmatprep.subr.bf16.mxu0 %v407_v30 }
  0x2c   :  { %313 = vmatpush1.bf16.msra.mxu0 %v409_v31 }
  0x2d   :  { %314 = vmatprep.subr.bf16.mxu0 %v410_v32 }
  0x30   :  { %315 = vmatpush1.bf16.msra.mxu0 %v412_v33 }
  0x31   :  { %316 = vmatprep.subr.bf16.mxu0 %v413_v34 }
  0x34   :  { %317 = vmatpush1.bf16.msra.mxu0 %v415_v35 }
  0x35   :  { %318 = vmatprep.subr.bf16.mxu0 %v416_v36 }
  0x38   :  { %319 = vmatpush1.bf16.msra.mxu0 %v418_v37 }
  0x39   :  { %320 = vmatprep.subr.bf16.mxu0 %v419_v38 }
  0x3c   :  { %321 = vmatpush1.bf16.msra.mxu0 %v421_v39 }
  0x3d   :  { %322 = vmatprep.subr.bf16.mxu0 %v422_v40 }
  0x40   :  { %323 = vmatpush1.bf16.msra.mxu0 %v424_v41 }
  0x91   :  { %v28_v23 = vpop.xlane.xlu0 %27 }
  0x92   :  { %v30_v24 = vmul.f32 0.00390625, %v28_v23 }
  0x94   :  { %v31_v25 = vsub.f32 %v24_v0, %v30_v24  ;;  %v32_v26 = vsub.f32 %v25_v1, %v30_v24  ;;  %v113_v0 = vld [vmem:[%s578_s4] sm:$0x3] }
  0x95   :  { %v118_v1 = vrot.slane %v113_v0, %v47_v47  ;;  %v122_v2 = vrot.slane %v113_v0, %v51_v48 }
  0x96   :  { %v33_v27 = vmul.f32 %v31_v25, %v31_v25  ;;  %v34_v28 = vmul.f32 %v32_v26, %v32_v26 }
  0x98   :  { %v35_v29 = vadd.f32 %v34_v28, %v33_v27 }
  0x9a   :  { %36 = vadd.xlane.f32.xlu0 %v35_v29 }
 0x127   :  { %v37_v42 = vpop.xlane.xlu0 %36 }
 0x128   :  { %v38_v43 = vmul.f32 0.00390625, %v37_v42 }
 0x12a   :  { %v39_v45 = vadd.f32 1e-06, %v38_v43 }
 0x12c   :  { %425 = vrsqrt.f32 %v39_v45 }
 0x136   :  { %v426_v53 = vpop.eup %425 }
 0x137   :  { %v42_v54 = vmul.f32 %v426_v53, %v32_v26  ;;  %v41_v57 = vmul.f32 %v426_v53, %v31_v25 }
 0x139   :  { %v56_v58 = vmul.f32 %v52_v52, %v42_v54  ;;  %v55_v59 = vmul.f32 %v48_v51, %v41_v57 }
 0x13b   :  { %v70_v60 = vadd.f32 %v66_v56, %v56_v58  ;;  %v69_v61 = vadd.f32 %v62_v55, %v55_v59 }
 0x13d   :  { %v376_v62 = vpack.c.bf16 %v70_v60, %v70_v60  ;;  %v375_v63 = vpack.c.bf16 %v69_v61, %v69_v61 }
 0x13f   :  { %324 = vmatprep.mubr.bf16.mxu0 %v376_v62 }
 0x140   :  { %325 = vmatmul.mubr.bf16.vlgmr.msra.gmra.mrb[0].mxu0 %v375_v63 }
 0x213   :  { %v326_v3 = vpop.f32.mrb[0].mxu0 }
 0x214   :  { %v327_v4 = vadd.f32 %v326_v3, %v118_v1  ;;  %v328_v5 = vpop.f32.mrb[1].mxu0 }
 0x215   :  { %v329_v6 = vadd.f32 %v328_v5, %v122_v2  ;;  %v330_v7 = vpop.f32.mrb[2].mxu0 }
 0x216   :  { %333 = vst [vmem:[%s579_s5] sm:$0xff] %v327_v4  ;;  %v331_v8 = vpop.f32.mrb[3].mxu0 }
 0x217   :  { %334 = vst [vmem:[%s579_s5 + $0x8] sm:$0xff] %v329_v6 }

// kernel: vit_to_deepcad_latent.17
= control target key start
LH: loop header
LB: loop body
LE: loop exit
PB: predicated region body
PF: predicated region fallthrough
CT: control target
= control target key end

     0   :  { %s1853_s1 = inlined_call_operand.vmem [shape: bf16[1024,256], index: 1, kind: input, shape index: {}]   ;;  %s1854_s0 = inlined_call_operand.vmem [shape: bf16[16,1024], index: 0, kind: input, shape index: {}]   ;;  %s1855_s2 = inlined_call_operand.vmem [shape: f32[1,256], index: 2, kind: input, shape index: {}]   ;;  %s1856_s3 = inlined_call_operand.vmem [shape: f32[16,256], index: 3, kind: input, shape index: {}]   ;;  %s1857_s4 = inlined_call_operand.vmem [shape: f32[16,256], index: 4, kind: output, shape index: {}]  }
   0x1   :  { %v1185_v0 = vld [vmem:[%s1853_s1 + $0x4] ss:$8 sps:$4 sm:$0xff]   ;;  %v1189_v2 = vld [vmem:[%s1853_s1] ss:$8 sps:$4 sm:$0xff]   ;;  %v1191_v4 = vld [vmem:[%s1853_s1 + $0x14] ss:$8 sps:$4 sm:$0xff]  }
   0x2   :  { %v1187_v1 = vld [vmem:[%s1853_s1 + $0x204] ss:$8 sps:$4 sm:$0xff]   ;;  %845 = vmatprep.subr.bf16.mxu1 %v1185_v0  ;;  %v1190_v3 = vld [vmem:[%s1853_s1 + $0x200] ss:$8 sps:$4 sm:$0xff]   ;;  %v1193_v5 = vld [vmem:[%s1853_s1 + $0x214] ss:$8 sps:$4 sm:$0xff]  }
   0x3   :  { %931 = vmatprep.subr.bf16.mxu0 %v1187_v1  ;;  %846 = vmatpush1.bf16.msra.mxu1 %v1189_v2  ;;  %v1195_v6 = vld [vmem:[%s1853_s1 + $0x10] ss:$8 sps:$4 sm:$0xff]   ;;  %v1197_v8 = vld [vmem:[%s1853_s1 + $0x24] ss:$8 sps:$4 sm:$0xff]   ;;  %v1201_v10 = vld [vmem:[%s1853_s1 + $0x20] ss:$8 sps:$4 sm:$0xff]  }
   0x4   :  { %932 = vmatpush1.bf16.msra.mxu0 %v1190_v3  ;;  %847 = vmatprep.subr.bf16.mxu1 %v1191_v4  ;;  %v1196_v7 = vld [vmem:[%s1853_s1 + $0x210] ss:$8 sps:$4 sm:$0xff]   ;;  %v1199_v9 = vld [vmem:[%s1853_s1 + $0x224] ss:$8 sps:$4 sm:$0xff]   ;;  %v1202_v11 = vld [vmem:[%s1853_s1 + $0x220] ss:$8 sps:$4 sm:$0xff]  }
   0x5   :  { %933 = vmatprep.subr.bf16.mxu0 %v1193_v5  ;;  %v1203_v12 = vld [vmem:[%s1853_s1 + $0x34] ss:$8 sps:$4 sm:$0xff]   ;;  %v1207_v14 = vld [vmem:[%s1853_s1 + $0x30] ss:$8 sps:$4 sm:$0xff]   ;;  %v1209_v16 = vld [vmem:[%s1853_s1 + $0x44] ss:$8 sps:$4 sm:$0xff]  }
   0x6   :  { %v1205_v13 = vld [vmem:[%s1853_s1 + $0x234] ss:$8 sps:$4 sm:$0xff]   ;;  %v1208_v15 = vld [vmem:[%s1853_s1 + $0x230] ss:$8 sps:$4 sm:$0xff]   ;;  %v1211_v17 = vld [vmem:[%s1853_s1 + $0x244] ss:$8 sps:$4 sm:$0xff]  }
   0x7   :  { %848 = vmatpush1.bf16.msra.mxu1 %v1195_v6  ;;  %v1213_v18 = vld [vmem:[%s1853_s1 + $0x40] ss:$8 sps:$4 sm:$0xff]   ;;  %v1215_v20 = vld [vmem:[%s1853_s1 + $0x54] ss:$8 sps:$4 sm:$0xff]   ;;  %v1219_v22 = vld [vmem:[%s1853_s1 + $0x50] ss:$8 sps:$4 sm:$0xff]  }
   0x8   :  { %934 = vmatpush1.bf16.msra.mxu0 %v1196_v7  ;;  %849 = vmatprep.subr.bf16.mxu1 %v1197_v8  ;;  %v1214_v19 = vld [vmem:[%s1853_s1 + $0x240] ss:$8 sps:$4 sm:$0xff]   ;;  %v1217_v21 = vld [vmem:[%s1853_s1 + $0x254] ss:$8 sps:$4 sm:$0xff]   ;;  %v1220_v23 = vld [vmem:[%s1853_s1 + $0x250] ss:$8 sps:$4 sm:$0xff]  }
   0x9   :  { %935 = vmatprep.subr.bf16.mxu0 %v1199_v9  ;;  %v1221_v24 = vld [vmem:[%s1853_s1 + $0x64] ss:$8 sps:$4 sm:$0xff]   ;;  %v1225_v26 = vld [vmem:[%s1853_s1 + $0x60] ss:$8 sps:$4 sm:$0xff]   ;;  %v1227_v28 = vld [vmem:[%s1853_s1 + $0x74] ss:$8 sps:$4 sm:$0xff]  }
   0xa   :  { %v1223_v25 = vld [vmem:[%s1853_s1 + $0x264] ss:$8 sps:$4 sm:$0xff]   ;;  %v1226_v27 = vld [vmem:[%s1853_s1 + $0x260] ss:$8 sps:$4 sm:$0xff]   ;;  %v1229_v29 = vld [vmem:[%s1853_s1 + $0x274] ss:$8 sps:$4 sm:$0xff]  }
   0xb   :  { %850 = vmatpush1.bf16.msra.mxu1 %v1201_v10  ;;  %v1231_v30 = vld [vmem:[%s1853_s1 + $0x70] ss:$8 sps:$4 sm:$0xff]   ;;  %v1233_v32 = vld [vmem:[%s1853_s1 + $0x84] ss:$8 sps:$4 sm:$0xff]   ;;  %v1237_v34 = vld [vmem:[%s1853_s1 + $0x80] ss:$8 sps:$4 sm:$0xff]  }
   0xc   :  { %936 = vmatpush1.bf16.msra.mxu0 %v1202_v11  ;;  %851 = vmatprep.subr.bf16.mxu1 %v1203_v12  ;;  %v1232_v31 = vld [vmem:[%s1853_s1 + $0x270] ss:$8 sps:$4 sm:$0xff]   ;;  %v1235_v33 = vld [vmem:[%s1853_s1 + $0x284] ss:$8 sps:$4 sm:$0xff]   ;;  %v1238_v35 = vld [vmem:[%s1853_s1 + $0x280] ss:$8 sps:$4 sm:$0xff]  }
   0xd   :  { %937 = vmatprep.subr.bf16.mxu0 %v1205_v13  ;;  %v1239_v36 = vld [vmem:[%s1853_s1 + $0x94] ss:$8 sps:$4 sm:$0xff]   ;;  %v1243_v38 = vld [vmem:[%s1853_s1 + $0x90] ss:$8 sps:$4 sm:$0xff]   ;;  %v1245_v40 = vld [vmem:[%s1853_s1 + $0xa4] ss:$8 sps:$4 sm:$0xff]  }
   0xe   :  { %v1241_v37 = vld [vmem:[%s1853_s1 + $0x294] ss:$8 sps:$4 sm:$0xff]   ;;  %v1244_v39 = vld [vmem:[%s1853_s1 + $0x290] ss:$8 sps:$4 sm:$0xff]   ;;  %v1247_v41 = vld [vmem:[%s1853_s1 + $0x2a4] ss:$8 sps:$4 sm:$0xff]  }
   0xf   :  { %852 = vmatpush1.bf16.msra.mxu1 %v1207_v14  ;;  %v1249_v42 = vld [vmem:[%s1853_s1 + $0xa0] ss:$8 sps:$4 sm:$0xff]   ;;  %v1251_v44 = vld [vmem:[%s1853_s1 + $0xb4] ss:$8 sps:$4 sm:$0xff]   ;;  %v1255_v46 = vld [vmem:[%s1853_s1 + $0xb0] ss:$8 sps:$4 sm:$0xff]  }
  0x10   :  { %938 = vmatpush1.bf16.msra.mxu0 %v1208_v15  ;;  %853 = vmatprep.subr.bf16.mxu1 %v1209_v16  ;;  %v1250_v43 = vld [vmem:[%s1853_s1 + $0x2a0] ss:$8 sps:$4 sm:$0xff]   ;;  %v1253_v45 = vld [vmem:[%s1853_s1 + $0x2b4] ss:$8 sps:$4 sm:$0xff]   ;;  %v1256_v47 = vld [vmem:[%s1853_s1 + $0x2b0] ss:$8 sps:$4 sm:$0xff]  }
  0x11   :  { %939 = vmatprep.subr.bf16.mxu0 %v1211_v17  ;;  %v17_v48 = vld [vmem:[%s1854_s0] sm:$0xff]  ;;  %v19_v53 = vld [vmem:[%s1854_s0 + $0x10] sm:$0xff] }
  0x12   :  { %v21_v49 = vld [vmem:[%s1854_s0 + $0x20] sm:$0xff]  ;;  %v23_v54 = vld [vmem:[%s1854_s0 + $0x30] sm:$0xff] }
  0x13   :  { %854 = vmatpush1.bf16.msra.mxu1 %v1213_v18  ;;  %v1257_v50 = vld [vmem:[%s1853_s1 + $0xc4] ss:$8 sps:$4 sm:$0xff]   ;;  %v1034_v52 = vcombine.high %v17_v48, %v21_v49  ;;  %v1038_v55 = vcombine.high %v19_v53, %v23_v54  ;;  %v1261_v56 = vld [vmem:[%s1853_s1 + $0xc0] ss:$8 sps:$4 sm:$0xff]   ;;  %v1263_v58 = vld [vmem:[%s1853_s1 + $0xd4] ss:$8 sps:$4 sm:$0xff]   ;;  %v1033_v8 = vcombine.low %v17_v48, %v21_v49  ;;  %v1037_v10 = vcombine.low %v19_v53, %v23_v54 }
  0x14   :  { %940 = vmatpush1.bf16.msra.mxu0 %v1214_v19  ;;  %855 = vmatprep.subr.bf16.mxu1 %v1215_v20  ;;  %v1259_v51 = vld [vmem:[%s1853_s1 + $0x2c4] ss:$8 sps:$4 sm:$0xff]   ;;  %v1262_v57 = vld [vmem:[%s1853_s1 + $0x2c0] ss:$8 sps:$4 sm:$0xff]   ;;  %v1265_v59 = vld [vmem:[%s1853_s1 + $0x2d4] ss:$8 sps:$4 sm:$0xff]  }
  0x15   :  { %941 = vmatprep.subr.bf16.mxu0 %v1217_v21  ;;  %877 = vmatprep.mubr.bf16.mxu1 %v1034_v52  ;;  %v1267_v60 = vld [vmem:[%s1853_s1 + $0xd0] ss:$8 sps:$4 sm:$0xff]   ;;  %v1269_v62 = vld [vmem:[%s1853_s1 + $0xe4] ss:$8 sps:$4 sm:$0xff]   ;;  %v1273_v0 = vld [vmem:[%s1853_s1 + $0xe0] ss:$8 sps:$4 sm:$0xff]  }
  0x16   :  { %963 = vmatprep.mubr.bf16.mxu0 %v1038_v55  ;;  %v1268_v61 = vld [vmem:[%s1853_s1 + $0x2d0] ss:$8 sps:$4 sm:$0xff]   ;;  %v1271_v63 = vld [vmem:[%s1853_s1 + $0x2e4] ss:$8 sps:$4 sm:$0xff]   ;;  %v1274_v1 = vld [vmem:[%s1853_s1 + $0x2e0] ss:$8 sps:$4 sm:$0xff]  }
  0x17   :  { %856 = vmatpush1.bf16.msra.mxu1 %v1219_v22  ;;  %v1275_v2 = vld [vmem:[%s1853_s1 + $0xf4] ss:$8 sps:$4 sm:$0xff]   ;;  %v1279_v4 = vld [vmem:[%s1853_s1 + $0xf0] ss:$8 sps:$4 sm:$0xff]   ;;  %v1283_v6 = vld [vmem:[%s1853_s1 + $0x104] ss:$8 sps:$4 sm:$0xff]  }
  0x18   :  { %942 = vmatpush1.bf16.msra.mxu0 %v1220_v23  ;;  %857 = vmatprep.subr.bf16.mxu1 %v1221_v24  ;;  %v1277_v3 = vld [vmem:[%s1853_s1 + $0x2f4] ss:$8 sps:$4 sm:$0xff]   ;;  %v1280_v5 = vld [vmem:[%s1853_s1 + $0x2f0] ss:$8 sps:$4 sm:$0xff]   ;;  %v1286_v7 = vld [vmem:[%s1853_s1 + $0x304] ss:$8 sps:$4 sm:$0xff]  }
  0x19   :  { %943 = vmatprep.subr.bf16.mxu0 %v1223_v25  ;;  %v1281_v9 = vld [vmem:[%s1853_s1 + $0x100] ss:$8 sps:$4 sm:$0xff]   ;;  %v1289_v12 = vld [vmem:[%s1853_s1 + $0x114] ss:$8 sps:$4 sm:$0xff]   ;;  %v1287_v14 = vld [vmem:[%s1853_s1 + $0x110] ss:$8 sps:$4 sm:$0xff]  }
  0x1a   :  { %v1284_v11 = vld [vmem:[%s1853_s1 + $0x300] ss:$8 sps:$4 sm:$0xff]   ;;  %v1292_v13 = vld [vmem:[%s1853_s1 + $0x314] ss:$8 sps:$4 sm:$0xff]   ;;  %v1290_v15 = vld [vmem:[%s1853_s1 + $0x310] ss:$8 sps:$4 sm:$0xff]  }
  0x1b   :  { %858 = vmatpush1.bf16.msra.mxu1 %v1225_v26  ;;  %v1295_v16 = vld [vmem:[%s1853_s1 + $0x124] ss:$8 sps:$4 sm:$0xff]   ;;  %v1293_v18 = vld [vmem:[%s1853_s1 + $0x120] ss:$8 sps:$4 sm:$0xff]   ;;  %v1301_v20 = vld [vmem:[%s1853_s1 + $0x134] ss:$8 sps:$4 sm:$0xff]  }
  0x1c   :  { %944 = vmatpush1.bf16.msra.mxu0 %v1226_v27  ;;  %859 = vmatprep.subr.bf16.mxu1 %v1227_v28  ;;  %v1298_v17 = vld [vmem:[%s1853_s1 + $0x324] ss:$8 sps:$4 sm:$0xff]   ;;  %v1296_v19 = vld [vmem:[%s1853_s1 + $0x320] ss:$8 sps:$4 sm:$0xff]   ;;  %v1304_v21 = vld [vmem:[%s1853_s1 + $0x334] ss:$8 sps:$4 sm:$0xff]  }
  0x1d   :  { %945 = vmatprep.subr.bf16.mxu0 %v1229_v29  ;;  %v1299_v22 = vld [vmem:[%s1853_s1 + $0x130] ss:$8 sps:$4 sm:$0xff]   ;;  %v1307_v24 = vld [vmem:[%s1853_s1 + $0x144] ss:$8 sps:$4 sm:$0xff]   ;;  %v1305_v26 = vld [vmem:[%s1853_s1 + $0x140] ss:$8 sps:$4 sm:$0xff]  }
  0x1e   :  { %v1302_v23 = vld [vmem:[%s1853_s1 + $0x330] ss:$8 sps:$4 sm:$0xff]   ;;  %v1310_v25 = vld [vmem:[%s1853_s1 + $0x344] ss:$8 sps:$4 sm:$0xff]   ;;  %v1308_v27 = vld [vmem:[%s1853_s1 + $0x340] ss:$8 sps:$4 sm:$0xff]  }
  0x1f   :  { %860 = vmatpush1.bf16.msra.mxu1 %v1231_v30  ;;  %v1313_v28 = vld [vmem:[%s1853_s1 + $0x154] ss:$8 sps:$4 sm:$0xff]   ;;  %v1311_v30 = vld [vmem:[%s1853_s1 + $0x150] ss:$8 sps:$4 sm:$0xff]   ;;  %v1329_v48 = vld [vmem:[%s1853_s1 + $0x180] ss:$8 sps:$4 sm:$0xff]  }
  0x20   :  { %946 = vmatpush1.bf16.msra.mxu0 %v1232_v31  ;;  %861 = vmatprep.subr.bf16.mxu1 %v1233_v32  ;;  %v1316_v29 = vld [vmem:[%s1853_s1 + $0x354] ss:$8 sps:$4 sm:$0xff]   ;;  %v1314_v31 = vld [vmem:[%s1853_s1 + $0x350] ss:$8 sps:$4 sm:$0xff]   ;;  %v1319_v32 = vld [vmem:[%s1853_s1 + $0x164] ss:$8 sps:$4 sm:$0xff]  }
  0x21   :  { %947 = vmatprep.subr.bf16.mxu0 %v1235_v33  ;;  %v1322_v33 = vld [vmem:[%s1853_s1 + $0x364] ss:$8 sps:$4 sm:$0xff]   ;;  %v1332_v49 = vld [vmem:[%s1853_s1 + $0x380] ss:$8 sps:$4 sm:$0xff]   ;;  %v1335_v52 = vld [vmem:[%s1853_s1 + $0x190] ss:$8 sps:$4 sm:$0xff]  }
  0x22   :  { %v1338_v53 = vld [vmem:[%s1853_s1 + $0x390] ss:$8 sps:$4 sm:$0xff]   ;;  %v1343_v54 = vld [vmem:[%s1853_s1 + $0x1a4] ss:$8 sps:$4 sm:$0xff]  }
  0x23   :  { %862 = vmatpush1.bf16.msra.mxu1 %v1237_v34  ;;  %v1687_v34 = vld [vmem:[%s1854_s0 + $0x8] sm:$0xff] }
  0x24   :  { %948 = vmatpush1.bf16.msra.mxu0 %v1238_v35  ;;  %863 = vmatprep.subr.bf16.mxu1 %v1239_v36  ;;  %v1692_v35 = vld [vmem:[%s1854_s0 + $0x28] sm:$0xff]  ;;  %v1697_v36 = vld [vmem:[%s1854_s0 + $0x18] sm:$0xff] }
  0x25   :  { %949 = vmatprep.subr.bf16.mxu0 %v1241_v37  ;;  %v1702_v37 = vld [vmem:[%s1854_s0 + $0x38] sm:$0xff]  ;;  %v1346_v55 = vld [vmem:[%s1853_s1 + $0x3a4] ss:$8 sps:$4 sm:$0xff]  }
  0x27   :  { %864 = vmatpush1.bf16.msra.mxu1 %v1243_v38  ;;  %v1317_v38 = vld [vmem:[%s1853_s1 + $0x160] ss:$8 sps:$4 sm:$0xff]  }
  0x28   :  { %950 = vmatpush1.bf16.msra.mxu0 %v1244_v39  ;;  %865 = vmatprep.subr.bf16.mxu1 %v1245_v40  ;;  %v1320_v39 = vld [vmem:[%s1853_s1 + $0x360] ss:$8 sps:$4 sm:$0xff]   ;;  %v1036_v40 = vcombine.high %v1687_v34, %v1692_v35 }
  0x29   :  { %951 = vmatprep.subr.bf16.mxu0 %v1247_v41  ;;  %v1325_v41 = vld [vmem:[%s1853_s1 + $0x174] ss:$8 sps:$4 sm:$0xff]  }
  0x2b   :  { %866 = vmatpush1.bf16.msra.mxu1 %v1249_v42  ;;  %v1328_v42 = vld [vmem:[%s1853_s1 + $0x374] ss:$8 sps:$4 sm:$0xff]  }
  0x2c   :  { %952 = vmatpush1.bf16.msra.mxu0 %v1250_v43  ;;  %867 = vmatprep.subr.bf16.mxu1 %v1251_v44  ;;  %v1040_v43 = vcombine.high %v1697_v36, %v1702_v37  ;;  %v1323_v44 = vld [vmem:[%s1853_s1 + $0x170] ss:$8 sps:$4 sm:$0xff]  }
  0x2d   :  { %953 = vmatprep.subr.bf16.mxu0 %v1253_v45  ;;  %v1326_v45 = vld [vmem:[%s1853_s1 + $0x370] ss:$8 sps:$4 sm:$0xff]  }
  0x2f   :  { %868 = vmatpush1.bf16.msra.mxu1 %v1255_v46  ;;  %v1331_v46 = vld [vmem:[%s1853_s1 + $0x184] ss:$8 sps:$4 sm:$0xff]  }
  0x30   :  { %954 = vmatpush1.bf16.msra.mxu0 %v1256_v47  ;;  %869 = vmatprep.subr.bf16.mxu1 %v1257_v50  ;;  %v1334_v47 = vld [vmem:[%s1853_s1 + $0x384] ss:$8 sps:$4 sm:$0xff]   ;;  %v1337_v50 = vld [vmem:[%s1853_s1 + $0x194] ss:$8 sps:$4 sm:$0xff]  }
  0x31   :  { %955 = vmatprep.subr.bf16.mxu0 %v1259_v51  ;;  %v1340_v51 = vld [vmem:[%s1853_s1 + $0x394] ss:$8 sps:$4 sm:$0xff]  }
  0x33   :  { %870 = vmatpush1.bf16.msra.mxu1 %v1261_v56  ;;  %v1341_v56 = vld [vmem:[%s1853_s1 + $0x1a0] ss:$8 sps:$4 sm:$0xff]  }
  0x34   :  { %956 = vmatpush1.bf16.msra.mxu0 %v1262_v57  ;;  %871 = vmatprep.subr.bf16.mxu1 %v1263_v58  ;;  %v1344_v57 = vld [vmem:[%s1853_s1 + $0x3a0] ss:$8 sps:$4 sm:$0xff]   ;;  %v1349_v58 = vld [vmem:[%s1853_s1 + $0x1b4] ss:$8 sps:$4 sm:$0xff]  }
  0x35   :  { %957 = vmatprep.subr.bf16.mxu0 %v1265_v59  ;;  %v1352_v59 = vld [vmem:[%s1853_s1 + $0x3b4] ss:$8 sps:$4 sm:$0xff]  }
  0x37   :  { %872 = vmatpush1.bf16.msra.mxu1 %v1267_v60  ;;  %v1347_v60 = vld [vmem:[%s1853_s1 + $0x1b0] ss:$8 sps:$4 sm:$0xff]  }
  0x38   :  { %958 = vmatpush1.bf16.msra.mxu0 %v1268_v61  ;;  %873 = vmatprep.subr.bf16.mxu1 %v1269_v62  ;;  %v1350_v61 = vld [vmem:[%s1853_s1 + $0x3b0] ss:$8 sps:$4 sm:$0xff]   ;;  %v1355_v62 = vld [vmem:[%s1853_s1 + $0x1c4] ss:$8 sps:$4 sm:$0xff]  }
  0x39   :  { %959 = vmatprep.subr.bf16.mxu0 %v1271_v63  ;;  %v1358_v63 = vld [vmem:[%s1853_s1 + $0x3c4] ss:$8 sps:$4 sm:$0xff]  }
  0x3b   :  { %874 = vmatpush1.bf16.msra.mxu1 %v1273_v0  ;;  %v1353_v0 = vld [vmem:[%s1853_s1 + $0x1c0] ss:$8 sps:$4 sm:$0xff]  }
  0x3c   :  { %960 = vmatpush1.bf16.msra.mxu0 %v1274_v1  ;;  %875 = vmatprep.subr.bf16.mxu1 %v1275_v2  ;;  %v1356_v1 = vld [vmem:[%s1853_s1 + $0x3c0] ss:$8 sps:$4 sm:$0xff]   ;;  %v1361_v2 = vld [vmem:[%s1853_s1 + $0x1d4] ss:$8 sps:$4 sm:$0xff]  }
  0x3d   :  { %961 = vmatprep.subr.bf16.mxu0 %v1277_v3  ;;  %v1364_v3 = vld [vmem:[%s1853_s1 + $0x3d4] ss:$8 sps:$4 sm:$0xff]  }
  0x3f   :  { %876 = vmatpush1.bf16.msra.mxu1 %v1279_v4  ;;  %v1359_v4 = vld [vmem:[%s1853_s1 + $0x1d0] ss:$8 sps:$4 sm:$0xff]  }
  0x40   :  { %962 = vmatpush1.bf16.msra.mxu0 %v1280_v5  ;;  %888 = vmatprep.subr.bf16.mxu1 %v1283_v6  ;;  %v1362_v5 = vld [vmem:[%s1853_s1 + $0x3d0] ss:$8 sps:$4 sm:$0xff]   ;;  %v1367_v6 = vld [vmem:[%s1853_s1 + $0x1e4] ss:$8 sps:$4 sm:$0xff]  }
  0x41   :  { %974 = vmatprep.subr.bf16.mxu0 %v1286_v7  ;;  %v1370_v7 = vld [vmem:[%s1853_s1 + $0x3e4] ss:$8 sps:$4 sm:$0xff]  }
  0x42   :  { %878 = vmatmul.mubr.bf16.vlgmr.msra.gmra.mrb[0].mxu1 %v1033_v8  ;;  %v1365_v8 = vld [vmem:[%s1853_s1 + $0x1e0] ss:$8 sps:$4 sm:$0xff]  }
  0x43   :  { %964 = vmatmul.mubr.bf16.vlgmr.msra.gmra.mrb[0].mxu0 %v1037_v10  ;;  %889 = vmatpush1.bf16.msra.mxu1 %v1281_v9  ;;  %v1368_v9 = vld [vmem:[%s1853_s1 + $0x3e0] ss:$8 sps:$4 sm:$0xff]   ;;  %v1373_v10 = vld [vmem:[%s1853_s1 + $0x1f4] ss:$8 sps:$4 sm:$0xff]  }
  0x44   :  { %975 = vmatpush1.bf16.msra.mxu0 %v1284_v11  ;;  %890 = vmatprep.subr.bf16.mxu1 %v1289_v12  ;;  %v1376_v11 = vld [vmem:[%s1853_s1 + $0x3f4] ss:$8 sps:$4 sm:$0xff]   ;;  %v1371_v12 = vld [vmem:[%s1853_s1 + $0x1f0] ss:$8 sps:$4 sm:$0xff]  }
  0x45   :  { %976 = vmatprep.subr.bf16.mxu0 %v1292_v13  ;;  %920 = vmatprep.mubr.bf16.mxu1 %v1036_v40  ;;  %v1374_v13 = vld [vmem:[%s1853_s1 + $0x3f0] ss:$8 sps:$4 sm:$0xff]  }
  0x46   :  { %1006 = vmatprep.mubr.bf16.mxu0 %v1040_v43 }
  0x47   :  { %891 = vmatpush1.bf16.msra.mxu1 %v1287_v14  ;;  %v1035_v14 = vcombine.low %v1687_v34, %v1692_v35 }
  0x48   :  { %977 = vmatpush1.bf16.msra.mxu0 %v1290_v15  ;;  %892 = vmatprep.subr.bf16.mxu1 %v1295_v16  ;;  %v1039_v15 = vcombine.low %v1697_v36, %v1702_v37  ;;  %v155_v16 = vlaneseq }
  0x49   :  { %978 = vmatprep.subr.bf16.mxu0 %v1298_v17 }
  0x4a   :  { %v156_v17 = vshrl.u32 %v155_v16, 7 }
  0x4b   :  { %893 = vmatpush1.bf16.msra.mxu1 %v1293_v18 }
  0x4c   :  { %979 = vmatpush1.bf16.msra.mxu0 %v1296_v19  ;;  %894 = vmatprep.subr.bf16.mxu1 %v1301_v20  ;;  %v157_v18 = vsub.s32 0, %v156_v17  ;;  %v153_v19 = vld [vmem:[%s1855_s2] sm:$0x3]  ;;  %v161_v20 = vsub.s32 1, %v156_v17 }
  0x4d   :  { %980 = vmatprep.subr.bf16.mxu0 %v1304_v21 }
  0x4e   :  { %v158_v21 = vrot.slane %v153_v19, %v157_v18 }
  0x4f   :  { %895 = vmatpush1.bf16.msra.mxu1 %v1299_v22  ;;  %v162_v22 = vrot.slane %v153_v19, %v161_v20 }
  0x50   :  { %981 = vmatpush1.bf16.msra.mxu0 %v1302_v23  ;;  %896 = vmatprep.subr.bf16.mxu1 %v1307_v24 }
  0x51   :  { %982 = vmatprep.subr.bf16.mxu0 %v1310_v25 }
  0x53   :  { %897 = vmatpush1.bf16.msra.mxu1 %v1305_v26 }
  0x54   :  { %983 = vmatpush1.bf16.msra.mxu0 %v1308_v27  ;;  %898 = vmatprep.subr.bf16.mxu1 %v1313_v28  ;;  %v1017_v28 = vld [vmem:[%s1856_s3] sm:$0xff] }
  0x55   :  { %984 = vmatprep.subr.bf16.mxu0 %v1316_v29 }
  0x57   :  { %899 = vmatpush1.bf16.msra.mxu1 %v1311_v30 }
  0x58   :  { %985 = vmatpush1.bf16.msra.mxu0 %v1314_v31  ;;  %900 = vmatprep.subr.bf16.mxu1 %v1319_v32 }
  0x59   :  { %986 = vmatprep.subr.bf16.mxu0 %v1322_v33  ;;  %v1018_v33 = vld [vmem:[%s1856_s3 + $0x8] sm:$0xff] }
  0x5b   :  { %901 = vmatpush1.bf16.msra.mxu1 %v1317_v38  ;;  %v1019_v38 = vld [vmem:[%s1856_s3 + $0x10] sm:$0xff] }
  0x5c   :  { %987 = vmatpush1.bf16.msra.mxu0 %v1320_v39  ;;  %902 = vmatprep.subr.bf16.mxu1 %v1325_v41 }
  0x5d   :  { %988 = vmatprep.subr.bf16.mxu0 %v1328_v42  ;;  %v1020_v42 = vld [vmem:[%s1856_s3 + $0x18] sm:$0xff] }
  0x5f   :  { %903 = vmatpush1.bf16.msra.mxu1 %v1323_v44 }
  0x60   :  { %989 = vmatpush1.bf16.msra.mxu0 %v1326_v45  ;;  %904 = vmatprep.subr.bf16.mxu1 %v1331_v46 }
  0x61   :  { %990 = vmatprep.subr.bf16.mxu0 %v1334_v47 }
  0x63   :  { %905 = vmatpush1.bf16.msra.mxu1 %v1329_v48 }
  0x64   :  { %991 = vmatpush1.bf16.msra.mxu0 %v1332_v49  ;;  %906 = vmatprep.subr.bf16.mxu1 %v1337_v50 }
  0x65   :  { %992 = vmatprep.subr.bf16.mxu0 %v1340_v51 }
  0x67   :  { %907 = vmatpush1.bf16.msra.mxu1 %v1335_v52 }
  0x68   :  { %993 = vmatpush1.bf16.msra.mxu0 %v1338_v53  ;;  %908 = vmatprep.subr.bf16.mxu1 %v1343_v54 }
  0x69   :  { %994 = vmatprep.subr.bf16.mxu0 %v1346_v55 }
  0x6b   :  { %909 = vmatpush1.bf16.msra.mxu1 %v1341_v56 }
  0x6c   :  { %995 = vmatpush1.bf16.msra.mxu0 %v1344_v57  ;;  %910 = vmatprep.subr.bf16.mxu1 %v1349_v58 }
  0x6d   :  { %996 = vmatprep.subr.bf16.mxu0 %v1352_v59 }
  0x6f   :  { %911 = vmatpush1.bf16.msra.mxu1 %v1347_v60 }
  0x70   :  { %997 = vmatpush1.bf16.msra.mxu0 %v1350_v61  ;;  %912 = vmatprep.subr.bf16.mxu1 %v1355_v62 }
  0x71   :  { %998 = vmatprep.subr.bf16.mxu0 %v1358_v63 }
  0x73   :  { %913 = vmatpush1.bf16.msra.mxu1 %v1353_v0 }
  0x74   :  { %999 = vmatpush1.bf16.msra.mxu0 %v1356_v1  ;;  %914 = vmatprep.subr.bf16.mxu1 %v1361_v2 }
  0x75   :  { %1000 = vmatprep.subr.bf16.mxu0 %v1364_v3 }
  0x77   :  { %915 = vmatpush1.bf16.msra.mxu1 %v1359_v4 }
  0x78   :  { %1001 = vmatpush1.bf16.msra.mxu0 %v1362_v5  ;;  %916 = vmatprep.subr.bf16.mxu1 %v1367_v6 }
  0x79   :  { %1002 = vmatprep.subr.bf16.mxu0 %v1370_v7 }
  0x7b   :  { %917 = vmatpush1.bf16.msra.mxu1 %v1365_v8 }
  0x7c   :  { %1003 = vmatpush1.bf16.msra.mxu0 %v1368_v9  ;;  %918 = vmatprep.subr.bf16.mxu1 %v1373_v10 }
  0x7d   :  { %1004 = vmatprep.subr.bf16.mxu0 %v1376_v11 }
  0x7f   :  { %919 = vmatpush1.bf16.msra.mxu1 %v1371_v12 }
  0x80   :  { %1005 = vmatpush1.bf16.msra.mxu0 %v1374_v13 }
  0x82   :  { %921 = vmatmul.mubr.bf16.vlgmr.msra.gmra.mrb[0].mxu1 %v1035_v14 }
  0x83   :  { %1007 = vmatmul.mubr.bf16.vlgmr.msra.gmra.mrb[0].mxu0 %v1039_v15 }
 0x155   :  { %v922_v23 = vpop.f32.mrb[0].mxu1 }
 0x156   :  { %v1008_v24 = vpop.f32.mrb[0].mxu0  ;;  %v1169_v25 = vadd.f32 %v922_v23, %v158_v21  ;;  %v924_v26 = vpop.f32.mrb[1].mxu1 }
 0x157   :  { %v1010_v27 = vpop.f32.mrb[1].mxu0  ;;  %v1171_v29 = vadd.f32 %v924_v26, %v162_v22  ;;  %v926_v30 = vpop.f32.mrb[2].mxu1 }
 0x158   :  { %v1012_v31 = vpop.f32.mrb[2].mxu0  ;;  %v1170_v32 = vadd.f32 %v1169_v25, %v1008_v24  ;;  %v1173_v34 = vadd.f32 %v926_v30, %v158_v21  ;;  %v928_v35 = vpop.f32.mrb[3].mxu1 }
 0x159   :  { %v1014_v36 = vpop.f32.mrb[3].mxu0  ;;  %v1172_v37 = vadd.f32 %v1171_v29, %v1010_v27  ;;  %v1175_v39 = vadd.f32 %v928_v35, %v162_v22 }
 0x15a   :  { %v1021_v40 = vadd.f32 %v1170_v32, %v1017_v28  ;;  %v1174_v41 = vadd.f32 %v1173_v34, %v1012_v31 }
 0x15b   :  { %v1022_v43 = vadd.f32 %v1172_v37, %v1018_v33  ;;  %v1176_v44 = vadd.f32 %v1175_v39, %v1014_v36 }
 0x15c   :  { %1025 = vst [vmem:[%s1857_s4] sm:$0xff] %v1021_v40  ;;  %v1023_v45 = vadd.f32 %v1174_v41, %v1019_v38 }
 0x15d   :  { %1026 = vst [vmem:[%s1857_s4 + $0x8] sm:$0xff] %v1022_v43  ;;  %v1024_v46 = vadd.f32 %v1176_v44, %v1020_v42 }
 0x15e   :  { %1027 = vst [vmem:[%s1857_s4 + $0x10] sm:$0xff] %v1023_v45 }
 0x15f   :  { %1028 = vst [vmem:[%s1857_s4 + $0x18] sm:$0xff] %v1024_v46 }

</bundles_post_ra>
